<compile_context>
chip_gen: v6e
topology: v6e:2x2x1
jax: 0.10.0
libtpu: 0.0.40
codegen_flags: <defaults>
</compile_context>

<pallas_src>
import functools
import math

import jax
import jax.numpy as jnp
from jax.experimental import pallas as pl
from jax.experimental.pallas import tpu as pltpu


# --------------------- Fully fused T2 forward kernel -------------------------

def _t2_kernel(
    x_ref, mem_ref,
    sa_wqkv_ref, sa_bqkv_ref, sa_wo_ref, sa_bo_ref,
    ca_wq_ref, ca_bq_ref, ca_wkv_ref, ca_bkv_ref, ca_wo_ref, ca_bo_ref,
    w1_ref, b1_ref, w2_ref, b2_ref,
    ln1_g_ref, ln1_b_ref, ln2_g_ref, ln2_b_ref, ln3_g_ref, ln3_b_ref,
    fc_w_ref, fc_b_ref,
    o_ref,
    *, num_layers, num_heads, eps):
  """One grid step = one batch element through ALL layers + fc, all in VMEM."""
  D = x_ref.shape[-1]
  H = num_heads
  dh = D // H
  scale = 1.0 / math.sqrt(dh)

  x = x_ref[0].astype(jnp.float32)      # (T, D)
  mem = mem_ref[0].astype(jnp.float32)  # (S, D)

  def layer_norm(y, g, b):
    mu = jnp.mean(y, axis=-1, keepdims=True)
    var = jnp.mean(jnp.square(y - mu), axis=-1, keepdims=True)
    return (y - mu) * jax.lax.rsqrt(var + eps) * g.astype(jnp.float32) \
        + b.astype(jnp.float32)

  def mha(q, k, v):
    # q: (Tq, D), k/v: (Skv, D).  One batched contraction over the head axis
    # (single MXU op for scores, single op for p@v) — no per-head Python loop.
    Tq, Skv = q.shape[0], k.shape[0]
    qh = jnp.transpose(q.reshape(Tq, H, dh), (1, 0, 2))    # (H, Tq, dh)
    kh = jnp.transpose(k.reshape(Skv, H, dh), (1, 0, 2))   # (H, Skv, dh)
    vh = jnp.transpose(v.reshape(Skv, H, dh), (1, 0, 2))   # (H, Skv, dh)
    s = jnp.einsum("htd,hsd->hts", qh, kh,
                   preferred_element_type=jnp.float32)     # (H, Tq, Skv)
    s = s - jnp.max(s, axis=-1, keepdims=True)
    p = jnp.exp(s)
    p = p / jnp.sum(p, axis=-1, keepdims=True)             # exact softmax
    o = jnp.einsum("hts,hsd->htd", p, vh,
                   preferred_element_type=jnp.float32)     # (H, Tq, dh)
    return jnp.transpose(o, (1, 0, 2)).reshape(Tq, D)      # (Tq, D)

  for l in range(num_layers):  # unrolled; x stays resident in VMEM/vregs
    # ---------------- self-attention (fused QKV projection) ----------------
    qkv = jnp.dot(x, sa_wqkv_ref[l].astype(jnp.float32),
                  preferred_element_type=jnp.float32)
    qkv = qkv + sa_bqkv_ref[l].astype(jnp.float32)         # (T, 3D)
    q = qkv[:, :D] * scale
    k = qkv[:, D:2 * D]
    v = qkv[:, 2 * D:]
    sa = mha(q, k, v)
    sa = jnp.dot(sa, sa_wo_ref[l].astype(jnp.float32),
                 preferred_element_type=jnp.float32) \
        + sa_bo_ref[l].astype(jnp.float32)
    x = layer_norm(x + sa, ln1_g_ref[l], ln1_b_ref[l])

    # --------------- cross-attention (fused KV projection) -----------------
    q = jnp.dot(x, ca_wq_ref[l].astype(jnp.float32),
                preferred_element_type=jnp.float32) \
        + ca_bq_ref[l].astype(jnp.float32)
    q = q * scale
    kv = jnp.dot(mem, ca_wkv_ref[l].astype(jnp.float32),
                 preferred_element_type=jnp.float32) \
        + ca_bkv_ref[l].astype(jnp.float32)                 # (S, 2D)
    k = kv[:, :D]
    v = kv[:, D:]
    ca = mha(q, k, v)
    ca = jnp.dot(ca, ca_wo_ref[l].astype(jnp.float32),
                 preferred_element_type=jnp.float32) \
        + ca_bo_ref[l].astype(jnp.float32)
    x = layer_norm(x + ca, ln2_g_ref[l], ln2_b_ref[l])

    # --------------------------- feed-forward ------------------------------
    h = jnp.dot(x, w1_ref[l].astype(jnp.float32),
                preferred_element_type=jnp.float32) + b1_ref[l].astype(jnp.float32)
    h = jnp.maximum(h, 0.0)
    h = jnp.dot(h, w2_ref[l].astype(jnp.float32),
                preferred_element_type=jnp.float32) + b2_ref[l].astype(jnp.float32)
    x = layer_norm(x + h, ln3_g_ref[l], ln3_b_ref[l])

  # ---------------- final fc (lane-dense padded output slab) ----------------
  out = jnp.dot(x, fc_w_ref[...].astype(jnp.float32),
                preferred_element_type=jnp.float32) + fc_b_ref[...].astype(jnp.float32)
  o_ref[0] = out.astype(o_ref.dtype)


def t2_forward(x, memory, params, *, num_heads, output_dim):
  """x: (T, B, D), memory: (S, B, D) -> (T, B, output_dim). ONE pallas_call."""
  T, B, D = x.shape
  S = memory.shape[0]
  L = params["sa_wqkv"].shape[0]
  F = params["w1"].shape[2]
  out_pad = params["fc_w"].shape[1]

  # Rearranged ONCE to batch-major so the kernel reads lane-dense (T, D) slabs.
  xb = jnp.transpose(x, (1, 0, 2))        # (B, T, D)
  mb = jnp.transpose(memory, (1, 0, 2))   # (B, S, D)

  def resident(shape):
    # Whole weight slab resident across the batch grid (fetched once).
    n = len(shape)
    return pl.BlockSpec(shape, lambda b, n=n: (0,) * n)

  kern = functools.partial(_t2_kernel, num_layers=L, num_heads=num_heads,
                           eps=1e-5)
  out = pl.pallas_call(
      kern,
      out_shape=jax.ShapeDtypeStruct((B, T, out_pad), x.dtype),
      grid=(B,),
      in_specs=[
          pl.BlockSpec((1, T, D), lambda b: (b, 0, 0)),
          pl.BlockSpec((1, S, D), lambda b: (b, 0, 0)),
          resident((L, D, 3 * D)), resident((L, 1, 3 * D)),
          resident((L, D, D)), resident((L, 1, D)),
          resident((L, D, D)), resident((L, 1, D)),
          resident((L, D, 2 * D)), resident((L, 1, 2 * D)),
          resident((L, D, D)), resident((L, 1, D)),
          resident((L, D, F)), resident((L, 1, F)),
          resident((L, F, D)), resident((L, 1, D)),
          resident((L, 1, D)), resident((L, 1, D)),
          resident((L, 1, D)), resident((L, 1, D)),
          resident((L, 1, D)), resident((L, 1, D)),
          resident((D, out_pad)), resident((1, out_pad)),
      ],
      out_specs=pl.BlockSpec((1, T, out_pad), lambda b: (b, 0, 0)),
      # v7x: two TensorCores each take a batch element; v5e/v6e: serial 2-step
      # loop (cheap next to the removed per-layer dispatches / HBM round trips).
      compiler_params=pltpu.CompilerParams(dimension_semantics=("parallel",)),
  )(xb, mb,
    params["sa_wqkv"], params["sa_bqkv"], params["sa_wo"], params["sa_bo"],
    params["ca_wq"], params["ca_bq"], params["ca_wkv"], params["ca_bkv"],
    params["ca_wo"], params["ca_bo"],
    params["w1"], params["b1"], params["w2"], params["b2"],
    params["ln1_g"], params["ln1_b"], params["ln2_g"], params["ln2_b"],
    params["ln3_g"], params["ln3_b"],
    params["fc_w"], params["fc_b"])

  # Drop the lane padding and return seq-major like the PyTorch module.
  return jnp.transpose(out[:, :, :output_dim], (1, 0, 2))   # (T, B, output_dim)


# ------------------------------- Param init -----------------------------------

def init_params(key, latent_dim, hidden_dim, output_dim, layers, num_heads):
  d, f = latent_dim, hidden_dim
  s = 1.0 / math.sqrt(d)

  def rnd(k, shape, scale):
    return jax.random.normal(k, shape, jnp.float32) * scale

  sa_wqkv, sa_wo, ca_wq, ca_wkv, ca_wo, w1, w2 = ([] for _ in range(7))
  for _ in range(layers):
    key, kq, kk, kv, ko, kcq, kck, kcv, kco, k1, k2 = jax.random.split(key, 11)
    sa_wqkv.append(jnp.concatenate(
        [rnd(kq, (d, d), s), rnd(kk, (d, d), s), rnd(kv, (d, d), s)], axis=1))
    sa_wo.append(rnd(ko, (d, d), s))
    ca_wq.append(rnd(kcq, (d, d), s))
    ca_wkv.append(jnp.concatenate(
        [rnd(kck, (d, d), s), rnd(kcv, (d, d), s)], axis=1))
    ca_wo.append(rnd(kco, (d, d), s))
    w1.append(rnd(k1, (d, f), s))
    w2.append(rnd(k2, (f, d), 1.0 / math.sqrt(f)))

  L = layers
  out_pad = ((output_dim + 127) // 128) * 128   # lane-dense fc output slab
  key, k_fc = jax.random.split(key)
  fc_w = jnp.zeros((d, out_pad), jnp.float32)
  fc_w = fc_w.at[:, :output_dim].set(rnd(k_fc, (d, output_dim), s))

  return {
      "sa_wqkv": jnp.stack(sa_wqkv),
      "sa_bqkv": jnp.zeros((L, 1, 3 * d), jnp.float32),
      "sa_wo": jnp.stack(sa_wo), "sa_bo": jnp.zeros((L, 1, d), jnp.float32),
      "ca_wq": jnp.stack(ca_wq), "ca_bq": jnp.zeros((L, 1, d), jnp.float32),
      "ca_wkv": jnp.stack(ca_wkv),
      "ca_bkv": jnp.zeros((L, 1, 2 * d), jnp.float32),
      "ca_wo": jnp.stack(ca_wo), "ca_bo": jnp.zeros((L, 1, d), jnp.float32),
      "w1": jnp.stack(w1), "b1": jnp.zeros((L, 1, f), jnp.float32),
      "w2": jnp.stack(w2), "b2": jnp.zeros((L, 1, d), jnp.float32),
      "ln1_g": jnp.ones((L, 1, d), jnp.float32),
      "ln1_b": jnp.zeros((L, 1, d), jnp.float32),
      "ln2_g": jnp.ones((L, 1, d), jnp.float32),
      "ln2_b": jnp.zeros((L, 1, d), jnp.float32),
      "ln3_g": jnp.ones((L, 1, d), jnp.float32),
      "ln3_b": jnp.zeros((L, 1, d), jnp.float32),
      "fc_w": fc_w, "fc_b": jnp.zeros((1, out_pad), jnp.float32),
  }


# ----------------------------------- Main --------------------------------------

if __name__ == "__main__":
  latent_dim = 32     # must be divisible by num_heads
  hidden_dim = 64
  output_dim = 16
  num_layers = 2
  num_heads = 4
  T, S, B = 8, 8, 2

  key = jax.random.PRNGKey(0)
  k_x, k_m, k_p = jax.random.split(key, 3)
  x = jax.random.normal(k_x, (T, B, latent_dim), jnp.float32)
  memory = jax.random.normal(k_m, (S, B, latent_dim), jnp.float32)
  params = init_params(k_p, latent_dim, hidden_dim, output_dim, num_layers,
                       num_heads)

  fwd = jax.jit(functools.partial(t2_forward, num_heads=num_heads,
                                  output_dim=output_dim))
  out = fwd(x, memory, params)
  jax.block_until_ready(out)
  assert out.shape == (T, B, output_dim), out.shape
  assert bool(jnp.all(jnp.isfinite(out)))
  print("KERNEL_OK")
</pallas_src>

<mosaic_0001>
module attributes {stable_mosaic.version = 11 : i64} {
  func.func @_t2_kernel(%arg0: i32, %arg1: memref<1x8x32xf32, #tpu.memory_space<vmem>>, %arg2: memref<1x8x32xf32, #tpu.memory_space<vmem>>, %arg3: memref<2x32x96xf32, #tpu.memory_space<vmem>>, %arg4: memref<2x1x96xf32, #tpu.memory_space<vmem>>, %arg5: memref<2x32x32xf32, #tpu.memory_space<vmem>>, %arg6: memref<2x1x32xf32, #tpu.memory_space<vmem>>, %arg7: memref<2x32x32xf32, #tpu.memory_space<vmem>>, %arg8: memref<2x1x32xf32, #tpu.memory_space<vmem>>, %arg9: memref<2x32x64xf32, #tpu.memory_space<vmem>>, %arg10: memref<2x1x64xf32, #tpu.memory_space<vmem>>, %arg11: memref<2x32x32xf32, #tpu.memory_space<vmem>>, %arg12: memref<2x1x32xf32, #tpu.memory_space<vmem>>, %arg13: memref<2x32x64xf32, #tpu.memory_space<vmem>>, %arg14: memref<2x1x64xf32, #tpu.memory_space<vmem>>, %arg15: memref<2x64x32xf32, #tpu.memory_space<vmem>>, %arg16: memref<2x1x32xf32, #tpu.memory_space<vmem>>, %arg17: memref<2x1x32xf32, #tpu.memory_space<vmem>>, %arg18: memref<2x1x32xf32, #tpu.memory_space<vmem>>, %arg19: memref<2x1x32xf32, #tpu.memory_space<vmem>>, %arg20: memref<2x1x32xf32, #tpu.memory_space<vmem>>, %arg21: memref<2x1x32xf32, #tpu.memory_space<vmem>>, %arg22: memref<2x1x32xf32, #tpu.memory_space<vmem>>, %arg23: memref<32x128xf32, #tpu.memory_space<vmem>>, %arg24: memref<1x128xf32, #tpu.memory_space<vmem>>, %arg25: memref<1x8x128xf32, #tpu.memory_space<vmem>>) attributes {dimension_semantics = [#tpu.dimension_semantics<parallel>], iteration_bounds = array<i64: 2>, scalar_prefetch = 0 : i64, scratch_operands = 0 : i64, tpu.core_type = #tpu.core_type<tc>, window_params = [{transform_indices = @transform_0, window_bounds = array<i64: 1, 8, 32>}, {transform_indices = @transform_1, window_bounds = array<i64: 1, 8, 32>}, {pipeline_mode = #tpu.pipeline_mode<synchronous>, transform_indices = @transform_2, window_bounds = array<i64: 2, 32, 96>}, {pipeline_mode = #tpu.pipeline_mode<synchronous>, transform_indices = @transform_3, window_bounds = array<i64: 2, 1, 96>}, {pipeline_mode = #tpu.pipeline_mode<synchronous>, transform_indices = @transform_4, window_bounds = array<i64: 2, 32, 32>}, {pipeline_mode = #tpu.pipeline_mode<synchronous>, transform_indices = @transform_5, window_bounds = array<i64: 2, 1, 32>}, {pipeline_mode = #tpu.pipeline_mode<synchronous>, transform_indices = @transform_6, window_bounds = array<i64: 2, 32, 32>}, {pipeline_mode = #tpu.pipeline_mode<synchronous>, transform_indices = @transform_7, window_bounds = array<i64: 2, 1, 32>}, {pipeline_mode = #tpu.pipeline_mode<synchronous>, transform_indices = @transform_8, window_bounds = array<i64: 2, 32, 64>}, {pipeline_mode = #tpu.pipeline_mode<synchronous>, transform_indices = @transform_9, window_bounds = array<i64: 2, 1, 64>}, {pipeline_mode = #tpu.pipeline_mode<synchronous>, transform_indices = @transform_10, window_bounds = array<i64: 2, 32, 32>}, {pipeline_mode = #tpu.pipeline_mode<synchronous>, transform_indices = @transform_11, window_bounds = array<i64: 2, 1, 32>}, {pipeline_mode = #tpu.pipeline_mode<synchronous>, transform_indices = @transform_12, window_bounds = array<i64: 2, 32, 64>}, {pipeline_mode = #tpu.pipeline_mode<synchronous>, transform_indices = @transform_13, window_bounds = array<i64: 2, 1, 64>}, {pipeline_mode = #tpu.pipeline_mode<synchronous>, transform_indices = @transform_14, window_bounds = array<i64: 2, 64, 32>}, {pipeline_mode = #tpu.pipeline_mode<synchronous>, transform_indices = @transform_15, window_bounds = array<i64: 2, 1, 32>}, {pipeline_mode = #tpu.pipeline_mode<synchronous>, transform_indices = @transform_16, window_bounds = array<i64: 2, 1, 32>}, {pipeline_mode = #tpu.pipeline_mode<synchronous>, transform_indices = @transform_17, window_bounds = array<i64: 2, 1, 32>}, {pipeline_mode = #tpu.pipeline_mode<synchronous>, transform_indices = @transform_18, window_bounds = array<i64: 2, 1, 32>}, {pipeline_mode = #tpu.pipeline_mode<synchronous>, transform_indices = @transform_19, window_bounds = array<i64: 2, 1, 32>}, {pipeline_mode = #tpu.pipeline_mode<synchronous>, transform_indices = @transform_20, window_bounds = array<i64: 2, 1, 32>}, {pipeline_mode = #tpu.pipeline_mode<synchronous>, transform_indices = @transform_21, window_bounds = array<i64: 2, 1, 32>}, {pipeline_mode = #tpu.pipeline_mode<synchronous>, transform_indices = @transform_22, window_bounds = array<i64: 32, 128>}, {pipeline_mode = #tpu.pipeline_mode<synchronous>, transform_indices = @transform_23, window_bounds = array<i64: 1, 128>}, {transform_indices = @transform_24, window_bounds = array<i64: 1, 8, 128>}]} {
    %c0 = arith.constant 0 : index
    %c0_0 = arith.constant 0 : index
    %c0_1 = arith.constant 0 : index
    %0 = vector.load %arg1[%c0, %c0_0, %c0_1] : memref<1x8x32xf32, #tpu.memory_space<vmem>>, vector<1x8x32xf32>
    %1 = vector.shape_cast %0 : vector<1x8x32xf32> to vector<8x32xf32>
    %c0_2 = arith.constant 0 : index
    %c0_3 = arith.constant 0 : index
    %c0_4 = arith.constant 0 : index
    %2 = vector.load %arg2[%c0_2, %c0_3, %c0_4] : memref<1x8x32xf32, #tpu.memory_space<vmem>>, vector<1x8x32xf32>
    %3 = vector.shape_cast %2 : vector<1x8x32xf32> to vector<8x32xf32>
    %c0_5 = arith.constant 0 : index
    %c0_6 = arith.constant 0 : index
    %c0_7 = arith.constant 0 : index
    %4 = vector.load %arg3[%c0_5, %c0_6, %c0_7] : memref<2x32x96xf32, #tpu.memory_space<vmem>>, vector<1x32x96xf32>
    %5 = vector.shape_cast %4 : vector<1x32x96xf32> to vector<32x96xf32>
    %cst = arith.constant dense<0.000000e+00> : vector<8x96xf32>
    %6 = tpu.matmul %1, %5, %cst {dimension_numbers = #tpu.dot_dimension_numbers<[1], [0], [0], [1], [0, 0, 1, 1], [], []>} : vector<8x32xf32>, vector<32x96xf32>, vector<8x96xf32> -> vector<8x96xf32>
    %c0_8 = arith.constant 0 : index
    %c0_9 = arith.constant 0 : index
    %c0_10 = arith.constant 0 : index
    %7 = vector.load %arg4[%c0_8, %c0_9, %c0_10] : memref<2x1x96xf32, #tpu.memory_space<vmem>>, vector<1x1x96xf32>
    %8 = vector.shape_cast %7 : vector<1x1x96xf32> to vector<1x96xf32>
    %9 = vector.broadcast %8 : vector<1x96xf32> to vector<8x96xf32>
    %10 = arith.addf %6, %9 : vector<8x96xf32>
    %11 = vector.extract_strided_slice %10 {offsets = [0, 0], sizes = [8, 32], strides = [1, 1]} : vector<8x96xf32> to vector<8x32xf32>
    %cst_11 = arith.constant 0.353553385 : f32
    %12 = vector.broadcast %cst_11 : f32 to vector<8x32xf32>
    %13 = arith.mulf %11, %12 : vector<8x32xf32>
    %14 = vector.extract_strided_slice %10 {offsets = [0, 32], sizes = [8, 32], strides = [1, 1]} : vector<8x96xf32> to vector<8x32xf32>
    %15 = vector.extract_strided_slice %10 {offsets = [0, 64], sizes = [8, 32], strides = [1, 1]} : vector<8x96xf32> to vector<8x32xf32>
    %16 = vector.shape_cast %13 : vector<8x32xf32> to vector<8x4x8xf32>
    %17 = tpu.transpose %16, [1, 0, 2] : vector<8x4x8xf32> -> vector<4x8x8xf32>
    %18 = vector.shape_cast %14 : vector<8x32xf32> to vector<8x4x8xf32>
    %19 = tpu.transpose %18, [1, 0, 2] : vector<8x4x8xf32> -> vector<4x8x8xf32>
    %20 = vector.shape_cast %15 : vector<8x32xf32> to vector<8x4x8xf32>
    %21 = tpu.transpose %20, [1, 0, 2] : vector<8x4x8xf32> -> vector<4x8x8xf32>
    "tpu.trace_start"() <{level = 10 : i32, message = "htd,hsd->hts"}> : () -> ()
    %cst_12 = arith.constant dense<0.000000e+00> : vector<4x8x8xf32>
    %22 = tpu.matmul %17, %19, %cst_12 {dimension_numbers = #tpu.dot_dimension_numbers<[2], [2], [1], [1], [0, 0, 0, 1, 1, 1], [0], [0]>} : vector<4x8x8xf32>, vector<4x8x8xf32>, vector<4x8x8xf32> -> vector<4x8x8xf32>
    "tpu.trace_stop"() : () -> ()
    %cst_13 = arith.constant dense<0xFF800000> : vector<4x8xf32>
    %23 = vector.multi_reduction <maximumf>, %22, %cst_13 [2] : vector<4x8x8xf32> to vector<4x8xf32>
    %24 = vector.shape_cast %23 : vector<4x8xf32> to vector<4x8x1xf32>
    %25 = vector.broadcast %24 : vector<4x8x1xf32> to vector<4x8x8xf32>
    %26 = arith.subf %22, %25 : vector<4x8x8xf32>
    %27 = math.exp %26 : vector<4x8x8xf32>
    %cst_14 = arith.constant dense<0.000000e+00> : vector<4x8xf32>
    %28 = vector.multi_reduction <add>, %27, %cst_14 [2] : vector<4x8x8xf32> to vector<4x8xf32>
    %29 = vector.shape_cast %28 : vector<4x8xf32> to vector<4x8x1xf32>
    %30 = vector.broadcast %29 : vector<4x8x1xf32> to vector<4x8x8xf32>
    %31 = arith.divf %27, %30 : vector<4x8x8xf32>
    "tpu.trace_start"() <{level = 10 : i32, message = "hts,hsd->htd"}> : () -> ()
    %cst_15 = arith.constant dense<0.000000e+00> : vector<4x8x8xf32>
    %32 = tpu.matmul %31, %21, %cst_15 {dimension_numbers = #tpu.dot_dimension_numbers<[2], [1], [1], [2], [0, 0, 0, 1, 1, 2], [0], [0]>} : vector<4x8x8xf32>, vector<4x8x8xf32>, vector<4x8x8xf32> -> vector<4x8x8xf32>
    "tpu.trace_stop"() : () -> ()
    %33 = tpu.transpose %32, [1, 0, 2] : vector<4x8x8xf32> -> vector<8x4x8xf32>
    %34 = vector.shape_cast %33 : vector<8x4x8xf32> to vector<8x32xf32>
    %c0_16 = arith.constant 0 : index
    %c0_17 = arith.constant 0 : index
    %c0_18 = arith.constant 0 : index
    %35 = vector.load %arg5[%c0_16, %c0_17, %c0_18] : memref<2x32x32xf32, #tpu.memory_space<vmem>>, vector<1x32x32xf32>
    %36 = vector.shape_cast %35 : vector<1x32x32xf32> to vector<32x32xf32>
    %cst_19 = arith.constant dense<0.000000e+00> : vector<8x32xf32>
    %37 = tpu.matmul %34, %36, %cst_19 {dimension_numbers = #tpu.dot_dimension_numbers<[1], [0], [0], [1], [0, 0, 1, 1], [], []>} : vector<8x32xf32>, vector<32x32xf32>, vector<8x32xf32> -> vector<8x32xf32>
    %c0_20 = arith.constant 0 : index
    %c0_21 = arith.constant 0 : index
    %c0_22 = arith.constant 0 : index
    %38 = vector.load %arg6[%c0_20, %c0_21, %c0_22] : memref<2x1x32xf32, #tpu.memory_space<vmem>>, vector<1x1x32xf32>
    %39 = vector.shape_cast %38 : vector<1x1x32xf32> to vector<1x32xf32>
    %40 = vector.broadcast %39 : vector<1x32xf32> to vector<8x32xf32>
    %41 = arith.addf %37, %40 : vector<8x32xf32>
    %42 = arith.addf %1, %41 : vector<8x32xf32>
    %c0_23 = arith.constant 0 : index
    %c0_24 = arith.constant 0 : index
    %c0_25 = arith.constant 0 : index
    %43 = vector.load %arg17[%c0_23, %c0_24, %c0_25] : memref<2x1x32xf32, #tpu.memory_space<vmem>>, vector<1x1x32xf32>
    %44 = vector.shape_cast %43 : vector<1x1x32xf32> to vector<1x32xf32>
    %c0_26 = arith.constant 0 : index
    %c0_27 = arith.constant 0 : index
    %c0_28 = arith.constant 0 : index
    %45 = vector.load %arg18[%c0_26, %c0_27, %c0_28] : memref<2x1x32xf32, #tpu.memory_space<vmem>>, vector<1x1x32xf32>
    %46 = vector.shape_cast %45 : vector<1x1x32xf32> to vector<1x32xf32>
    %cst_29 = arith.constant dense<0.000000e+00> : vector<8xf32>
    %47 = vector.multi_reduction <add>, %42, %cst_29 [1] : vector<8x32xf32> to vector<8xf32>
    %48 = vector.shape_cast %47 : vector<8xf32> to vector<8x1xf32>
    %cst_30 = arith.constant 3.200000e+01 : f32
    %49 = vector.broadcast %cst_30 : f32 to vector<8x1xf32>
    %50 = arith.divf %48, %49 : vector<8x1xf32>
    %51 = vector.broadcast %50 : vector<8x1xf32> to vector<8x32xf32>
    %52 = arith.subf %42, %51 : vector<8x32xf32>
    %53 = arith.mulf %52, %52 : vector<8x32xf32>
    %cst_31 = arith.constant dense<0.000000e+00> : vector<8xf32>
    %54 = vector.multi_reduction <add>, %53, %cst_31 [1] : vector<8x32xf32> to vector<8xf32>
    %55 = vector.shape_cast %54 : vector<8xf32> to vector<8x1xf32>
    %cst_32 = arith.constant 3.200000e+01 : f32
    %56 = vector.broadcast %cst_32 : f32 to vector<8x1xf32>
    %57 = arith.divf %55, %56 : vector<8x1xf32>
    %58 = vector.broadcast %50 : vector<8x1xf32> to vector<8x32xf32>
    %59 = arith.subf %42, %58 : vector<8x32xf32>
    %cst_33 = arith.constant 9.99999974E-6 : f32
    %60 = vector.broadcast %cst_33 : f32 to vector<8x1xf32>
    %61 = arith.addf %57, %60 : vector<8x1xf32>
    %62 = math.rsqrt %61 : vector<8x1xf32>
    %63 = vector.broadcast %62 : vector<8x1xf32> to vector<8x32xf32>
    %64 = arith.mulf %59, %63 : vector<8x32xf32>
    %65 = vector.broadcast %44 : vector<1x32xf32> to vector<8x32xf32>
    %66 = arith.mulf %64, %65 : vector<8x32xf32>
    %67 = vector.broadcast %46 : vector<1x32xf32> to vector<8x32xf32>
    %68 = arith.addf %66, %67 : vector<8x32xf32>
    %c0_34 = arith.constant 0 : index
    %c0_35 = arith.constant 0 : index
    %c0_36 = arith.constant 0 : index
    %69 = vector.load %arg7[%c0_34, %c0_35, %c0_36] : memref<2x32x32xf32, #tpu.memory_space<vmem>>, vector<1x32x32xf32>
    %70 = vector.shape_cast %69 : vector<1x32x32xf32> to vector<32x32xf32>
    %cst_37 = arith.constant dense<0.000000e+00> : vector<8x32xf32>
    %71 = tpu.matmul %68, %70, %cst_37 {dimension_numbers = #tpu.dot_dimension_numbers<[1], [0], [0], [1], [0, 0, 1, 1], [], []>} : vector<8x32xf32>, vector<32x32xf32>, vector<8x32xf32> -> vector<8x32xf32>
    %c0_38 = arith.constant 0 : index
    %c0_39 = arith.constant 0 : index
    %c0_40 = arith.constant 0 : index
    %72 = vector.load %arg8[%c0_38, %c0_39, %c0_40] : memref<2x1x32xf32, #tpu.memory_space<vmem>>, vector<1x1x32xf32>
    %73 = vector.shape_cast %72 : vector<1x1x32xf32> to vector<1x32xf32>
    %74 = vector.broadcast %73 : vector<1x32xf32> to vector<8x32xf32>
    %75 = arith.addf %71, %74 : vector<8x32xf32>
    %cst_41 = arith.constant 0.353553385 : f32
    %76 = vector.broadcast %cst_41 : f32 to vector<8x32xf32>
    %77 = arith.mulf %75, %76 : vector<8x32xf32>
    %c0_42 = arith.constant 0 : index
    %c0_43 = arith.constant 0 : index
    %c0_44 = arith.constant 0 : index
    %78 = vector.load %arg9[%c0_42, %c0_43, %c0_44] : memref<2x32x64xf32, #tpu.memory_space<vmem>>, vector<1x32x64xf32>
    %79 = vector.shape_cast %78 : vector<1x32x64xf32> to vector<32x64xf32>
    %cst_45 = arith.constant dense<0.000000e+00> : vector<8x64xf32>
    %80 = tpu.matmul %3, %79, %cst_45 {dimension_numbers = #tpu.dot_dimension_numbers<[1], [0], [0], [1], [0, 0, 1, 1], [], []>} : vector<8x32xf32>, vector<32x64xf32>, vector<8x64xf32> -> vector<8x64xf32>
    %c0_46 = arith.constant 0 : index
    %c0_47 = arith.constant 0 : index
    %c0_48 = arith.constant 0 : index
    %81 = vector.load %arg10[%c0_46, %c0_47, %c0_48] : memref<2x1x64xf32, #tpu.memory_space<vmem>>, vector<1x1x64xf32>
    %82 = vector.shape_cast %81 : vector<1x1x64xf32> to vector<1x64xf32>
    %83 = vector.broadcast %82 : vector<1x64xf32> to vector<8x64xf32>
    %84 = arith.addf %80, %83 : vector<8x64xf32>
    %85 = vector.extract_strided_slice %84 {offsets = [0, 0], sizes = [8, 32], strides = [1, 1]} : vector<8x64xf32> to vector<8x32xf32>
    %86 = vector.extract_strided_slice %84 {offsets = [0, 32], sizes = [8, 32], strides = [1, 1]} : vector<8x64xf32> to vector<8x32xf32>
    %87 = vector.shape_cast %77 : vector<8x32xf32> to vector<8x4x8xf32>
    %88 = tpu.transpose %87, [1, 0, 2] : vector<8x4x8xf32> -> vector<4x8x8xf32>
    %89 = vector.shape_cast %85 : vector<8x32xf32> to vector<8x4x8xf32>
    %90 = tpu.transpose %89, [1, 0, 2] : vector<8x4x8xf32> -> vector<4x8x8xf32>
    %91 = vector.shape_cast %86 : vector<8x32xf32> to vector<8x4x8xf32>
    %92 = tpu.transpose %91, [1, 0, 2] : vector<8x4x8xf32> -> vector<4x8x8xf32>
    "tpu.trace_start"() <{level = 10 : i32, message = "htd,hsd->hts"}> : () -> ()
    %cst_49 = arith.constant dense<0.000000e+00> : vector<4x8x8xf32>
    %93 = tpu.matmul %88, %90, %cst_49 {dimension_numbers = #tpu.dot_dimension_numbers<[2], [2], [1], [1], [0, 0, 0, 1, 1, 1], [0], [0]>} : vector<4x8x8xf32>, vector<4x8x8xf32>, vector<4x8x8xf32> -> vector<4x8x8xf32>
    "tpu.trace_stop"() : () -> ()
    %cst_50 = arith.constant dense<0xFF800000> : vector<4x8xf32>
    %94 = vector.multi_reduction <maximumf>, %93, %cst_50 [2] : vector<4x8x8xf32> to vector<4x8xf32>
    %95 = vector.shape_cast %94 : vector<4x8xf32> to vector<4x8x1xf32>
    %96 = vector.broadcast %95 : vector<4x8x1xf32> to vector<4x8x8xf32>
    %97 = arith.subf %93, %96 : vector<4x8x8xf32>
    %98 = math.exp %97 : vector<4x8x8xf32>
    %cst_51 = arith.constant dense<0.000000e+00> : vector<4x8xf32>
    %99 = vector.multi_reduction <add>, %98, %cst_51 [2] : vector<4x8x8xf32> to vector<4x8xf32>
    %100 = vector.shape_cast %99 : vector<4x8xf32> to vector<4x8x1xf32>
    %101 = vector.broadcast %100 : vector<4x8x1xf32> to vector<4x8x8xf32>
    %102 = arith.divf %98, %101 : vector<4x8x8xf32>
    "tpu.trace_start"() <{level = 10 : i32, message = "hts,hsd->htd"}> : () -> ()
    %cst_52 = arith.constant dense<0.000000e+00> : vector<4x8x8xf32>
    %103 = tpu.matmul %102, %92, %cst_52 {dimension_numbers = #tpu.dot_dimension_numbers<[2], [1], [1], [2], [0, 0, 0, 1, 1, 2], [0], [0]>} : vector<4x8x8xf32>, vector<4x8x8xf32>, vector<4x8x8xf32> -> vector<4x8x8xf32>
    "tpu.trace_stop"() : () -> ()
    %104 = tpu.transpose %103, [1, 0, 2] : vector<4x8x8xf32> -> vector<8x4x8xf32>
    %105 = vector.shape_cast %104 : vector<8x4x8xf32> to vector<8x32xf32>
    %c0_53 = arith.constant 0 : index
    %c0_54 = arith.constant 0 : index
    %c0_55 = arith.constant 0 : index
    %106 = vector.load %arg11[%c0_53, %c0_54, %c0_55] : memref<2x32x32xf32, #tpu.memory_space<vmem>>, vector<1x32x32xf32>
    %107 = vector.shape_cast %106 : vector<1x32x32xf32> to vector<32x32xf32>
    %cst_56 = arith.constant dense<0.000000e+00> : vector<8x32xf32>
    %108 = tpu.matmul %105, %107, %cst_56 {dimension_numbers = #tpu.dot_dimension_numbers<[1], [0], [0], [1], [0, 0, 1, 1], [], []>} : vector<8x32xf32>, vector<32x32xf32>, vector<8x32xf32> -> vector<8x32xf32>
    %c0_57 = arith.constant 0 : index
    %c0_58 = arith.constant 0 : index
    %c0_59 = arith.constant 0 : index
    %109 = vector.load %arg12[%c0_57, %c0_58, %c0_59] : memref<2x1x32xf32, #tpu.memory_space<vmem>>, vector<1x1x32xf32>
    %110 = vector.shape_cast %109 : vector<1x1x32xf32> to vector<1x32xf32>
    %111 = vector.broadcast %110 : vector<1x32xf32> to vector<8x32xf32>
    %112 = arith.addf %108, %111 : vector<8x32xf32>
    %113 = arith.addf %68, %112 : vector<8x32xf32>
    %c0_60 = arith.constant 0 : index
    %c0_61 = arith.constant 0 : index
    %c0_62 = arith.constant 0 : index
    %114 = vector.load %arg19[%c0_60, %c0_61, %c0_62] : memref<2x1x32xf32, #tpu.memory_space<vmem>>, vector<1x1x32xf32>
    %115 = vector.shape_cast %114 : vector<1x1x32xf32> to vector<1x32xf32>
    %c0_63 = arith.constant 0 : index
    %c0_64 = arith.constant 0 : index
    %c0_65 = arith.constant 0 : index
    %116 = vector.load %arg20[%c0_63, %c0_64, %c0_65] : memref<2x1x32xf32, #tpu.memory_space<vmem>>, vector<1x1x32xf32>
    %117 = vector.shape_cast %116 : vector<1x1x32xf32> to vector<1x32xf32>
    %cst_66 = arith.constant dense<0.000000e+00> : vector<8xf32>
    %118 = vector.multi_reduction <add>, %113, %cst_66 [1] : vector<8x32xf32> to vector<8xf32>
    %119 = vector.shape_cast %118 : vector<8xf32> to vector<8x1xf32>
    %cst_67 = arith.constant 3.200000e+01 : f32
    %120 = vector.broadcast %cst_67 : f32 to vector<8x1xf32>
    %121 = arith.divf %119, %120 : vector<8x1xf32>
    %122 = vector.broadcast %121 : vector<8x1xf32> to vector<8x32xf32>
    %123 = arith.subf %113, %122 : vector<8x32xf32>
    %124 = arith.mulf %123, %123 : vector<8x32xf32>
    %cst_68 = arith.constant dense<0.000000e+00> : vector<8xf32>
    %125 = vector.multi_reduction <add>, %124, %cst_68 [1] : vector<8x32xf32> to vector<8xf32>
    %126 = vector.shape_cast %125 : vector<8xf32> to vector<8x1xf32>
    %cst_69 = arith.constant 3.200000e+01 : f32
    %127 = vector.broadcast %cst_69 : f32 to vector<8x1xf32>
    %128 = arith.divf %126, %127 : vector<8x1xf32>
    %129 = vector.broadcast %121 : vector<8x1xf32> to vector<8x32xf32>
    %130 = arith.subf %113, %129 : vector<8x32xf32>
    %cst_70 = arith.constant 9.99999974E-6 : f32
    %131 = vector.broadcast %cst_70 : f32 to vector<8x1xf32>
    %132 = arith.addf %128, %131 : vector<8x1xf32>
    %133 = math.rsqrt %132 : vector<8x1xf32>
    %134 = vector.broadcast %133 : vector<8x1xf32> to vector<8x32xf32>
    %135 = arith.mulf %130, %134 : vector<8x32xf32>
    %136 = vector.broadcast %115 : vector<1x32xf32> to vector<8x32xf32>
    %137 = arith.mulf %135, %136 : vector<8x32xf32>
    %138 = vector.broadcast %117 : vector<1x32xf32> to vector<8x32xf32>
    %139 = arith.addf %137, %138 : vector<8x32xf32>
    %c0_71 = arith.constant 0 : index
    %c0_72 = arith.constant 0 : index
    %c0_73 = arith.constant 0 : index
    %140 = vector.load %arg13[%c0_71, %c0_72, %c0_73] : memref<2x32x64xf32, #tpu.memory_space<vmem>>, vector<1x32x64xf32>
    %141 = vector.shape_cast %140 : vector<1x32x64xf32> to vector<32x64xf32>
    %cst_74 = arith.constant dense<0.000000e+00> : vector<8x64xf32>
    %142 = tpu.matmul %139, %141, %cst_74 {dimension_numbers = #tpu.dot_dimension_numbers<[1], [0], [0], [1], [0, 0, 1, 1], [], []>} : vector<8x32xf32>, vector<32x64xf32>, vector<8x64xf32> -> vector<8x64xf32>
    %c0_75 = arith.constant 0 : index
    %c0_76 = arith.constant 0 : index
    %c0_77 = arith.constant 0 : index
    %143 = vector.load %arg14[%c0_75, %c0_76, %c0_77] : memref<2x1x64xf32, #tpu.memory_space<vmem>>, vector<1x1x64xf32>
    %144 = vector.shape_cast %143 : vector<1x1x64xf32> to vector<1x64xf32>
    %145 = vector.broadcast %144 : vector<1x64xf32> to vector<8x64xf32>
    %146 = arith.addf %142, %145 : vector<8x64xf32>
    %cst_78 = arith.constant 0.000000e+00 : f32
    %147 = vector.broadcast %cst_78 : f32 to vector<8x64xf32>
    %148 = arith.maximumf %146, %147 : vector<8x64xf32>
    %c0_79 = arith.constant 0 : index
    %c0_80 = arith.constant 0 : index
    %c0_81 = arith.constant 0 : index
    %149 = vector.load %arg15[%c0_79, %c0_80, %c0_81] : memref<2x64x32xf32, #tpu.memory_space<vmem>>, vector<1x64x32xf32>
    %150 = vector.shape_cast %149 : vector<1x64x32xf32> to vector<64x32xf32>
    %cst_82 = arith.constant dense<0.000000e+00> : vector<8x32xf32>
    %151 = tpu.matmul %148, %150, %cst_82 {dimension_numbers = #tpu.dot_dimension_numbers<[1], [0], [0], [1], [0, 0, 1, 1], [], []>} : vector<8x64xf32>, vector<64x32xf32>, vector<8x32xf32> -> vector<8x32xf32>
    %c0_83 = arith.constant 0 : index
    %c0_84 = arith.constant 0 : index
    %c0_85 = arith.constant 0 : index
    %152 = vector.load %arg16[%c0_83, %c0_84, %c0_85] : memref<2x1x32xf32, #tpu.memory_space<vmem>>, vector<1x1x32xf32>
    %153 = vector.shape_cast %152 : vector<1x1x32xf32> to vector<1x32xf32>
    %154 = vector.broadcast %153 : vector<1x32xf32> to vector<8x32xf32>
    %155 = arith.addf %151, %154 : vector<8x32xf32>
    %156 = arith.addf %139, %155 : vector<8x32xf32>
    %c0_86 = arith.constant 0 : index
    %c0_87 = arith.constant 0 : index
    %c0_88 = arith.constant 0 : index
    %157 = vector.load %arg21[%c0_86, %c0_87, %c0_88] : memref<2x1x32xf32, #tpu.memory_space<vmem>>, vector<1x1x32xf32>
    %158 = vector.shape_cast %157 : vector<1x1x32xf32> to vector<1x32xf32>
    %c0_89 = arith.constant 0 : index
    %c0_90 = arith.constant 0 : index
    %c0_91 = arith.constant 0 : index
    %159 = vector.load %arg22[%c0_89, %c0_90, %c0_91] : memref<2x1x32xf32, #tpu.memory_space<vmem>>, vector<1x1x32xf32>
    %160 = vector.shape_cast %159 : vector<1x1x32xf32> to vector<1x32xf32>
    %cst_92 = arith.constant dense<0.000000e+00> : vector<8xf32>
    %161 = vector.multi_reduction <add>, %156, %cst_92 [1] : vector<8x32xf32> to vector<8xf32>
    %162 = vector.shape_cast %161 : vector<8xf32> to vector<8x1xf32>
    %cst_93 = arith.constant 3.200000e+01 : f32
    %163 = vector.broadcast %cst_93 : f32 to vector<8x1xf32>
    %164 = arith.divf %162, %163 : vector<8x1xf32>
    %165 = vector.broadcast %164 : vector<8x1xf32> to vector<8x32xf32>
    %166 = arith.subf %156, %165 : vector<8x32xf32>
    %167 = arith.mulf %166, %166 : vector<8x32xf32>
    %cst_94 = arith.constant dense<0.000000e+00> : vector<8xf32>
    %168 = vector.multi_reduction <add>, %167, %cst_94 [1] : vector<8x32xf32> to vector<8xf32>
    %169 = vector.shape_cast %168 : vector<8xf32> to vector<8x1xf32>
    %cst_95 = arith.constant 3.200000e+01 : f32
    %170 = vector.broadcast %cst_95 : f32 to vector<8x1xf32>
    %171 = arith.divf %169, %170 : vector<8x1xf32>
    %172 = vector.broadcast %164 : vector<8x1xf32> to vector<8x32xf32>
    %173 = arith.subf %156, %172 : vector<8x32xf32>
    %cst_96 = arith.constant 9.99999974E-6 : f32
    %174 = vector.broadcast %cst_96 : f32 to vector<8x1xf32>
    %175 = arith.addf %171, %174 : vector<8x1xf32>
    %176 = math.rsqrt %175 : vector<8x1xf32>
    %177 = vector.broadcast %176 : vector<8x1xf32> to vector<8x32xf32>
    %178 = arith.mulf %173, %177 : vector<8x32xf32>
    %179 = vector.broadcast %158 : vector<1x32xf32> to vector<8x32xf32>
    %180 = arith.mulf %178, %179 : vector<8x32xf32>
    %181 = vector.broadcast %160 : vector<1x32xf32> to vector<8x32xf32>
    %182 = arith.addf %180, %181 : vector<8x32xf32>
    %c1 = arith.constant 1 : index
    %c0_97 = arith.constant 0 : index
    %c0_98 = arith.constant 0 : index
    %183 = vector.load %arg3[%c1, %c0_97, %c0_98] : memref<2x32x96xf32, #tpu.memory_space<vmem>>, vector<1x32x96xf32>
    %184 = vector.shape_cast %183 : vector<1x32x96xf32> to vector<32x96xf32>
    %cst_99 = arith.constant dense<0.000000e+00> : vector<8x96xf32>
    %185 = tpu.matmul %182, %184, %cst_99 {dimension_numbers = #tpu.dot_dimension_numbers<[1], [0], [0], [1], [0, 0, 1, 1], [], []>} : vector<8x32xf32>, vector<32x96xf32>, vector<8x96xf32> -> vector<8x96xf32>
    %c1_100 = arith.constant 1 : index
    %c0_101 = arith.constant 0 : index
    %c0_102 = arith.constant 0 : index
    %186 = vector.load %arg4[%c1_100, %c0_101, %c0_102] : memref<2x1x96xf32, #tpu.memory_space<vmem>>, vector<1x1x96xf32>
    %187 = vector.shape_cast %186 : vector<1x1x96xf32> to vector<1x96xf32>
    %188 = vector.broadcast %187 : vector<1x96xf32> to vector<8x96xf32>
    %189 = arith.addf %185, %188 : vector<8x96xf32>
    %190 = vector.extract_strided_slice %189 {offsets = [0, 0], sizes = [8, 32], strides = [1, 1]} : vector<8x96xf32> to vector<8x32xf32>
    %cst_103 = arith.constant 0.353553385 : f32
    %191 = vector.broadcast %cst_103 : f32 to vector<8x32xf32>
    %192 = arith.mulf %190, %191 : vector<8x32xf32>
    %193 = vector.extract_strided_slice %189 {offsets = [0, 32], sizes = [8, 32], strides = [1, 1]} : vector<8x96xf32> to vector<8x32xf32>
    %194 = vector.extract_strided_slice %189 {offsets = [0, 64], sizes = [8, 32], strides = [1, 1]} : vector<8x96xf32> to vector<8x32xf32>
    %195 = vector.shape_cast %192 : vector<8x32xf32> to vector<8x4x8xf32>
    %196 = tpu.transpose %195, [1, 0, 2] : vector<8x4x8xf32> -> vector<4x8x8xf32>
    %197 = vector.shape_cast %193 : vector<8x32xf32> to vector<8x4x8xf32>
    %198 = tpu.transpose %197, [1, 0, 2] : vector<8x4x8xf32> -> vector<4x8x8xf32>
    %199 = vector.shape_cast %194 : vector<8x32xf32> to vector<8x4x8xf32>
    %200 = tpu.transpose %199, [1, 0, 2] : vector<8x4x8xf32> -> vector<4x8x8xf32>
    "tpu.trace_start"() <{level = 10 : i32, message = "htd,hsd->hts"}> : () -> ()
    %cst_104 = arith.constant dense<0.000000e+00> : vector<4x8x8xf32>
    %201 = tpu.matmul %196, %198, %cst_104 {dimension_numbers = #tpu.dot_dimension_numbers<[2], [2], [1], [1], [0, 0, 0, 1, 1, 1], [0], [0]>} : vector<4x8x8xf32>, vector<4x8x8xf32>, vector<4x8x8xf32> -> vector<4x8x8xf32>
    "tpu.trace_stop"() : () -> ()
    %cst_105 = arith.constant dense<0xFF800000> : vector<4x8xf32>
    %202 = vector.multi_reduction <maximumf>, %201, %cst_105 [2] : vector<4x8x8xf32> to vector<4x8xf32>
    %203 = vector.shape_cast %202 : vector<4x8xf32> to vector<4x8x1xf32>
    %204 = vector.broadcast %203 : vector<4x8x1xf32> to vector<4x8x8xf32>
    %205 = arith.subf %201, %204 : vector<4x8x8xf32>
    %206 = math.exp %205 : vector<4x8x8xf32>
    %cst_106 = arith.constant dense<0.000000e+00> : vector<4x8xf32>
    %207 = vector.multi_reduction <add>, %206, %cst_106 [2] : vector<4x8x8xf32> to vector<4x8xf32>
    %208 = vector.shape_cast %207 : vector<4x8xf32> to vector<4x8x1xf32>
    %209 = vector.broadcast %208 : vector<4x8x1xf32> to vector<4x8x8xf32>
    %210 = arith.divf %206, %209 : vector<4x8x8xf32>
    "tpu.trace_start"() <{level = 10 : i32, message = "hts,hsd->htd"}> : () -> ()
    %cst_107 = arith.constant dense<0.000000e+00> : vector<4x8x8xf32>
    %211 = tpu.matmul %210, %200, %cst_107 {dimension_numbers = #tpu.dot_dimension_numbers<[2], [1], [1], [2], [0, 0, 0, 1, 1, 2], [0], [0]>} : vector<4x8x8xf32>, vector<4x8x8xf32>, vector<4x8x8xf32> -> vector<4x8x8xf32>
    "tpu.trace_stop"() : () -> ()
    %212 = tpu.transpose %211, [1, 0, 2] : vector<4x8x8xf32> -> vector<8x4x8xf32>
    %213 = vector.shape_cast %212 : vector<8x4x8xf32> to vector<8x32xf32>
    %c1_108 = arith.constant 1 : index
    %c0_109 = arith.constant 0 : index
    %c0_110 = arith.constant 0 : index
    %214 = vector.load %arg5[%c1_108, %c0_109, %c0_110] : memref<2x32x32xf32, #tpu.memory_space<vmem>>, vector<1x32x32xf32>
    %215 = vector.shape_cast %214 : vector<1x32x32xf32> to vector<32x32xf32>
    %cst_111 = arith.constant dense<0.000000e+00> : vector<8x32xf32>
    %216 = tpu.matmul %213, %215, %cst_111 {dimension_numbers = #tpu.dot_dimension_numbers<[1], [0], [0], [1], [0, 0, 1, 1], [], []>} : vector<8x32xf32>, vector<32x32xf32>, vector<8x32xf32> -> vector<8x32xf32>
    %c1_112 = arith.constant 1 : index
    %c0_113 = arith.constant 0 : index
    %c0_114 = arith.constant 0 : index
    %217 = vector.load %arg6[%c1_112, %c0_113, %c0_114] : memref<2x1x32xf32, #tpu.memory_space<vmem>>, vector<1x1x32xf32>
    %218 = vector.shape_cast %217 : vector<1x1x32xf32> to vector<1x32xf32>
    %219 = vector.broadcast %218 : vector<1x32xf32> to vector<8x32xf32>
    %220 = arith.addf %216, %219 : vector<8x32xf32>
    %221 = arith.addf %182, %220 : vector<8x32xf32>
    %c1_115 = arith.constant 1 : index
    %c0_116 = arith.constant 0 : index
    %c0_117 = arith.constant 0 : index
    %222 = vector.load %arg17[%c1_115, %c0_116, %c0_117] : memref<2x1x32xf32, #tpu.memory_space<vmem>>, vector<1x1x32xf32>
    %223 = vector.shape_cast %222 : vector<1x1x32xf32> to vector<1x32xf32>
    %c1_118 = arith.constant 1 : index
    %c0_119 = arith.constant 0 : index
    %c0_120 = arith.constant 0 : index
    %224 = vector.load %arg18[%c1_118, %c0_119, %c0_120] : memref<2x1x32xf32, #tpu.memory_space<vmem>>, vector<1x1x32xf32>
    %225 = vector.shape_cast %224 : vector<1x1x32xf32> to vector<1x32xf32>
    %cst_121 = arith.constant dense<0.000000e+00> : vector<8xf32>
    %226 = vector.multi_reduction <add>, %221, %cst_121 [1] : vector<8x32xf32> to vector<8xf32>
    %227 = vector.shape_cast %226 : vector<8xf32> to vector<8x1xf32>
    %cst_122 = arith.constant 3.200000e+01 : f32
    %228 = vector.broadcast %cst_122 : f32 to vector<8x1xf32>
    %229 = arith.divf %227, %228 : vector<8x1xf32>
    %230 = vector.broadcast %229 : vector<8x1xf32> to vector<8x32xf32>
    %231 = arith.subf %221, %230 : vector<8x32xf32>
    %232 = arith.mulf %231, %231 : vector<8x32xf32>
    %cst_123 = arith.constant dense<0.000000e+00> : vector<8xf32>
    %233 = vector.multi_reduction <add>, %232, %cst_123 [1] : vector<8x32xf32> to vector<8xf32>
    %234 = vector.shape_cast %233 : vector<8xf32> to vector<8x1xf32>
    %cst_124 = arith.constant 3.200000e+01 : f32
    %235 = vector.broadcast %cst_124 : f32 to vector<8x1xf32>
    %236 = arith.divf %234, %235 : vector<8x1xf32>
    %237 = vector.broadcast %229 : vector<8x1xf32> to vector<8x32xf32>
    %238 = arith.subf %221, %237 : vector<8x32xf32>
    %cst_125 = arith.constant 9.99999974E-6 : f32
    %239 = vector.broadcast %cst_125 : f32 to vector<8x1xf32>
    %240 = arith.addf %236, %239 : vector<8x1xf32>
    %241 = math.rsqrt %240 : vector<8x1xf32>
    %242 = vector.broadcast %241 : vector<8x1xf32> to vector<8x32xf32>
    %243 = arith.mulf %238, %242 : vector<8x32xf32>
    %244 = vector.broadcast %223 : vector<1x32xf32> to vector<8x32xf32>
    %245 = arith.mulf %243, %244 : vector<8x32xf32>
    %246 = vector.broadcast %225 : vector<1x32xf32> to vector<8x32xf32>
    %247 = arith.addf %245, %246 : vector<8x32xf32>
    %c1_126 = arith.constant 1 : index
    %c0_127 = arith.constant 0 : index
    %c0_128 = arith.constant 0 : index
    %248 = vector.load %arg7[%c1_126, %c0_127, %c0_128] : memref<2x32x32xf32, #tpu.memory_space<vmem>>, vector<1x32x32xf32>
    %249 = vector.shape_cast %248 : vector<1x32x32xf32> to vector<32x32xf32>
    %cst_129 = arith.constant dense<0.000000e+00> : vector<8x32xf32>
    %250 = tpu.matmul %247, %249, %cst_129 {dimension_numbers = #tpu.dot_dimension_numbers<[1], [0], [0], [1], [0, 0, 1, 1], [], []>} : vector<8x32xf32>, vector<32x32xf32>, vector<8x32xf32> -> vector<8x32xf32>
    %c1_130 = arith.constant 1 : index
    %c0_131 = arith.constant 0 : index
    %c0_132 = arith.constant 0 : index
    %251 = vector.load %arg8[%c1_130, %c0_131, %c0_132] : memref<2x1x32xf32, #tpu.memory_space<vmem>>, vector<1x1x32xf32>
    %252 = vector.shape_cast %251 : vector<1x1x32xf32> to vector<1x32xf32>
    %253 = vector.broadcast %252 : vector<1x32xf32> to vector<8x32xf32>
    %254 = arith.addf %250, %253 : vector<8x32xf32>
    %cst_133 = arith.constant 0.353553385 : f32
    %255 = vector.broadcast %cst_133 : f32 to vector<8x32xf32>
    %256 = arith.mulf %254, %255 : vector<8x32xf32>
    %c1_134 = arith.constant 1 : index
    %c0_135 = arith.constant 0 : index
    %c0_136 = arith.constant 0 : index
    %257 = vector.load %arg9[%c1_134, %c0_135, %c0_136] : memref<2x32x64xf32, #tpu.memory_space<vmem>>, vector<1x32x64xf32>
    %258 = vector.shape_cast %257 : vector<1x32x64xf32> to vector<32x64xf32>
    %cst_137 = arith.constant dense<0.000000e+00> : vector<8x64xf32>
    %259 = tpu.matmul %3, %258, %cst_137 {dimension_numbers = #tpu.dot_dimension_numbers<[1], [0], [0], [1], [0, 0, 1, 1], [], []>} : vector<8x32xf32>, vector<32x64xf32>, vector<8x64xf32> -> vector<8x64xf32>
    %c1_138 = arith.constant 1 : index
    %c0_139 = arith.constant 0 : index
    %c0_140 = arith.constant 0 : index
    %260 = vector.load %arg10[%c1_138, %c0_139, %c0_140] : memref<2x1x64xf32, #tpu.memory_space<vmem>>, vector<1x1x64xf32>
    %261 = vector.shape_cast %260 : vector<1x1x64xf32> to vector<1x64xf32>
    %262 = vector.broadcast %261 : vector<1x64xf32> to vector<8x64xf32>
    %263 = arith.addf %259, %262 : vector<8x64xf32>
    %264 = vector.extract_strided_slice %263 {offsets = [0, 0], sizes = [8, 32], strides = [1, 1]} : vector<8x64xf32> to vector<8x32xf32>
    %265 = vector.extract_strided_slice %263 {offsets = [0, 32], sizes = [8, 32], strides = [1, 1]} : vector<8x64xf32> to vector<8x32xf32>
    %266 = vector.shape_cast %256 : vector<8x32xf32> to vector<8x4x8xf32>
    %267 = tpu.transpose %266, [1, 0, 2] : vector<8x4x8xf32> -> vector<4x8x8xf32>
    %268 = vector.shape_cast %264 : vector<8x32xf32> to vector<8x4x8xf32>
    %269 = tpu.transpose %268, [1, 0, 2] : vector<8x4x8xf32> -> vector<4x8x8xf32>
    %270 = vector.shape_cast %265 : vector<8x32xf32> to vector<8x4x8xf32>
    %271 = tpu.transpose %270, [1, 0, 2] : vector<8x4x8xf32> -> vector<4x8x8xf32>
    "tpu.trace_start"() <{level = 10 : i32, message = "htd,hsd->hts"}> : () -> ()
    %cst_141 = arith.constant dense<0.000000e+00> : vector<4x8x8xf32>
    %272 = tpu.matmul %267, %269, %cst_141 {dimension_numbers = #tpu.dot_dimension_numbers<[2], [2], [1], [1], [0, 0, 0, 1, 1, 1], [0], [0]>} : vector<4x8x8xf32>, vector<4x8x8xf32>, vector<4x8x8xf32> -> vector<4x8x8xf32>
    "tpu.trace_stop"() : () -> ()
    %cst_142 = arith.constant dense<0xFF800000> : vector<4x8xf32>
    %273 = vector.multi_reduction <maximumf>, %272, %cst_142 [2] : vector<4x8x8xf32> to vector<4x8xf32>
    %274 = vector.shape_cast %273 : vector<4x8xf32> to vector<4x8x1xf32>
    %275 = vector.broadcast %274 : vector<4x8x1xf32> to vector<4x8x8xf32>
    %276 = arith.subf %272, %275 : vector<4x8x8xf32>
    %277 = math.exp %276 : vector<4x8x8xf32>
    %cst_143 = arith.constant dense<0.000000e+00> : vector<4x8xf32>
    %278 = vector.multi_reduction <add>, %277, %cst_143 [2] : vector<4x8x8xf32> to vector<4x8xf32>
    %279 = vector.shape_cast %278 : vector<4x8xf32> to vector<4x8x1xf32>
    %280 = vector.broadcast %279 : vector<4x8x1xf32> to vector<4x8x8xf32>
    %281 = arith.divf %277, %280 : vector<4x8x8xf32>
    "tpu.trace_start"() <{level = 10 : i32, message = "hts,hsd->htd"}> : () -> ()
    %cst_144 = arith.constant dense<0.000000e+00> : vector<4x8x8xf32>
    %282 = tpu.matmul %281, %271, %cst_144 {dimension_numbers = #tpu.dot_dimension_numbers<[2], [1], [1], [2], [0, 0, 0, 1, 1, 2], [0], [0]>} : vector<4x8x8xf32>, vector<4x8x8xf32>, vector<4x8x8xf32> -> vector<4x8x8xf32>
    "tpu.trace_stop"() : () -> ()
    %283 = tpu.transpose %282, [1, 0, 2] : vector<4x8x8xf32> -> vector<8x4x8xf32>
    %284 = vector.shape_cast %283 : vector<8x4x8xf32> to vector<8x32xf32>
    %c1_145 = arith.constant 1 : index
    %c0_146 = arith.constant 0 : index
    %c0_147 = arith.constant 0 : index
    %285 = vector.load %arg11[%c1_145, %c0_146, %c0_147] : memref<2x32x32xf32, #tpu.memory_space<vmem>>, vector<1x32x32xf32>
    %286 = vector.shape_cast %285 : vector<1x32x32xf32> to vector<32x32xf32>
    %cst_148 = arith.constant dense<0.000000e+00> : vector<8x32xf32>
    %287 = tpu.matmul %284, %286, %cst_148 {dimension_numbers = #tpu.dot_dimension_numbers<[1], [0], [0], [1], [0, 0, 1, 1], [], []>} : vector<8x32xf32>, vector<32x32xf32>, vector<8x32xf32> -> vector<8x32xf32>
    %c1_149 = arith.constant 1 : index
    %c0_150 = arith.constant 0 : index
    %c0_151 = arith.constant 0 : index
    %288 = vector.load %arg12[%c1_149, %c0_150, %c0_151] : memref<2x1x32xf32, #tpu.memory_space<vmem>>, vector<1x1x32xf32>
    %289 = vector.shape_cast %288 : vector<1x1x32xf32> to vector<1x32xf32>
    %290 = vector.broadcast %289 : vector<1x32xf32> to vector<8x32xf32>
    %291 = arith.addf %287, %290 : vector<8x32xf32>
    %292 = arith.addf %247, %291 : vector<8x32xf32>
    %c1_152 = arith.constant 1 : index
    %c0_153 = arith.constant 0 : index
    %c0_154 = arith.constant 0 : index
    %293 = vector.load %arg19[%c1_152, %c0_153, %c0_154] : memref<2x1x32xf32, #tpu.memory_space<vmem>>, vector<1x1x32xf32>
    %294 = vector.shape_cast %293 : vector<1x1x32xf32> to vector<1x32xf32>
    %c1_155 = arith.constant 1 : index
    %c0_156 = arith.constant 0 : index
    %c0_157 = arith.constant 0 : index
    %295 = vector.load %arg20[%c1_155, %c0_156, %c0_157] : memref<2x1x32xf32, #tpu.memory_space<vmem>>, vector<1x1x32xf32>
    %296 = vector.shape_cast %295 : vector<1x1x32xf32> to vector<1x32xf32>
    %cst_158 = arith.constant dense<0.000000e+00> : vector<8xf32>
    %297 = vector.multi_reduction <add>, %292, %cst_158 [1] : vector<8x32xf32> to vector<8xf32>
    %298 = vector.shape_cast %297 : vector<8xf32> to vector<8x1xf32>
    %cst_159 = arith.constant 3.200000e+01 : f32
    %299 = vector.broadcast %cst_159 : f32 to vector<8x1xf32>
    %300 = arith.divf %298, %299 : vector<8x1xf32>
    %301 = vector.broadcast %300 : vector<8x1xf32> to vector<8x32xf32>
    %302 = arith.subf %292, %301 : vector<8x32xf32>
    %303 = arith.mulf %302, %302 : vector<8x32xf32>
    %cst_160 = arith.constant dense<0.000000e+00> : vector<8xf32>
    %304 = vector.multi_reduction <add>, %303, %cst_160 [1] : vector<8x32xf32> to vector<8xf32>
    %305 = vector.shape_cast %304 : vector<8xf32> to vector<8x1xf32>
    %cst_161 = arith.constant 3.200000e+01 : f32
    %306 = vector.broadcast %cst_161 : f32 to vector<8x1xf32>
    %307 = arith.divf %305, %306 : vector<8x1xf32>
    %308 = vector.broadcast %300 : vector<8x1xf32> to vector<8x32xf32>
    %309 = arith.subf %292, %308 : vector<8x32xf32>
    %cst_162 = arith.constant 9.99999974E-6 : f32
    %310 = vector.broadcast %cst_162 : f32 to vector<8x1xf32>
    %311 = arith.addf %307, %310 : vector<8x1xf32>
    %312 = math.rsqrt %311 : vector<8x1xf32>
    %313 = vector.broadcast %312 : vector<8x1xf32> to vector<8x32xf32>
    %314 = arith.mulf %309, %313 : vector<8x32xf32>
    %315 = vector.broadcast %294 : vector<1x32xf32> to vector<8x32xf32>
    %316 = arith.mulf %314, %315 : vector<8x32xf32>
    %317 = vector.broadcast %296 : vector<1x32xf32> to vector<8x32xf32>
    %318 = arith.addf %316, %317 : vector<8x32xf32>
    %c1_163 = arith.constant 1 : index
    %c0_164 = arith.constant 0 : index
    %c0_165 = arith.constant 0 : index
    %319 = vector.load %arg13[%c1_163, %c0_164, %c0_165] : memref<2x32x64xf32, #tpu.memory_space<vmem>>, vector<1x32x64xf32>
    %320 = vector.shape_cast %319 : vector<1x32x64xf32> to vector<32x64xf32>
    %cst_166 = arith.constant dense<0.000000e+00> : vector<8x64xf32>
    %321 = tpu.matmul %318, %320, %cst_166 {dimension_numbers = #tpu.dot_dimension_numbers<[1], [0], [0], [1], [0, 0, 1, 1], [], []>} : vector<8x32xf32>, vector<32x64xf32>, vector<8x64xf32> -> vector<8x64xf32>
    %c1_167 = arith.constant 1 : index
    %c0_168 = arith.constant 0 : index
    %c0_169 = arith.constant 0 : index
    %322 = vector.load %arg14[%c1_167, %c0_168, %c0_169] : memref<2x1x64xf32, #tpu.memory_space<vmem>>, vector<1x1x64xf32>
    %323 = vector.shape_cast %322 : vector<1x1x64xf32> to vector<1x64xf32>
    %324 = vector.broadcast %323 : vector<1x64xf32> to vector<8x64xf32>
    %325 = arith.addf %321, %324 : vector<8x64xf32>
    %cst_170 = arith.constant 0.000000e+00 : f32
    %326 = vector.broadcast %cst_170 : f32 to vector<8x64xf32>
    %327 = arith.maximumf %325, %326 : vector<8x64xf32>
    %c1_171 = arith.constant 1 : index
    %c0_172 = arith.constant 0 : index
    %c0_173 = arith.constant 0 : index
    %328 = vector.load %arg15[%c1_171, %c0_172, %c0_173] : memref<2x64x32xf32, #tpu.memory_space<vmem>>, vector<1x64x32xf32>
    %329 = vector.shape_cast %328 : vector<1x64x32xf32> to vector<64x32xf32>
    %cst_174 = arith.constant dense<0.000000e+00> : vector<8x32xf32>
    %330 = tpu.matmul %327, %329, %cst_174 {dimension_numbers = #tpu.dot_dimension_numbers<[1], [0], [0], [1], [0, 0, 1, 1], [], []>} : vector<8x64xf32>, vector<64x32xf32>, vector<8x32xf32> -> vector<8x32xf32>
    %c1_175 = arith.constant 1 : index
    %c0_176 = arith.constant 0 : index
    %c0_177 = arith.constant 0 : index
    %331 = vector.load %arg16[%c1_175, %c0_176, %c0_177] : memref<2x1x32xf32, #tpu.memory_space<vmem>>, vector<1x1x32xf32>
    %332 = vector.shape_cast %331 : vector<1x1x32xf32> to vector<1x32xf32>
    %333 = vector.broadcast %332 : vector<1x32xf32> to vector<8x32xf32>
    %334 = arith.addf %330, %333 : vector<8x32xf32>
    %335 = arith.addf %318, %334 : vector<8x32xf32>
    %c1_178 = arith.constant 1 : index
    %c0_179 = arith.constant 0 : index
    %c0_180 = arith.constant 0 : index
    %336 = vector.load %arg21[%c1_178, %c0_179, %c0_180] : memref<2x1x32xf32, #tpu.memory_space<vmem>>, vector<1x1x32xf32>
    %337 = vector.shape_cast %336 : vector<1x1x32xf32> to vector<1x32xf32>
    %c1_181 = arith.constant 1 : index
    %c0_182 = arith.constant 0 : index
    %c0_183 = arith.constant 0 : index
    %338 = vector.load %arg22[%c1_181, %c0_182, %c0_183] : memref<2x1x32xf32, #tpu.memory_space<vmem>>, vector<1x1x32xf32>
    %339 = vector.shape_cast %338 : vector<1x1x32xf32> to vector<1x32xf32>
    %cst_184 = arith.constant dense<0.000000e+00> : vector<8xf32>
    %340 = vector.multi_reduction <add>, %335, %cst_184 [1] : vector<8x32xf32> to vector<8xf32>
    %341 = vector.shape_cast %340 : vector<8xf32> to vector<8x1xf32>
    %cst_185 = arith.constant 3.200000e+01 : f32
    %342 = vector.broadcast %cst_185 : f32 to vector<8x1xf32>
    %343 = arith.divf %341, %342 : vector<8x1xf32>
    %344 = vector.broadcast %343 : vector<8x1xf32> to vector<8x32xf32>
    %345 = arith.subf %335, %344 : vector<8x32xf32>
    %346 = arith.mulf %345, %345 : vector<8x32xf32>
    %cst_186 = arith.constant dense<0.000000e+00> : vector<8xf32>
    %347 = vector.multi_reduction <add>, %346, %cst_186 [1] : vector<8x32xf32> to vector<8xf32>
    %348 = vector.shape_cast %347 : vector<8xf32> to vector<8x1xf32>
    %cst_187 = arith.constant 3.200000e+01 : f32
    %349 = vector.broadcast %cst_187 : f32 to vector<8x1xf32>
    %350 = arith.divf %348, %349 : vector<8x1xf32>
    %351 = vector.broadcast %343 : vector<8x1xf32> to vector<8x32xf32>
    %352 = arith.subf %335, %351 : vector<8x32xf32>
    %cst_188 = arith.constant 9.99999974E-6 : f32
    %353 = vector.broadcast %cst_188 : f32 to vector<8x1xf32>
    %354 = arith.addf %350, %353 : vector<8x1xf32>
    %355 = math.rsqrt %354 : vector<8x1xf32>
    %356 = vector.broadcast %355 : vector<8x1xf32> to vector<8x32xf32>
    %357 = arith.mulf %352, %356 : vector<8x32xf32>
    %358 = vector.broadcast %337 : vector<1x32xf32> to vector<8x32xf32>
    %359 = arith.mulf %357, %358 : vector<8x32xf32>
    %360 = vector.broadcast %339 : vector<1x32xf32> to vector<8x32xf32>
    %361 = arith.addf %359, %360 : vector<8x32xf32>
    %c0_189 = arith.constant 0 : index
    %c0_190 = arith.constant 0 : index
    %362 = vector.load %arg23[%c0_189, %c0_190] : memref<32x128xf32, #tpu.memory_space<vmem>>, vector<32x128xf32>
    %cst_191 = arith.constant dense<0.000000e+00> : vector<8x128xf32>
    %363 = tpu.matmul %361, %362, %cst_191 {dimension_numbers = #tpu.dot_dimension_numbers<[1], [0], [0], [1], [0, 0, 1, 1], [], []>} : vector<8x32xf32>, vector<32x128xf32>, vector<8x128xf32> -> vector<8x128xf32>
    %c0_192 = arith.constant 0 : index
    %c0_193 = arith.constant 0 : index
    %364 = vector.load %arg24[%c0_192, %c0_193] : memref<1x128xf32, #tpu.memory_space<vmem>>, vector<1x128xf32>
    %365 = vector.broadcast %364 : vector<1x128xf32> to vector<8x128xf32>
    %366 = arith.addf %363, %365 : vector<8x128xf32>
    %c0_194 = arith.constant 0 : index
    %c0_195 = arith.constant 0 : index
    %c0_196 = arith.constant 0 : index
    %367 = vector.load %arg25[%c0_194, %c0_195, %c0_196] : memref<1x8x128xf32, #tpu.memory_space<vmem>>, vector<1x8x128xf32>
    %368 = vector.shape_cast %367 : vector<1x8x128xf32> to vector<8x128xf32>
    %369 = vector.shape_cast %366 : vector<8x128xf32> to vector<1x8x128xf32>
    tpu.vector_store %arg25[%c0_194, %c0_195, %c0_196], %369 {strides = array<i32>} : memref<1x8x128xf32, #tpu.memory_space<vmem>>, vector<1x8x128xf32>,
    return
  }
  func.func @transform_0(%arg0: i32) -> (i32, i32, i32) {
    %c0_i32 = arith.constant 0 : i32
    %c0_i32_0 = arith.constant 0 : i32
    %c0_i32_1 = arith.constant 0 : i32
    return %arg0, %c0_i32, %c0_i32_0 : i32, i32, i32
  }
  func.func @transform_1(%arg0: i32) -> (i32, i32, i32) {
    %c0_i32 = arith.constant 0 : i32
    %c0_i32_0 = arith.constant 0 : i32
    %c0_i32_1 = arith.constant 0 : i32
    return %arg0, %c0_i32, %c0_i32_0 : i32, i32, i32
  }
  func.func @transform_2(%arg0: i32) -> (i32, i32, i32) {
    %c0_i32 = arith.constant 0 : i32
    %c0_i32_0 = arith.constant 0 : i32
    %c0_i32_1 = arith.constant 0 : i32
    %c0_i32_2 = arith.constant 0 : i32
    return %c0_i32, %c0_i32_0, %c0_i32_1 : i32, i32, i32
  }
  func.func @transform_3(%arg0: i32) -> (i32, i32, i32) {
    %c0_i32 = arith.constant 0 : i32
    %c0_i32_0 = arith.constant 0 : i32
    %c0_i32_1 = arith.constant 0 : i32
    %c0_i32_2 = arith.constant 0 : i32
    return %c0_i32, %c0_i32_0, %c0_i32_1 : i32, i32, i32
  }
  func.func @transform_4(%arg0: i32) -> (i32, i32, i32) {
    %c0_i32 = arith.constant 0 : i32
    %c0_i32_0 = arith.constant 0 : i32
    %c0_i32_1 = arith.constant 0 : i32
    %c0_i32_2 = arith.constant 0 : i32
    return %c0_i32, %c0_i32_0, %c0_i32_1 : i32, i32, i32
  }
  func.func @transform_5(%arg0: i32) -> (i32, i32, i32) {
    %c0_i32 = arith.constant 0 : i32
    %c0_i32_0 = arith.constant 0 : i32
    %c0_i32_1 = arith.constant 0 : i32
    %c0_i32_2 = arith.constant 0 : i32
    return %c0_i32, %c0_i32_0, %c0_i32_1 : i32, i32, i32
  }
  func.func @transform_6(%arg0: i32) -> (i32, i32, i32) {
    %c0_i32 = arith.constant 0 : i32
    %c0_i32_0 = arith.constant 0 : i32
    %c0_i32_1 = arith.constant 0 : i32
    %c0_i32_2 = arith.constant 0 : i32
    return %c0_i32, %c0_i32_0, %c0_i32_1 : i32, i32, i32
  }
  func.func @transform_7(%arg0: i32) -> (i32, i32, i32) {
    %c0_i32 = arith.constant 0 : i32
    %c0_i32_0 = arith.constant 0 : i32
    %c0_i32_1 = arith.constant 0 : i32
    %c0_i32_2 = arith.constant 0 : i32
    return %c0_i32, %c0_i32_0, %c0_i32_1 : i32, i32, i32
  }
  func.func @transform_8(%arg0: i32) -> (i32, i32, i32) {
    %c0_i32 = arith.constant 0 : i32
    %c0_i32_0 = arith.constant 0 : i32
    %c0_i32_1 = arith.constant 0 : i32
    %c0_i32_2 = arith.constant 0 : i32
    return %c0_i32, %c0_i32_0, %c0_i32_1 : i32, i32, i32
  }
  func.func @transform_9(%arg0: i32) -> (i32, i32, i32) {
    %c0_i32 = arith.constant 0 : i32
    %c0_i32_0 = arith.constant 0 : i32
    %c0_i32_1 = arith.constant 0 : i32
    %c0_i32_2 = arith.constant 0 : i32
    return %c0_i32, %c0_i32_0, %c0_i32_1 : i32, i32, i32
  }
  func.func @transform_10(%arg0: i32) -> (i32, i32, i32) {
    %c0_i32 = arith.constant 0 : i32
    %c0_i32_0 = arith.constant 0 : i32
    %c0_i32_1 = arith.constant 0 : i32
    %c0_i32_2 = arith.constant 0 : i32
    return %c0_i32, %c0_i32_0, %c0_i32_1 : i32, i32, i32
  }
  func.func @transform_11(%arg0: i32) -> (i32, i32, i32) {
    %c0_i32 = arith.constant 0 : i32
    %c0_i32_0 = arith.constant 0 : i32
    %c0_i32_1 = arith.constant 0 : i32
    %c0_i32_2 = arith.constant 0 : i32
    return %c0_i32, %c0_i32_0, %c0_i32_1 : i32, i32, i32
  }
  func.func @transform_12(%arg0: i32) -> (i32, i32, i32) {
    %c0_i32 = arith.constant 0 : i32
    %c0_i32_0 = arith.constant 0 : i32
    %c0_i32_1 = arith.constant 0 : i32
    %c0_i32_2 = arith.constant 0 : i32
    return %c0_i32, %c0_i32_0, %c0_i32_1 : i32, i32, i32
  }
  func.func @transform_13(%arg0: i32) -> (i32, i32, i32) {
    %c0_i32 = arith.constant 0 : i32
    %c0_i32_0 = arith.constant 0 : i32
    %c0_i32_1 = arith.constant 0 : i32
    %c0_i32_2 = arith.constant 0 : i32
    return %c0_i32, %c0_i32_0, %c0_i32_1 : i32, i32, i32
  }
  func.func @transform_14(%arg0: i32) -> (i32, i32, i32) {
    %c0_i32 = arith.constant 0 : i32
    %c0_i32_0 = arith.constant 0 : i32
    %c0_i32_1 = arith.constant 0 : i32
    %c0_i32_2 = arith.constant 0 : i32
    return %c0_i32, %c0_i32_0, %c0_i32_1 : i32, i32, i32
  }
  func.func @transform_15(%arg0: i32) -> (i32, i32, i32) {
    %c0_i32 = arith.constant 0 : i32
    %c0_i32_0 = arith.constant 0 : i32
    %c0_i32_1 = arith.constant 0 : i32
    %c0_i32_2 = arith.constant 0 : i32
    return %c0_i32, %c0_i32_0, %c0_i32_1 : i32, i32, i32
  }
  func.func @transform_16(%arg0: i32) -> (i32, i32, i32) {
    %c0_i32 = arith.constant 0 : i32
    %c0_i32_0 = arith.constant 0 : i32
    %c0_i32_1 = arith.constant 0 : i32
    %c0_i32_2 = arith.constant 0 : i32
    return %c0_i32, %c0_i32_0, %c0_i32_1 : i32, i32, i32
  }
  func.func @transform_17(%arg0: i32) -> (i32, i32, i32) {
    %c0_i32 = arith.constant 0 : i32
    %c0_i32_0 = arith.constant 0 : i32
    %c0_i32_1 = arith.constant 0 : i32
    %c0_i32_2 = arith.constant 0 : i32
    return %c0_i32, %c0_i32_0, %c0_i32_1 : i32, i32, i32
  }
  func.func @transform_18(%arg0: i32) -> (i32, i32, i32) {
    %c0_i32 = arith.constant 0 : i32
    %c0_i32_0 = arith.constant 0 : i32
    %c0_i32_1 = arith.constant 0 : i32
    %c0_i32_2 = arith.constant 0 : i32
    return %c0_i32, %c0_i32_0, %c0_i32_1 : i32, i32, i32
  }
  func.func @transform_19(%arg0: i32) -> (i32, i32, i32) {
    %c0_i32 = arith.constant 0 : i32
    %c0_i32_0 = arith.constant 0 : i32
    %c0_i32_1 = arith.constant 0 : i32
    %c0_i32_2 = arith.constant 0 : i32
    return %c0_i32, %c0_i32_0, %c0_i32_1 : i32, i32, i32
  }
  func.func @transform_20(%arg0: i32) -> (i32, i32, i32) {
    %c0_i32 = arith.constant 0 : i32
    %c0_i32_0 = arith.constant 0 : i32
    %c0_i32_1 = arith.constant 0 : i32
    %c0_i32_2 = arith.constant 0 : i32
    return %c0_i32, %c0_i32_0, %c0_i32_1 : i32, i32, i32
  }
  func.func @transform_21(%arg0: i32) -> (i32, i32, i32) {
    %c0_i32 = arith.constant 0 : i32
    %c0_i32_0 = arith.constant 0 : i32
    %c0_i32_1 = arith.constant 0 : i32
    %c0_i32_2 = arith.constant 0 : i32
    return %c0_i32, %c0_i32_0, %c0_i32_1 : i32, i32, i32
  }
  func.func @transform_22(%arg0: i32) -> (i32, i32) {
    %c0_i32 = arith.constant 0 : i32
    %c0_i32_0 = arith.constant 0 : i32
    %c0_i32_1 = arith.constant 0 : i32
    return %c0_i32, %c0_i32_0 : i32, i32
  }
  func.func @transform_23(%arg0: i32) -> (i32, i32) {
    %c0_i32 = arith.constant 0 : i32
    %c0_i32_0 = arith.constant 0 : i32
    %c0_i32_1 = arith.constant 0 : i32
    return %c0_i32, %c0_i32_0 : i32, i32
  }
  func.func @transform_24(%arg0: i32) -> (i32, i32, i32) {
    %c0_i32 = arith.constant 0 : i32
    %c0_i32_0 = arith.constant 0 : i32
    %c0_i32_1 = arith.constant 0 : i32
    return %arg0, %c0_i32, %c0_i32_0 : i32, i32, i32
  }
}

</mosaic_0001>

<bundles_post_ra>
// kernel: t2_forward.1
= control target key start
LH: loop header
LB: loop body
LE: loop exit
PB: predicated region body
PF: predicated region fallthrough
CT: control target
= control target key end

     0   :  { %s9615_s0 = inlined_call_operand.vmem [shape: f32[2,8,32], index: 0, kind: input, shape index: {}]   ;;  %s9616_s1 = inlined_call_operand.vmem [shape: f32[2,8,32], index: 1, kind: input, shape index: {}]   ;;  %s9617_s2 = inlined_call_operand.vmem [shape: f32[2,32,96], index: 2, kind: input, shape index: {}]   ;;  %s9618_s3 = inlined_call_operand.vmem [shape: f32[2,1,96], index: 3, kind: input, shape index: {}]   ;;  %s9619_s4 = inlined_call_operand.vmem [shape: f32[2,32,32], index: 4, kind: input, shape index: {}]   ;;  %s9620_s5 = inlined_call_operand.vmem [shape: f32[2,1,32], index: 5, kind: input, shape index: {}]   ;;  %s9621_s6 = inlined_call_operand.vmem [shape: f32[2,32,32], index: 6, kind: input, shape index: {}]   ;;  %s9622_s7 = inlined_call_operand.vmem [shape: f32[2,1,32], index: 7, kind: input, shape index: {}]   ;;  %s9623_s8 = inlined_call_operand.vmem [shape: f32[2,32,64], index: 8, kind: input, shape index: {}]   ;;  %s9624_s9 = inlined_call_operand.vmem [shape: f32[2,1,64], index: 9, kind: input, shape index: {}]   ;;  %s9625_s10 = inlined_call_operand.hbm [shape: f32[2,32,32], index: 10, kind: input, shape index: {}]   ;;  %s9626_s11 = inlined_call_operand.vmem [shape: f32[2,1,32], index: 11, kind: input, shape index: {}]   ;;  %s9627_s12 = inlined_call_operand.hbm [shape: f32[2,32,64], index: 12, kind: input, shape index: {}]   ;;  %s9628_s13 = inlined_call_operand.hbm [shape: f32[2,1,64], index: 13, kind: input, shape index: {}]   ;;  %s9629_s14 = inlined_call_operand.vmem [shape: f32[2,64,32], index: 14, kind: input, shape index: {}]   ;;  %s9630_s15 = inlined_call_operand.hbm [shape: f32[2,1,32], index: 15, kind: input, shape index: {}]   ;;  %s9631_s16 = inlined_call_operand.vmem [shape: f32[2,1,32], index: 16, kind: input, shape index: {}]   ;;  %s9632_s17 = inlined_call_operand.vmem [shape: f32[2,1,32], index: 17, kind: input, shape index: {}]   ;;  %s9633_s18 = inlined_call_operand.vmem [shape: f32[2,1,32], index: 18, kind: input, shape index: {}]   ;;  %s9634_s19 = inlined_call_operand.vmem [shape: f32[2,1,32], index: 19, kind: input, shape index: {}]   ;;  %s9635_s20 = inlined_call_operand.vmem [shape: f32[2,1,32], index: 20, kind: input, shape index: {}]   ;;  %s9636_s21 = inlined_call_operand.vmem [shape: f32[2,1,32], index: 21, kind: input, shape index: {}]   ;;  %s9637_s22 = inlined_call_operand.hbm [shape: f32[32,128], index: 22, kind: input, shape index: {}]   ;;  %s9638_s23 = inlined_call_operand.vmem [shape: f32[1,128], index: 23, kind: input, shape index: {}]   ;;  %s9639_s24 = inlined_call_operand.vmem [shape: f32[2,8,128], index: 24, kind: output, shape index: {}]  }
   0x1   :  { %9667 = sst [smem:[#allocation15_spill]] %s9615_s0 }
   0x2   :  { %9668 = sst [smem:[#allocation16_spill]] %s9616_s1 }
   0x3   :  { %9669 = sst [smem:[#allocation17_spill]] %s9617_s2 }
   0x4   :  { %9670 = sst [smem:[#allocation18_spill]] %s9618_s3 }
   0x5   :  { %9671 = sst [smem:[#allocation19_spill]] %s9619_s4 }
   0x6   :  { %9672 = sst [smem:[#allocation20_spill]] %s9620_s5 }
   0x7   :  { %9673 = sst [smem:[#allocation21_spill]] %s9621_s6 }
   0x8   :  { %9674 = sst [smem:[#allocation22_spill]] %s9622_s7 }
   0x9   :  { %9675 = sst [smem:[#allocation23_spill]] %s9623_s8 }
   0xa   :  { %9676 = sst [smem:[#allocation24_spill]] %s9625_s10 }
   0xb   :  { %9677 = sst [smem:[#allocation25_spill]] %s9626_s11 }
   0xc   :  { %9678 = sst [smem:[#allocation26_spill]] %s9627_s12 }
   0xd   :  { %9679 = sst [smem:[#allocation27_spill]] %s9628_s13 }
   0xe   :  { %9680 = sst [smem:[#allocation28_spill]] %s9630_s15 }
   0xf   :  { %9681 = sst [smem:[#allocation29_spill]] %s9637_s22 }
  0x10   :  { %9682 = sst [smem:[#allocation30_spill]] %s9638_s23 }
  0x11   :  { %9683 = sst [smem:[#allocation31_spill]] %s9639_s24 }
  0x12   :  { %29 = vsyncpa [#allocation3], 0 }
  0x13   :  { %30 = vsyncpa [#allocation5], 0 }
  0x14   :  { %31 = vsyncpa [#allocation8], 0  ;;  %s8473_s5 = smov 0  }
  0x15 LB: > { %9684 = sst [smem:[#allocation13_spill]] %s8325_s5  ;;  %s8479_s26 = sadd.s32 4294967295, %s8325_s5   ;;  %s8325_s5 = sphi %s8473_s5, %s37_s5  }
  0x16   : > { %p7362_p0 = scmp.ge.s32.totalorder %s8325_s5, 1  ;;  %p582_p1 = scmp.lt.s32.totalorder %s8325_s5, 3 }
  0x17   : > { %p8061_p2 = scmp.eq.s32.totalorder %s8479_s26, 0  ;;  %s8327_s28 = smov [#allocation4]  }
  0x18   : > { %p8484_p3 = pnand %p7362_p0, %p582_p1  ;;  %s634_s6 = sshll.u32 %s8327_s28, 4  ;;  %s635_s6 = int_to_ptr.vmem [resolvable:$true] %s634_s6 }
  0x19   : > { %s8328_s29 = smov [#allocation7]   ;;  %s8329_s7 = smov [#allocation2]  }
  0x1a   : > { %p8045_p4 = pneg %p8484_p3  ;;  %s663_s0 = sshll.u32 %s8328_s29, 4  ;;  %s8496_s0 = int_to_ptr.vmem [resolvable:$true] %s663_s0 }
  0x1b   : > { %s618_s30 = sshll.u32 %s8329_s7, 4  ;;  %s8188_s25 = scalar_lea.vmem %s635_s6, 1024  ;;  %s8498_s30 = int_to_ptr.vmem [resolvable:$true] %s618_s30 }
  0x1c   : > { %p8492_p5 = pnand %p8061_p2, %p8045_p4  ;;  %p8189_p7 = scmp.ne.s32.totalorder %s635_s6, %s8188_s25 }
  0x1d   : > { %p8196_p10 = scmp.lt.s32.totalorder %s635_s6, %s635_s6  ;;  %p8197_p11 = scmp.lt.s32.totalorder %s8188_s25, %s8188_s25 }
  0x1e   : > { %p8502_p6 = pneg %p8492_p5 }
  0x1f   : > { %p8198_p12 = por %p8197_p11, %p8196_p10 }
  0x20   : > { %p8191_p8 = pnand %p8189_p7, %p8502_p6 }
  0x22   : > { %p8192_p9 = pneg %p8191_p8 }
  0x24   : > { %p8199_p13 = pnand %p8198_p12, %p8192_p9 }
  0x26   : > { %8202 = shalt.err (!%p8199_p13)
}
  0x27   : > { %s8330_s8 = smov 128   ;;  %s8331_s4 = smov 8  }
  0x28   : > { %s9688_s12 = sld [smem:[#allocation26_spill]]  ;;  %s8214_s29 = scalar_lea.vmem %s8496_s0, 32 }
  0x29   : > { %p8215_p0 = scmp.ne.s32.totalorder %s8496_s0, %s8214_s29  ;;  %p8222_p7 = scmp.lt.s32.totalorder %s8496_s0, %s8496_s0 }
  0x2a   : > { %p8223_p8 = scmp.lt.s32.totalorder %s8214_s29, %s8214_s29 }
  0x2b   : > { %p8217_p1 = pnand %p8215_p0, %p8502_p6 }
  0x2c   : > { %p8224_p9 = por %p8223_p8, %p8222_p7 }
  0x2d   : > { %p8218_p4 = pneg %p8217_p1 }
  0x2e   : > { %8051 = dma.hbm_to_vmem [thread:$0]  (!%p8492_p5), %s9688_s12, 1024, %s635_s6, [#allocation5], %s8330_s8, %s8330_s8, %s8331_s4  }
  0x2f   : > { %p8225_p10 = pnand %p8224_p9, %p8218_p4 }
  0x31   : > { %8228 = shalt.err (!%p8225_p10)
}
  0x32   : > { %s9647_s7 = smov 16   ;;  %s9648_s25 = smov 1  }
  0x33   : > { %s9689_s15 = sld [smem:[#allocation28_spill]]  ;;  %s8240_s28 = scalar_lea.vmem %s8498_s30, 1024 }
  0x34   : > { %p8241_p11 = scmp.ne.s32.totalorder %s8498_s30, %s8240_s28  ;;  %p8248_p0 = scmp.lt.s32.totalorder %s8498_s30, %s8498_s30 }
  0x35   : > { %p8249_p1 = scmp.lt.s32.totalorder %s8240_s28, %s8240_s28 }
  0x36   : > { %p8243_p12 = pnand %p8241_p11, %p8502_p6 }
  0x37   : > { %p8250_p4 = por %p8249_p1, %p8248_p0 }
  0x38   : > { %p8244_p13 = pneg %p8243_p12 }
  0x39   : > { %8057 = dma.hbm_to_vmem [thread:$0]  (!%p8492_p5), %s9689_s15, 32, %s8496_s0, [#allocation8], %s9647_s7, %s9647_s7, %s9648_s25  }
  0x3a   : > { %p8251_p7 = pnand %p8250_p4, %p8244_p13 }
  0x3c   : > { %8254 = shalt.err (!%p8251_p7)
}
  0x3d   : > { %s9690_s10 = sld [smem:[#allocation24_spill]]  ;;  %s8334_s0 = smov [#allocation6]  }
  0x3e   : > { %s647_s1 = sshll.u32 %s8334_s0, 4  ;;  %s8335_s7 = smov [#allocation9]   ;;  %s648_s1 = int_to_ptr.vmem [resolvable:$true] %s647_s1 }
  0x3f   : > { %s694_s25 = sshll.u32 %s8335_s7, 4  ;;  %s8266_s28 = scalar_lea.vmem %s648_s1, 32  ;;  %s695_s25 = int_to_ptr.vmem [resolvable:$true] %s694_s25 }
  0x40   : > { %p8267_p8 = scmp.ne.s32.totalorder %s648_s1, %s8266_s28  ;;  %p8274_p11 = scmp.lt.s32.totalorder %s648_s1, %s648_s1 }
  0x41   : > { %p8275_p12 = scmp.lt.s32.totalorder %s8266_s28, %s8266_s28 }
  0x42   : > { %p8269_p9 = pnand %p8267_p8, %p8502_p6 }
  0x43   : > { %8048 = dma.hbm_to_vmem [thread:$0]  (!%p8492_p5), %s9690_s10, 1024, %s8498_s30, [#allocation3], %s8330_s8, %s8330_s8, %s8331_s4  }
  0x44   : > { %p8270_p10 = pneg %p8269_p9  ;;  %p8276_p13 = por %p8275_p12, %p8274_p11 }
  0x46   : > { %p8277_p0 = pnand %p8276_p13, %p8270_p10 }
  0x48   : > { %8280 = shalt.err (!%p8277_p0)
}
  0x49   : > { %s9691_s29 = smov 1   ;;  %s9692_s30 = smov 16  }
  0x4a   : > { %s9693_s13 = sld [smem:[#allocation27_spill]]  ;;  %s8292_s7 = scalar_lea.vmem %s695_s25, 512 }
  0x4b   : > { %p8293_p1 = scmp.ne.s32.totalorder %s695_s25, %s8292_s7  ;;  %p8300_p8 = scmp.lt.s32.totalorder %s695_s25, %s695_s25 }
  0x4c   : > { %p8301_p9 = scmp.lt.s32.totalorder %s8292_s7, %s8292_s7 }
  0x4d   : > { %p8295_p4 = pnand %p8293_p1, %p8502_p6 }
  0x4e   : > { %p8302_p11 = por %p8301_p9, %p8300_p8 }
  0x4f   : > { %p8296_p7 = pneg %p8295_p4 }
  0x50   : > { %8054 = dma.hbm_to_vmem [thread:$0]  (!%p8492_p5), %s9693_s13, 32, %s648_s1, [#allocation5], %s9692_s30, %s9692_s30, %s9691_s29  }
  0x51   : > { %p8303_p10 = pnand %p8302_p11, %p8296_p7 }
  0x53   : > { %8306 = shalt.err (!%p8303_p10)
}
  0x54   : > { %s9694_s22 = sld [smem:[#allocation29_spill]] }
  0x56   : > { %727 = sbr.rel (%p8484_p3) target bundleno = 8729 (0x2219), region = 116 }
  0x5a   : > { %8060 = dma.hbm_to_vmem [thread:$0]  (!%p8492_p5), %s9694_s22, 512, %s695_s25, [#allocation8], %s8330_s8, %s8330_s8, %s8331_s4  }
  0x5b   : > { %8312 = dma.done.wait (%p8061_p2), [#allocation3], 1024  }
  0x5c   : > { %8314 = vsyncadd (%p8061_p2), [#allocation3], 4294966272 }
  0x5d   : > { %8316 = dma.done.wait (%p8061_p2), [#allocation5], 1056  }
  0x5e   : > { %8318 = vsyncadd (%p8061_p2), [#allocation5], 4294966240 }
  0x5f   : > { %8320 = dma.done.wait (%p8061_p2), [#allocation8], 544  }
  0x60   : > { %8322 = vsyncadd (%p8061_p2), [#allocation8], 4294966752  ;;  %p811_p3 = scmp.lt.s32.totalorder %s8479_s26, 1  ;;  %v8336_v0 = vmov 0.0   ;;  %vm8337_vm0 = vmmov 0   ;;  %s9696_s3 = sld [smem:[#allocation17_spill]]  ;;  %v926_v17 = vlaneseq }
  0x61   : > { %7684 = vmatprep.subr.mxu0 %v8336_v0  ;;  %7692 = vmatprep.mubr.msk.f32.mxu0 %vm8337_vm0, %v8336_v0  ;;  %vm836_vm1 = vcmask 261120   ;;  %s9698_s2 = sld [smem:[#allocation18_spill]]  ;;  %s9659_s8 = smov 104   ;;  %v8342_v15 = vmov 1983009808   ;;  %vm1360_vm2 = vcmask 64512  }
  0x62   : > { %s9720_s26 = smov (!%p811_p3, %s8479_s26), 1  ;;  %7695 = vmatprep.subr.mxu1 %v8336_v0  ;;  %7697 = vmatprep.mubr.msk.f32.mxu1 %vm8337_vm0, %v8336_v0  ;;  %s9661_s4 = smov 120   ;;  %v924_v16 = vunpack.c.l.s4 %v8342_v15  ;;  %v8343_v18 = vmov 1934713408   ;;  %v927_v21 = vshrl.u32 %v926_v17, 7  ;;  %vm2150_vm3 = vcmask 130048  }
  0x63   : > { %s8588_s10 = sshll.u32 %s9720_s26, 3  ;;  %s9697_s26 = sld [smem:[#allocation15_spill]]  ;;  %v956_v19 = vunpack.c.l.s4 %v8343_v18  ;;  %vm2152_vm4 = vcmask 195584   ;;  %vm3883_vm5 = vcmask 523264  }
  0x64   : > { %9695 = sst [smem:[#allocation14_spill]] %s8588_s10  ;;  %s9657_s25 = smov 96   ;;  %v925_v20 = vunpack.c.0.s8 %v924_v16 }
  0x65   : > { %s9663_s1 = smov 112   ;;  %v957_v24 = vunpack.c.0.s8 %v956_v19  ;;  %s9649_s29 = smov 64  }
  0x66   : > { %v828_v1 = vld [vmem:[%s9696_s3 + $0x18] sm:$0xff]  ;;  %v827_v2 = vld [vmem:[%s9696_s3 + $0x10] sm:$0xff]  ;;  %v826_v3 = vld [vmem:[%s9696_s3 + $0x8] sm:$0xff]  ;;  %v8645_v25 = vsub.s32 %v925_v20, %v927_v21  ;;  %s9655_s0 = smov 16   ;;  %s9653_s7 = smov 8  }
  0x67   : > { %7685 = vmatpush3.msra.mxu0 %v828_v1  ;;  %v825_v4 = vld [vmem:[%s9696_s3] sm:$0xff]  ;;  %v8647_v32 = vsub.s32 %v957_v24, %v927_v21  ;;  %s9651_s28 = smov 24   ;;  %s9706_s27 = smov 104  }
  0x68   : > { %7686 = vmatprep.subr.mxu0 %v8336_v0  ;;  %v7378_v6 = vld [vmem:[%s9698_s2] ss:$0 sm:$0xff]  ;;  %s9711_s30 = smov 24   ;;  %s9712_s11 = sld [smem:[#allocation25_spill]] }
  0x69   : > { %s814_s6 = scalar_lea.vmem %s9697_s26, %s8588_s10  ;;  %7687 = vmatpush3.msra.mxu0 %v827_v2  ;;  %s9700_s26 = sld [smem:[#allocation20_spill]] }
  0x6a   : > { %7688 = vmatprep.subr.mxu0 %v8336_v0  ;;  %v8608_v5 = vld [vmem:[%s814_s6] sm:$0xff]  ;;  %s9699_s6 = sld [smem:[#allocation19_spill]] }
  0x6b   : > { %7689 = vmatpush3.msra.mxu0 %v826_v3  ;;  %s9715_s23 = sld [smem:[#allocation14_spill]] }
  0x6c   : > { %7690 = vmatprep.subr.mxu0 %v8336_v0  ;;  %s9716_s5 = sld [smem:[#allocation30_spill]] }
  0x6d   : > { %7691 = vmatpush3.msra.mxu0 %v825_v4 }
  0x6e   : > { %7693 = vmatmul.mubr.msk.f32.vlgmr.msra.gmra.mxu0 %vm836_vm1, %v8608_v5  ;;  %7715 = vmatprep.subr.mxu0 %v8336_v0 }
  0x6f   : > { %7717 = vmatprep.mubr.msk.f32.mxu0 %vm8337_vm0, %v8336_v0 }
 0x12e   : > { %v906_v7 = vpop.f32.mrf.mxu0 }
 0x12f   : > { %v8619_v8 = vadd.f32 %v7378_v6, %v906_v7 }
 0x130   : > { %v7694_v9 = vpop.f32.mrf.mxu0 }
 0x131   : > { %1062 = vrot.lane.b32.xlu1 %v8619_v8, %s9659_s8  ;;  %1058 = vrot.lane.b32.xlu0 %v8619_v8, %s9661_s4  ;;  %v910_v10 = vmul.f32 0.35355338, %v8619_v8 }
 0x135   : > { %1064 = vrot.lane.b32.xlu1 %v8619_v8, %s9657_s25  ;;  %1060 = vrot.lane.b32.xlu0 %v8619_v8, %s9663_s1 }
 0x139   : > { %912 = vrot.lane.b32.xlu1 %v910_v10, %s9661_s4  ;;  %s9710_s4 = smov 8  }
 0x1a3   : > { %v8631_v11 = vpop.permute.xlu0 %1058  ;;  %v8635_v12 = vpop.permute.xlu1 %1062 }
 0x1a4   : > { %1066 = vrot.lane.b32.xlu0 %v8631_v11, %s9657_s25 }
 0x1a7   : > { %v8637_v13 = vpop.permute.xlu0 %1060  ;;  %v1065_v14 = vpop.permute.xlu1 %1064 }
 0x1a8   : > { %1070 = vrot.lane.b32.xlu0 %v8635_v12, %s9657_s25  ;;  %1068 = vrot.lane.b32.xlu1 %v8637_v13, %s9657_s25  ;;  %s9703_s25 = sld [smem:[#allocation21_spill]] }
 0x1ab   : > { %v913_v22 = vpop.permute.xlu1 %912 }
 0x1ac   : > { %915 = vrot.lane.b32.xlu0 %v910_v10, %s9663_s1  ;;  %918 = vrot.lane.b32.xlu1 %v910_v10, %s9659_s8  ;;  %s9702_s1 = sld [smem:[#allocation16_spill]]  ;;  %s9709_s8 = smov 16  }
 0x1b2   : > { %s8821_s12 = scalar_lea.vmem %s9702_s1, %s8588_s10  ;;  %s9704_s1 = smov 112  }
 0x216   : > { %v1067_v23 = vpop.permute.xlu0 %1066 }
 0x21a   : > { %v1071_v26 = vpop.permute.xlu0 %1070  ;;  %v1069_v27 = vpop.permute.xlu1 %1068 }
 0x21b   : > { %v1092_v28 = vcombine.low %v1067_v23, %v1071_v26  ;;  %v1093_v29 = vcombine.high %v1067_v23, %v1071_v26  ;;  %v1076_v30 = vcombine.low %v1065_v14, %v1069_v27  ;;  %v1077_v31 = vcombine.high %v1065_v14, %v1069_v27 }
 0x21d   : > { %v1100_v33 = vrot.slane %v1092_v28, %v8645_v25  ;;  %v1107_v34 = vrot.slane %v1093_v29, %v8645_v25  ;;  %v1084_v35 = vrot.slane %v1076_v30, %v8645_v25  ;;  %v1091_v36 = vrot.slane %v1077_v31, %v8645_v25 }
 0x21e   : > { %v916_v37 = vpop.permute.xlu0 %915  ;;  %v919_v38 = vpop.permute.xlu1 %918 }
 0x21f   : > { %v1108_v39 = vcombine.low %v1084_v35, %v1100_v33  ;;  %v1109_v40 = vcombine.high %v1084_v35, %v1100_v33  ;;  %v1124_v41 = vcombine.low %v1091_v36, %v1107_v34  ;;  %v1125_v42 = vcombine.high %v1091_v36, %v1107_v34 }
 0x220   : > { %v921_v43 = vcombine.low %v910_v10, %v916_v37  ;;  %v922_v44 = vcombine.high %v910_v10, %v916_v37  ;;  %v937_v45 = vcombine.low %v913_v22, %v919_v38  ;;  %v938_v46 = vcombine.high %v913_v22, %v919_v38 }
 0x221   : > { %v1116_v47 = vrot.slane %v1108_v39, %v8647_v32  ;;  %v1123_v48 = vrot.slane %v1109_v40, %v8647_v32  ;;  %v1132_v49 = vrot.slane %v1124_v41, %v8647_v32  ;;  %v1139_v50 = vrot.slane %v1125_v42, %v8647_v32 }
 0x222   : > { %v929_v51 = vrot.slane %v921_v43, %v8645_v25  ;;  %v936_v52 = vrot.slane %v922_v44, %v8645_v25  ;;  %v945_v53 = vrot.slane %v937_v45, %v8645_v25  ;;  %v952_v54 = vrot.slane %v938_v46, %v8645_v25 }
 0x223   : > { %v1144_v55 = vcombine.low %v1116_v47, %v1123_v48  ;;  %v7382_v56 = vcombine.high %v1116_v47, %v1123_v48  ;;  %v1160_v57 = vcombine.low %v1132_v49, %v1139_v50  ;;  %v7383_v58 = vcombine.high %v1132_v49, %v1139_v50 }
 0x224   : > { %v953_v59 = vcombine.low %v929_v51, %v945_v53  ;;  %v954_v60 = vcombine.high %v929_v51, %v945_v53  ;;  %v969_v61 = vcombine.low %v936_v52, %v952_v54  ;;  %v970_v62 = vcombine.high %v936_v52, %v952_v54 }
 0x225   : > { %v1151_v63 = vrot.slane %v1144_v55, %v8645_v25  ;;  %v1159_v1 = vrot.slane %v7382_v56, %v8645_v25  ;;  %v1167_v2 = vrot.slane %v1160_v57, %v8645_v25  ;;  %v1175_v3 = vrot.slane %v7383_v58, %v8645_v25 }
 0x226   : > { %v961_v4 = vrot.slane %v953_v59, %v8647_v32  ;;  %v968_v6 = vrot.slane %v954_v60, %v8647_v32  ;;  %v977_v7 = vrot.slane %v969_v61, %v8647_v32  ;;  %v984_v9 = vrot.slane %v970_v62, %v8647_v32 }
 0x227   : > { %v1176_v10 = vcombine.low %v1151_v63, %v1159_v1  ;;  %v1192_v14 = vcombine.low %v1167_v2, %v1175_v3  ;;  %v1177_v29 = vcombine.high %v1151_v63, %v1159_v1  ;;  %v1193_v30 = vcombine.high %v1167_v2, %v1175_v3 }
 0x228   : > { %v989_v15 = vcombine.low %v961_v4, %v968_v6  ;;  %v7380_v16 = vcombine.high %v961_v4, %v968_v6  ;;  %v1005_v17 = vcombine.low %v977_v7, %v984_v9  ;;  %v7381_v18 = vcombine.high %v977_v7, %v984_v9 }
 0x229   : > { %v1184_v19 = vrot.slane %v1176_v10, %v8647_v32  ;;  %v1200_v20 = vrot.slane %v1192_v14, %v8647_v32  ;;  %v1191_v38 = vrot.slane %v1177_v29, %v8647_v32  ;;  %v1207_v39 = vrot.slane %v1193_v30, %v8647_v32 }
 0x22a   : > { %v996_v21 = vrot.slane %v989_v15, %v8645_v25  ;;  %v1004_v22 = vrot.slane %v7380_v16, %v8645_v25  ;;  %v1012_v23 = vrot.slane %v1005_v17, %v8645_v25  ;;  %v1020_v24 = vrot.slane %v7381_v18, %v8645_v25 }
 0x22b   : > { %v1208_v26 = vcombine.low %v1184_v19, %v1200_v20  ;;  %v1209_v37 = vcombine.high %v1184_v19, %v1200_v20  ;;  %v1210_v43 = vcombine.low %v1191_v38, %v1207_v39  ;;  %v1211_v45 = vcombine.high %v1191_v38, %v1207_v39 }
 0x22c   : > { %v1021_v27 = vcombine.low %v996_v21, %v1004_v22  ;;  %v1037_v28 = vcombine.low %v1012_v23, %v1020_v24  ;;  %v1022_v34 = vcombine.high %v996_v21, %v1004_v22  ;;  %v1038_v35 = vcombine.high %v1012_v23, %v1020_v24 }
 0x22d   : > { %7696 = vmatpush3.xpose.msk.msra.mxu1 %vm1360_vm2, %v1208_v26 }
 0x22e   : > { %7700 = vmatprep.subr.mxu1 %v8336_v0  ;;  %v1029_v31 = vrot.slane %v1021_v27, %v8647_v32  ;;  %v1045_v33 = vrot.slane %v1037_v28, %v8647_v32  ;;  %v1036_v41 = vrot.slane %v1022_v34, %v8647_v32  ;;  %v1052_v42 = vrot.slane %v1038_v35, %v8647_v32 }
 0x230   : > { %v1053_v36 = vcombine.low %v1029_v31, %v1045_v33  ;;  %v1054_v40 = vcombine.high %v1029_v31, %v1045_v33  ;;  %v1055_v44 = vcombine.low %v1036_v41, %v1052_v42  ;;  %v1056_v46 = vcombine.high %v1036_v41, %v1052_v42 }
 0x232   : > { %7698 = vmatmul.mubr.msk.f32.vlgmr.msra.gmra.mxu1 %vm1360_vm2, %v1053_v36 }
 0x233   : > { %7701 = vmatpush3.xpose.msk.msra.mxu1 %vm1360_vm2, %v1209_v37  ;;  %7702 = vmatprep.mubr.msk.f32.mxu1 %vm8337_vm0, %v8336_v0 }
 0x234   : > { %7705 = vmatprep.subr.mxu1 %v8336_v0 }
 0x236   : > { %7703 = vmatmul.mubr.msk.f32.vlgmr.msra.gmra.mxu1 %vm1360_vm2, %v1054_v40 }
 0x237   : > { %7706 = vmatpush3.xpose.msk.msra.mxu1 %vm1360_vm2, %v1210_v43  ;;  %7707 = vmatprep.mubr.msk.f32.mxu1 %vm8337_vm0, %v8336_v0 }
 0x238   : > { %7710 = vmatprep.subr.mxu1 %v8336_v0 }
 0x23a   : > { %7708 = vmatmul.mubr.msk.f32.vlgmr.msra.gmra.mxu1 %vm1360_vm2, %v1055_v44 }
 0x23b   : > { %7711 = vmatpush3.xpose.msk.msra.mxu1 %vm1360_vm2, %v1211_v45  ;;  %7712 = vmatprep.mubr.msk.f32.mxu1 %vm8337_vm0, %v8336_v0 }
 0x23c   : > { %7720 = vmatprep.subr.mxu1 %v8336_v0 }
 0x23e   : > { %7713 = vmatmul.mubr.msk.f32.vlgmr.msra.gmra.mxu1 %vm1360_vm2, %v1056_v46 }
 0x23f   : > { %7722 = vmatprep.mubr.msk.f32.mxu1 %vm8337_vm0, %v8336_v0 }
 0x2f2   : > { %v1433_v47 = vpop.f32.mrf.mxu1 }
 0x2f3   : > { %v1665_v48 = vsel %vm1360_vm2, %v1433_v47, -inf }
 0x2f4   : > { %1666 = vmax.xlane.f32.xlu0 %v1665_v48  ;;  %v7699_v49 = vpop.f32.mrf.mxu1 }
 0x2f6   : > { %v1509_v50 = vpop.f32.mrf.mxu1 }
 0x2f7   : > { %v1668_v51 = vsel %vm1360_vm2, %v1509_v50, -inf }
 0x2f8   : > { %1669 = vmax.xlane.f32.xlu1 %v1668_v51  ;;  %v7704_v52 = vpop.f32.mrf.mxu1 }
 0x2fa   : > { %v1585_v53 = vpop.f32.mrf.mxu1 }
 0x2fb   : > { %v1671_v54 = vsel %vm1360_vm2, %v1585_v53, -inf }
 0x2fc   : > { %1672 = vmax.xlane.f32.xlu0 %v1671_v54  ;;  %v7709_v55 = vpop.f32.mrf.mxu1 }
 0x2fe   : > { %v1661_v56 = vpop.f32.mrf.mxu1 }
 0x2ff   : > { %v1674_v57 = vsel %vm1360_vm2, %v1661_v56, -inf }
 0x300   : > { %1675 = vmax.xlane.f32.xlu0 %v1674_v57  ;;  %v7714_v58 = vpop.f32.mrf.mxu1 }
 0x309   : > { %1212 = vrot.lane.b32.xlu1 %v8619_v8, %s9649_s29 }
 0x37d   : > { %v1667_v59 = vpop.xlane.xlu0 %1666 }
 0x37e   : > { %v1677_v60 = vsub.f32 %v1433_v47, %v1667_v59 }
 0x380   : > { %v1681_v61 = vmul.f32 1.442695, %v1677_v60 }
 0x381   : > { %v1670_v62 = vpop.xlane.xlu1 %1669 }
 0x382   : > { %8100 = vpow2.f32 %v1681_v61  ;;  %v1678_v63 = vsub.f32 %v1509_v50, %v1670_v62 }
 0x384   : > { %v1683_v1 = vmul.f32 1.442695, %v1678_v63 }
 0x385   : > { %v1673_v2 = vpop.xlane.xlu0 %1672  ;;  %v1213_v20 = vpop.permute.xlu1 %1212 }
 0x386   : > { %8102 = vpow2.f32 %v1683_v1  ;;  %v1679_v3 = vsub.f32 %v1585_v53, %v1673_v2 }
 0x388   : > { %v1685_v4 = vmul.f32 1.442695, %v1679_v3 }
 0x389   : > { %v1676_v6 = vpop.xlane.xlu0 %1675 }
 0x38a   : > { %8104 = vpow2.f32 %v1685_v4  ;;  %v1680_v7 = vsub.f32 %v1661_v56, %v1676_v6 }
 0x38c   : > { %v1687_v9 = vmul.f32 1.442695, %v1680_v7 }
 0x38e   : > { %8106 = vpow2.f32 %v1687_v9 }
 0x38f   : > { %v8707_v10 = vpop.eup %8100 }
 0x390   : > { %v1689_v8 = vsel %vm1360_vm2, %v8707_v10, 0.0 }
 0x391   : > { %1690 = vadd.xlane.f32.xlu1 %v1689_v8 }
 0x393   : > { %v8103_v14 = vpop.eup %8102 }
 0x394   : > { %v1692_v15 = vsel %vm1360_vm2, %v8103_v14, 0.0 }
 0x395   : > { %1693 = vadd.xlane.f32.xlu0 %v1692_v15 }
 0x397   : > { %v8712_v16 = vpop.eup %8104 }
 0x398   : > { %v1695_v17 = vsel %vm1360_vm2, %v8712_v16, 0.0 }
 0x399   : > { %1696 = vadd.xlane.f32.xlu1 %v1695_v17 }
 0x39b   : > { %v8716_v18 = vpop.eup %8106 }
 0x39c   : > { %v1698_v19 = vsel %vm1360_vm2, %v8716_v18, 0.0 }
 0x39d   : > { %1699 = vadd.xlane.f32.xlu0 %v1698_v19 }
 0x3aa   : > { %1216 = vrot.lane.b32.xlu1 %v8637_v13, %s9649_s29 }
 0x3ae   : > { %1218 = vrot.lane.b32.xlu1 %v8635_v12, %s9649_s29 }
 0x3b3   : > { %1214 = vrot.lane.b32.xlu0 %v8631_v11, %s9649_s29  ;;  %s9707_s29 = sld [smem:[#allocation22_spill]] }
 0x41a   : > { %v1691_v21 = vpop.xlane.xlu1 %1690 }
 0x41b   : > { %8108 = vrcp.f32 %v1691_v21 }
 0x41e   : > { %v1694_v22 = vpop.xlane.xlu0 %1693 }
 0x41f   : > { %8110 = vrcp.f32 %v1694_v22 }
 0x422   : > { %v1697_v23 = vpop.xlane.xlu1 %1696 }
 0x423   : > { %8112 = vrcp.f32 %v1697_v23 }
 0x426   : > { %v1217_v24 = vpop.permute.xlu1 %1216  ;;  %v1700_v26 = vpop.xlane.xlu0 %1699 }
 0x427   : > { %v1224_v27 = vcombine.low %v1213_v20, %v1217_v24  ;;  %v1225_v28 = vcombine.high %v1213_v20, %v1217_v24  ;;  %8114 = vrcp.f32 %v1700_v26 }
 0x428   : > { %v8109_v55 = vpop.eup %8108 }
 0x429   : > { %v1232_v13 = vrot.slane %v1224_v27, %v8645_v25  ;;  %v1239_v12 = vrot.slane %v1225_v28, %v8645_v25  ;;  %v1702_v1 = vmul.f32 %v8109_v55, %v8707_v10  ;;  %v2157_v10 = vld [vmem:[%s9699_s6 + $0x18] sm:$0xff] }
 0x42a   : > { %v1219_v29 = vpop.permute.xlu1 %1218  ;;  %v1215_v30 = vpop.permute.xlu0 %1214 }
 0x42b   : > { %v1240_v31 = vcombine.low %v1215_v30, %v1219_v29  ;;  %v1241_v33 = vcombine.high %v1215_v30, %v1219_v29 }
 0x42c   : > { %v8111_v56 = vpop.eup %8110 }
 0x42d   : > { %v1248_v11 = vrot.slane %v1240_v31, %v8645_v25  ;;  %v1255_v34 = vrot.slane %v1241_v33, %v8645_v25  ;;  %v1704_v2 = vmul.f32 %v8111_v56, %v8103_v14 }
 0x42f   : > { %v1256_v35 = vcombine.low %v1232_v13, %v1248_v11  ;;  %v1257_v36 = vcombine.high %v1232_v13, %v1248_v11  ;;  %v1272_v37 = vcombine.low %v1239_v12, %v1255_v34  ;;  %v1273_v38 = vcombine.high %v1239_v12, %v1255_v34  ;;  %v2156_v12 = vld [vmem:[%s9699_s6 + $0x10] sm:$0xff]  ;;  %v2155_v11 = vld [vmem:[%s9699_s6 + $0x8] sm:$0xff] }
 0x430   : > { %v8113_v61 = vpop.eup %8112 }
 0x431   : > { %v1264_v39 = vrot.slane %v1256_v35, %v8647_v32  ;;  %v1271_v40 = vrot.slane %v1257_v36, %v8647_v32  ;;  %v1280_v41 = vrot.slane %v1272_v37, %v8647_v32  ;;  %v1287_v42 = vrot.slane %v1273_v38, %v8647_v32 }
 0x432   : > { %v1706_v7 = vmul.f32 %v8113_v61, %v8712_v16 }
 0x433   : > { %v1292_v43 = vcombine.low %v1264_v39, %v1271_v40  ;;  %v7384_v44 = vcombine.high %v1264_v39, %v1271_v40  ;;  %v1308_v45 = vcombine.low %v1280_v41, %v1287_v42  ;;  %v7385_v46 = vcombine.high %v1280_v41, %v1287_v42  ;;  %v2154_v42 = vld [vmem:[%s9699_s6] sm:$0xff] }
 0x434   : > { %v8115_v3 = vpop.eup %8114 }
 0x435   : > { %v1299_v47 = vrot.slane %v1292_v43, %v8645_v25  ;;  %v1307_v48 = vrot.slane %v7384_v44, %v8645_v25  ;;  %v1315_v49 = vrot.slane %v1308_v45, %v8645_v25  ;;  %v1323_v50 = vrot.slane %v7385_v46, %v8645_v25 }
 0x436   : > { %v1708_v9 = vmul.f32 %v8115_v3, %v8716_v18 }
 0x437   : > { %v1324_v51 = vcombine.low %v1299_v47, %v1307_v48  ;;  %v1340_v52 = vcombine.low %v1315_v49, %v1323_v50  ;;  %v1325_v53 = vcombine.high %v1299_v47, %v1307_v48  ;;  %v1341_v54 = vcombine.high %v1315_v49, %v1323_v50 }
 0x439   : > { %v1332_v57 = vrot.slane %v1324_v51, %v8647_v32  ;;  %v1348_v58 = vrot.slane %v1340_v52, %v8647_v32  ;;  %v1339_v59 = vrot.slane %v1325_v53, %v8647_v32  ;;  %v1355_v60 = vrot.slane %v1341_v54, %v8647_v32 }
 0x43b   : > { %v1356_v62 = vcombine.low %v1332_v57, %v1348_v58  ;;  %v1357_v63 = vcombine.high %v1332_v57, %v1348_v58  ;;  %v1358_v4 = vcombine.low %v1339_v59, %v1355_v60  ;;  %v1359_v6 = vcombine.high %v1339_v59, %v1355_v60 }
 0x43d   : > { %7716 = vmatpush3.msra.mxu0 %v1356_v62  ;;  %7721 = vmatpush3.msra.mxu1 %v1357_v63 }
 0x43e   : > { %7718 = vmatmul.mubr.msk.f32.vlgmr.msra.gmra.mxu0 %vm1360_vm2, %v1702_v1  ;;  %7723 = vmatmul.mubr.msk.f32.vlgmr.msra.gmra.mxu1 %vm1360_vm2, %v1704_v2  ;;  %v7400_v2 = vld [vmem:[%s9700_s26] ss:$0 sm:$0xff] }
 0x43f   : > { %7725 = vmatprep.subr.mxu0 %v8336_v0  ;;  %7730 = vmatprep.subr.mxu1 %v8336_v0 }
 0x440   : > { %7726 = vmatpush3.msra.mxu0 %v1358_v4  ;;  %7731 = vmatpush3.msra.mxu1 %v1359_v6 }
 0x441   : > { %7727 = vmatprep.mubr.msk.f32.mxu0 %vm8337_vm0, %v8336_v0  ;;  %7732 = vmatprep.mubr.msk.f32.mxu1 %vm8337_vm0, %v8336_v0 }
 0x442   : > { %7728 = vmatmul.mubr.msk.f32.vlgmr.msra.gmra.mxu0 %vm1360_vm2, %v1706_v7  ;;  %7733 = vmatmul.mubr.msk.f32.vlgmr.msra.gmra.mxu1 %vm1360_vm2, %v1708_v9 }
 0x443   : > { %7735 = vmatprep.subr.mxu0 %v8336_v0  ;;  %7743 = vmatprep.mubr.msk.f32.mxu0 %vm8337_vm0, %v8336_v0 }
 0x444   : > { %7746 = vmatprep.subr.mxu1 %v8336_v0  ;;  %7754 = vmatprep.mubr.msk.f32.mxu1 %vm8337_vm0, %v8336_v0 }
 0x445   : > { %7736 = vmatpush3.msra.mxu0 %v2157_v10 }
 0x446   : > { %7737 = vmatprep.subr.mxu0 %v8336_v0 }
 0x447   : > { %7738 = vmatpush3.msra.mxu0 %v2156_v12  ;;  %v7402_v12 = vld [vmem:[%s9631_s16] ss:$0 sm:$0xff] }
 0x448   : > { %7739 = vmatprep.subr.mxu0 %v8336_v0 }
 0x449   : > { %7740 = vmatpush3.msra.mxu0 %v2155_v11 }
 0x44a   : > { %7741 = vmatprep.subr.mxu0 %v8336_v0 }
 0x44b   : > { %7742 = vmatpush3.msra.mxu0 %v2154_v42 }
 0x44c   : > { %7757 = vmatprep.subr.mxu0 %v8336_v0 }
 0x4fe   : > { %v1778_v8 = vpop.f32.mrf.mxu0  ;;  %v1851_v14 = vpop.f32.mrf.mxu1 }
 0x500   : > { %v7719_v15 = vpop.f32.mrf.mxu0  ;;  %v7724_v16 = vpop.f32.mrf.mxu1 }
 0x501   : > { %v824_v15 = vld [vmem:[%s8821_s12] sm:$0xff] }
 0x502   : > { %v1924_v17 = vpop.f32.mrf.mxu0  ;;  %v1997_v18 = vpop.f32.mrf.mxu1 }
 0x503   : > { %v2001_v19 = vcombine.low %v1778_v8, %v1924_v17  ;;  %v2002_v20 = vcombine.high %v1778_v8, %v1924_v17  ;;  %v2017_v21 = vcombine.low %v1851_v14, %v1997_v18  ;;  %v2018_v22 = vcombine.high %v1851_v14, %v1997_v18 }
 0x504   : > { %v7729_v23 = vpop.f32.mrf.mxu0  ;;  %v7734_v24 = vpop.f32.mrf.mxu1 }
 0x505   : > { %v2009_v26 = vrot.slane %v2001_v19, %v8645_v25  ;;  %v2016_v27 = vrot.slane %v2002_v20, %v8645_v25  ;;  %v2025_v28 = vrot.slane %v2017_v21, %v8645_v25  ;;  %v2032_v29 = vrot.slane %v2018_v22, %v8645_v25  ;;  %v2272_v21 = vld [vmem:[%s9703_s25 + $0x18] sm:$0xff]  ;;  %v2271_v22 = vld [vmem:[%s9703_s25 + $0x10] sm:$0xff]  ;;  %v2270_v23 = vld [vmem:[%s9703_s25 + $0x8] sm:$0xff] }
 0x506   : > { %7747 = vmatpush3.msra.mxu1 %v2272_v21  ;;  %v2269_v24 = vld [vmem:[%s9703_s25] sm:$0xff] }
 0x507   : > { %v2033_v30 = vcombine.low %v2009_v26, %v2025_v28  ;;  %v2034_v31 = vcombine.high %v2009_v26, %v2025_v28  ;;  %v2049_v33 = vcombine.low %v2016_v27, %v2032_v29  ;;  %v2050_v13 = vcombine.high %v2016_v27, %v2032_v29  ;;  %7748 = vmatprep.subr.mxu1 %v8336_v0  ;;  %v7406_v26 = vld [vmem:[%s9624_s9] ss:$0 sm:$0xff] }
 0x508   : > { %7749 = vmatpush3.msra.mxu1 %v2271_v22 }
 0x509   : > { %v2041_v34 = vrot.slane %v2033_v30, %v8647_v32  ;;  %v2048_v35 = vrot.slane %v2034_v31, %v8647_v32  ;;  %v2057_v36 = vrot.slane %v2049_v33, %v8647_v32  ;;  %v2064_v37 = vrot.slane %v2050_v13, %v8647_v32  ;;  %7750 = vmatprep.subr.mxu1 %v8336_v0 }
 0x50a   : > { %7751 = vmatpush3.msra.mxu1 %v2270_v23 }
 0x50b   : > { %v2069_v38 = vcombine.low %v2041_v34, %v2048_v35  ;;  %v7398_v39 = vcombine.high %v2041_v34, %v2048_v35  ;;  %v2085_v40 = vcombine.low %v2057_v36, %v2064_v37  ;;  %v7399_v41 = vcombine.high %v2057_v36, %v2064_v37  ;;  %7752 = vmatprep.subr.mxu1 %v8336_v0  ;;  %v7403_v34 = vld [vmem:[%s9632_s17] ss:$0 sm:$0xff] }
 0x50c   : > { %7753 = vmatpush3.msra.mxu1 %v2269_v24 }
 0x50d   : > { %v2076_v43 = vrot.slane %v2069_v38, %v8645_v25  ;;  %v2084_v44 = vrot.slane %v7398_v39, %v8645_v25  ;;  %v2092_v45 = vrot.slane %v2085_v40, %v8645_v25  ;;  %v2100_v46 = vrot.slane %v7399_v41, %v8645_v25  ;;  %7768 = vmatprep.subr.mxu1 %v8336_v0 }
 0x50f   : > { %v2102_v47 = vcombine.high %v2076_v43, %v2084_v44  ;;  %v2118_v48 = vcombine.high %v2092_v45, %v2100_v46  ;;  %v2101_v49 = vcombine.low %v2076_v43, %v2084_v44  ;;  %v2117_v50 = vcombine.low %v2092_v45, %v2100_v46 }
 0x511   : > { %v2116_v51 = vrot.slane %v2102_v47, %v8647_v32  ;;  %v2132_v52 = vrot.slane %v2118_v48, %v8647_v32  ;;  %v2109_v53 = vrot.slane %v2101_v49, %v8647_v32  ;;  %v2125_v54 = vrot.slane %v2117_v50, %v8647_v32 }
 0x513   : > { %v2135_v55 = vcombine.low %v2116_v51, %v2132_v52  ;;  %v2134_v56 = vcombine.high %v2109_v53, %v2125_v54  ;;  %v2133_v57 = vcombine.low %v2109_v53, %v2125_v54  ;;  %v2136_v58 = vcombine.high %v2116_v51, %v2132_v52 }
 0x515   : > { %2142 = vrot.lane.b32.xlu1 %v2135_v55, %s9655_s0  ;;  %2138 = vrot.lane.b32.xlu0 %v2134_v56, %s9653_s7  ;;  %s9701_s7 = sld [smem:[#allocation23_spill]]  ;;  %s9705_s0 = smov 120  }
 0x519   : > { %2146 = vrot.lane.b32.xlu0 %v2136_v58, %s9651_s28  ;;  %s9708_s28 = smov 96  }
 0x51b   : > { %v2357_v10 = vld [vmem:[%s9701_s7 + $0x18] sm:$0xff]  ;;  %v2356_v8 = vld [vmem:[%s9701_s7 + $0x10] sm:$0xff]  ;;  %v2355_v14 = vld [vmem:[%s9701_s7 + $0x8] sm:$0xff] }
 0x587   : > { %v2139_v59 = vpop.permute.xlu0 %2138  ;;  %v2143_v60 = vpop.permute.xlu1 %2142 }
 0x588   : > { %v2149_v61 = vsel %vm1360_vm2, %v2133_v57, %v2139_v59 }
 0x589   : > { %v2151_v63 = vsel %vm2150_vm3, %v2149_v61, %v2143_v60 }
 0x58b   : > { %v2147_v62 = vpop.permute.xlu0 %2146 }
 0x58c   : > { %v2153_v1 = vsel %vm2152_vm4, %v2151_v63, %v2147_v62 }
 0x58d   : > { %7744 = vmatmul.mubr.msk.f32.vlgmr.msra.gmra.mxu0 %vm836_vm1, %v2153_v1 }
 0x58e   : > { %7765 = vmatprep.mubr.msk.f32.mxu0 %vm8337_vm0, %v8336_v0  ;;  %7758 = vmatpush3.msra.mxu0 %v2357_v10 }
 0x58f   : > { %7759 = vmatprep.subr.mxu0 %v8336_v0 }
 0x590   : > { %7760 = vmatpush3.msra.mxu0 %v2356_v8 }
 0x591   : > { %7761 = vmatprep.subr.mxu0 %v8336_v0 }
 0x592   : > { %7762 = vmatpush3.msra.mxu0 %v2355_v14 }
 0x593   : > { %7763 = vmatprep.subr.mxu0 %v8336_v0 }
 0x64d   : > { %v2234_v3 = vpop.f32.mrf.mxu0 }
 0x64e   : > { %v2235_v4 = vadd.f32 %v7400_v2, %v2234_v3 }
 0x64f   : > { %v7745_v6 = vpop.f32.mrf.mxu0 }
 0x650   : > { %v2238_v7 = vadd.f32 %v2235_v4, %v8608_v5  ;;  %v2354_v5 = vld [vmem:[%s9701_s7] sm:$0xff] }
 0x651   : > { %7764 = vmatpush3.msra.mxu0 %v2354_v5 }
 0x652   : > { %v2241_v9 = vsel %vm836_vm1, %v2238_v7, 0.0  ;;  %7766 = vmatmul.mubr.msk.f32.vlgmr.msra.gmra.mxu0 %vm836_vm1, %v824_v15  ;;  %7778 = vmatprep.subr.mxu0 %v8336_v0 }
 0x653   : > { %2242 = vadd.xlane.f32.xlu1 %v2241_v9  ;;  %7780 = vmatprep.mubr.msk.f32.mxu0 %vm8337_vm0, %v8336_v0 }
 0x6dc   : > { %v2243_v16 = vpop.xlane.xlu1 %2242 }
 0x6dd   : > { %v2245_v17 = vmul.f32 0.03125, %v2243_v16  ;;  %v7404_v16 = vld [vmem:[%s9707_s29] ss:$0 sm:$0xff] }
 0x6df   : > { %v2246_v18 = vsub.f32 %v2238_v7, %v2245_v17 }
 0x6e1   : > { %v2247_v19 = vmul.f32 %v2246_v18, %v2246_v18 }
 0x6e3   : > { %v2248_v20 = vsel %vm836_vm1, %v2247_v19, 0.0 }
 0x6e4   : > { %2249 = vadd.xlane.f32.xlu0 %v2248_v20 }
 0x712   : > { %v2434_v27 = vpop.f32.mrf.mxu0 }
 0x713   : > { %v8853_v28 = vadd.f32 %v7406_v26, %v2434_v27 }
 0x714   : > { %v7767_v29 = vpop.f32.mrf.mxu0 }
 0x715   : > { %2588 = vrot.lane.b32.xlu1 %v8853_v28, %s9704_s1  ;;  %2585 = vrot.lane.b32.xlu0 %v8853_v28, %s9705_s0 }
 0x719   : > { %2591 = vrot.lane.b32.xlu1 %v8853_v28, %s9706_s27 }
 0x76d   : > { %v2250_v30 = vpop.xlane.xlu0 %2249 }
 0x76e   : > { %v2251_v31 = vmul.f32 0.03125, %v2250_v30 }
 0x770   : > { %v2252_v33 = vadd.f32 1e-05, %v2251_v31 }
 0x772   : > { %8116 = vrsqrt.f32 %v2252_v33 }
 0x77f   : > { %v8117_v13 = vpop.eup %8116 }
 0x780   : > { %v2254_v11 = vmul.f32 %v8117_v13, %v2246_v18 }
 0x782   : > { %v2261_v35 = vmul.f32 %v7402_v12, %v2254_v11 }
 0x784   : > { %v8867_v36 = vadd.f32 %v7403_v34, %v2261_v35 }
 0x786   : > { %7755 = vmatmul.mubr.msk.f32.vlgmr.msra.gmra.mxu1 %vm836_vm1, %v8867_v36 }
 0x787   : > { %7770 = vmatprep.mubr.msk.f32.mxu1 %vm8337_vm0, %v8336_v0  ;;  %v8873_v37 = vpop.permute.xlu1 %2588  ;;  %v8881_v41 = vpop.permute.xlu0 %2585 }
 0x788   : > { %v2594_v38 = vcombine.low %v8853_v28, %v8873_v37  ;;  %v2595_v39 = vcombine.high %v8853_v28, %v8873_v37 }
 0x78a   : > { %v2602_v42 = vrot.slane %v2594_v38, %v8645_v25  ;;  %v2609_v43 = vrot.slane %v2595_v39, %v8645_v25 }
 0x78b   : > { %v8879_v40 = vpop.permute.xlu1 %2591 }
 0x78c   : > { %v2610_v44 = vcombine.low %v8881_v41, %v8879_v40  ;;  %v2611_v45 = vcombine.high %v8881_v41, %v8879_v40 }
 0x78e   : > { %v2618_v46 = vrot.slane %v2610_v44, %v8645_v25  ;;  %v2625_v47 = vrot.slane %v2611_v45, %v8645_v25 }
 0x790   : > { %v2626_v48 = vcombine.low %v2602_v42, %v2618_v46  ;;  %v2627_v49 = vcombine.high %v2602_v42, %v2618_v46  ;;  %v2642_v50 = vcombine.low %v2609_v43, %v2625_v47  ;;  %v2643_v51 = vcombine.high %v2609_v43, %v2625_v47 }
 0x792   : > { %v2634_v52 = vrot.slane %v2626_v48, %v8647_v32  ;;  %v2641_v53 = vrot.slane %v2627_v49, %v8647_v32  ;;  %v2650_v54 = vrot.slane %v2642_v50, %v8647_v32  ;;  %v2657_v55 = vrot.slane %v2643_v51, %v8647_v32 }
 0x794   : > { %v2662_v56 = vcombine.low %v2634_v52, %v2641_v53  ;;  %v7410_v57 = vcombine.high %v2634_v52, %v2641_v53  ;;  %v2678_v58 = vcombine.low %v2650_v54, %v2657_v55  ;;  %v7411_v59 = vcombine.high %v2650_v54, %v2657_v55 }
 0x796   : > { %v2669_v60 = vrot.slane %v2662_v56, %v8645_v25  ;;  %v2677_v61 = vrot.slane %v7410_v57, %v8645_v25  ;;  %v2685_v62 = vrot.slane %v2678_v58, %v8645_v25  ;;  %v2693_v63 = vrot.slane %v7411_v59, %v8645_v25 }
 0x798   : > { %v2694_v1 = vcombine.low %v2669_v60, %v2677_v61  ;;  %v2695_v2 = vcombine.high %v2669_v60, %v2677_v61  ;;  %v2710_v3 = vcombine.low %v2685_v62, %v2693_v63  ;;  %v2711_v4 = vcombine.high %v2685_v62, %v2693_v63 }
 0x79a   : > { %v2702_v6 = vrot.slane %v2694_v1, %v8647_v32  ;;  %v2718_v7 = vrot.slane %v2710_v3, %v8647_v32  ;;  %v8902_v9 = vrot.slane %v2695_v2, %v8647_v32  ;;  %v8905_v10 = vrot.slane %v2711_v4, %v8647_v32 }
 0x79c   : > { %v2726_v8 = vcombine.low %v2702_v6, %v2718_v7  ;;  %v2728_v14 = vcombine.low %v8902_v9, %v8905_v10  ;;  %v2727_v5 = vcombine.high %v2702_v6, %v2718_v7  ;;  %v2729_v15 = vcombine.high %v8902_v9, %v8905_v10 }
 0x79e   : > { %7769 = vmatpush3.xpose.msk.msra.mxu1 %vm1360_vm2, %v2726_v8  ;;  %7779 = vmatpush3.xpose.msk.msra.mxu0 %vm1360_vm2, %v2728_v14 }
 0x79f   : > { %7773 = vmatprep.subr.mxu1 %v8336_v0  ;;  %7788 = vmatprep.subr.mxu0 %v8336_v0 }
 0x846   : > { %v2349_v17 = vpop.f32.mrf.mxu1 }
 0x847   : > { %v2350_v18 = vadd.f32 %v7404_v16, %v2349_v17 }
 0x848   : > { %v7756_v19 = vpop.f32.mrf.mxu1 }
 0x849   : > { %v2353_v20 = vmul.f32 0.35355338, %v2350_v18 }
 0x84b   : > { %2442 = vrot.lane.b32.xlu1 %v2353_v20, %s9704_s1  ;;  %2439 = vrot.lane.b32.xlu0 %v2353_v20, %s9705_s0 }
 0x84f   : > { %2445 = vrot.lane.b32.xlu0 %v2353_v20, %s9706_s27 }
 0x8bd   : > { %v2443_v21 = vpop.permute.xlu1 %2442  ;;  %v2440_v22 = vpop.permute.xlu0 %2439 }
 0x8be   : > { %v2448_v23 = vcombine.low %v2353_v20, %v2443_v21  ;;  %v2449_v24 = vcombine.high %v2353_v20, %v2443_v21 }
 0x8c0   : > { %v2456_v30 = vrot.slane %v2448_v23, %v8645_v25  ;;  %v2463_v31 = vrot.slane %v2449_v24, %v8645_v25 }
 0x8c1   : > { %v2446_v26 = vpop.permute.xlu0 %2445 }
 0x8c2   : > { %v2464_v27 = vcombine.low %v2440_v22, %v2446_v26  ;;  %v2465_v29 = vcombine.high %v2440_v22, %v2446_v26 }
 0x8c4   : > { %v2472_v33 = vrot.slane %v2464_v27, %v8645_v25  ;;  %v2479_v13 = vrot.slane %v2465_v29, %v8645_v25 }
 0x8c6   : > { %v2480_v12 = vcombine.low %v2456_v30, %v2472_v33  ;;  %v2481_v11 = vcombine.high %v2456_v30, %v2472_v33  ;;  %v2496_v34 = vcombine.low %v2463_v31, %v2479_v13  ;;  %v2497_v35 = vcombine.high %v2463_v31, %v2479_v13 }
 0x8c8   : > { %v2488_v38 = vrot.slane %v2480_v12, %v8647_v32  ;;  %v2495_v39 = vrot.slane %v2481_v11, %v8647_v32  ;;  %v2504_v42 = vrot.slane %v2496_v34, %v8647_v32  ;;  %v2511_v43 = vrot.slane %v2497_v35, %v8647_v32 }
 0x8ca   : > { %v2516_v44 = vcombine.low %v2488_v38, %v2495_v39  ;;  %v7408_v45 = vcombine.high %v2488_v38, %v2495_v39  ;;  %v2532_v46 = vcombine.low %v2504_v42, %v2511_v43  ;;  %v7409_v47 = vcombine.high %v2504_v42, %v2511_v43 }
 0x8cc   : > { %v2523_v48 = vrot.slane %v2516_v44, %v8645_v25  ;;  %v2531_v49 = vrot.slane %v7408_v45, %v8645_v25  ;;  %v2539_v50 = vrot.slane %v2532_v46, %v8645_v25  ;;  %v2547_v51 = vrot.slane %v7409_v47, %v8645_v25 }
 0x8ce   : > { %v2548_v52 = vcombine.low %v2523_v48, %v2531_v49  ;;  %v2549_v53 = vcombine.high %v2523_v48, %v2531_v49  ;;  %v2564_v54 = vcombine.low %v2539_v50, %v2547_v51  ;;  %v2565_v55 = vcombine.high %v2539_v50, %v2547_v51 }
 0x8d0   : > { %v2556_v56 = vrot.slane %v2548_v52, %v8647_v32  ;;  %v2572_v57 = vrot.slane %v2564_v54, %v8647_v32  ;;  %v2563_v58 = vrot.slane %v2549_v53, %v8647_v32  ;;  %v2579_v59 = vrot.slane %v2565_v55, %v8647_v32 }
 0x8d2   : > { %v2580_v60 = vcombine.low %v2556_v56, %v2572_v57  ;;  %v2582_v61 = vcombine.low %v2563_v58, %v2579_v59  ;;  %v2581_v62 = vcombine.high %v2556_v56, %v2572_v57  ;;  %v2583_v63 = vcombine.high %v2563_v58, %v2579_v59 }
 0x8d4   : > { %7771 = vmatmul.mubr.msk.f32.vlgmr.msra.gmra.mxu1 %vm1360_vm2, %v2580_v60  ;;  %7781 = vmatmul.mubr.msk.f32.vlgmr.msra.gmra.mxu0 %vm1360_vm2, %v2582_v61 }
 0x8d5   : > { %7774 = vmatpush3.xpose.msk.msra.mxu1 %vm1360_vm2, %v2727_v5  ;;  %7775 = vmatprep.mubr.msk.f32.mxu1 %vm8337_vm0, %v8336_v0 }
 0x8d6   : > { %7783 = vmatprep.subr.mxu1 %v8336_v0  ;;  %7790 = vmatprep.mubr.msk.f32.mxu0 %vm8337_vm0, %v8336_v0 }
 0x8d8   : > { %7776 = vmatmul.mubr.msk.f32.vlgmr.msra.gmra.mxu1 %vm1360_vm2, %v2581_v62 }
 0x8d9   : > { %7784 = vmatpush3.xpose.msk.msra.mxu1 %vm1360_vm2, %v2729_v15  ;;  %7785 = vmatprep.mubr.msk.f32.mxu1 %vm8337_vm0, %v8336_v0 }
 0x8da   : > { %7793 = vmatprep.subr.mxu1 %v8336_v0 }
 0x8dc   : > { %7786 = vmatmul.mubr.msk.f32.vlgmr.msra.gmra.mxu1 %vm1360_vm2, %v2583_v63 }
 0x8dd   : > { %7795 = vmatprep.mubr.msk.f32.mxu1 %vm8337_vm0, %v8336_v0 }
 0x994   : > { %v2950_v1 = vpop.f32.mrf.mxu1  ;;  %v3102_v2 = vpop.f32.mrf.mxu0 }
 0x995   : > { %v3182_v3 = vsel %vm1360_vm2, %v2950_v1, -inf  ;;  %v3188_v5 = vsel %vm1360_vm2, %v3102_v2, -inf }
 0x996   : > { %3183 = vmax.xlane.f32.xlu1 %v3182_v3  ;;  %v7772_v4 = vpop.f32.mrf.mxu1  ;;  %v7782_v6 = vpop.f32.mrf.mxu0 }
 0x998   : > { %v3026_v7 = vpop.f32.mrf.mxu1 }
 0x999   : > { %v3185_v9 = vsel %vm1360_vm2, %v3026_v7, -inf }
 0x99a   : > { %3186 = vmax.xlane.f32.xlu0 %v3185_v9  ;;  %v7777_v10 = vpop.f32.mrf.mxu1 }
 0x99c   : > { %v3178_v8 = vpop.f32.mrf.mxu1 }
 0x99d   : > { %v3191_v14 = vsel %vm1360_vm2, %v3178_v8, -inf }
 0x99e   : > { %3192 = vmax.xlane.f32.xlu1 %v3191_v14  ;;  %v7787_v15 = vpop.f32.mrf.mxu1  ;;  %3189 = vmax.xlane.f32.xlu0 %v3188_v5 }
 0x9af   : > { %2732 = vrot.lane.b32.xlu1 %v8881_v41, %s9708_s28 }
 0x9b4   : > { %2730 = vrot.lane.b32.xlu0 %v8853_v28, %s9708_s28 }
 0xa1f   : > { %v3184_v16 = vpop.xlane.xlu1 %3183 }
 0xa20   : > { %v3194_v17 = vsub.f32 %v2950_v1, %v3184_v16 }
 0xa22   : > { %v3198_v18 = vmul.f32 1.442695, %v3194_v17 }
 0xa23   : > { %v3187_v19 = vpop.xlane.xlu0 %3186 }
 0xa24   : > { %8118 = vpow2.f32 %v3198_v18  ;;  %v3195_v20 = vsub.f32 %v3026_v7, %v3187_v19 }
 0xa26   : > { %v3200_v21 = vmul.f32 1.442695, %v3195_v20 }
 0xa27   : > { %v3193_v22 = vpop.xlane.xlu1 %3192  ;;  %v3190_v23 = vpop.xlane.xlu0 %3189 }
 0xa28   : > { %8120 = vpow2.f32 %v3200_v21  ;;  %v3197_v24 = vsub.f32 %v3178_v8, %v3193_v22  ;;  %v3196_v26 = vsub.f32 %v3102_v2, %v3190_v23 }
 0xa2a   : > { %v3204_v27 = vmul.f32 1.442695, %v3197_v24  ;;  %v3202_v29 = vmul.f32 1.442695, %v3196_v26 }
 0xa2b   : > { %v2733_v34 = vpop.permute.xlu1 %2732  ;;  %v2731_v35 = vpop.permute.xlu0 %2730 }
 0xa2c   : > { %8122 = vpow2.f32 %v3204_v27 }
 0xa2d   : > { %8124 = vpow2.f32 %v3202_v29 }
 0xa31   : > { %v8961_v41 = vpop.eup %8118 }
 0xa32   : > { %v3206_v28 = vsel %vm1360_vm2, %v8961_v41, 0.0 }
 0xa33   : > { %3207 = vadd.xlane.f32.xlu0 %v3206_v28 }
 0xa35   : > { %v8121_v30 = vpop.eup %8120 }
 0xa36   : > { %v3209_v31 = vsel %vm1360_vm2, %v8121_v30, 0.0 }
 0xa37   : > { %3210 = vadd.xlane.f32.xlu1 %v3209_v31 }
 0xa39   : > { %v8966_v33 = vpop.eup %8122 }
 0xa3a   : > { %v8968_v13 = vpop.eup %8124  ;;  %v3215_v12 = vsel %vm1360_vm2, %v8966_v33, 0.0 }
 0xa3b   : > { %3216 = vadd.xlane.f32.xlu1 %v3215_v12  ;;  %v3212_v11 = vsel %vm1360_vm2, %v8968_v13, 0.0 }
 0xa3c   : > { %3213 = vadd.xlane.f32.xlu0 %v3212_v11 }
 0xa4c   : > { %2734 = vrot.lane.b32.xlu1 %v8873_v37, %s9708_s28 }
 0xa52   : > { %2736 = vrot.lane.b32.xlu0 %v8879_v40, %s9708_s28 }
 0xabc   : > { %v3208_v39 = vpop.xlane.xlu0 %3207 }
 0xabd   : > { %8126 = vrcp.f32 %v3208_v39 }
 0xac0   : > { %v3211_v38 = vpop.xlane.xlu1 %3210 }
 0xac1   : > { %8128 = vrcp.f32 %v3211_v38 }
 0xac4   : > { %v3217_v42 = vpop.xlane.xlu1 %3216 }
 0xac5   : > { %v3214_v43 = vpop.xlane.xlu0 %3213  ;;  %8130 = vrcp.f32 %v3217_v42 }
 0xac6   : > { %8132 = vrcp.f32 %v3214_v43 }
 0xac8   : > { %v2735_v44 = vpop.permute.xlu1 %2734 }
 0xac9   : > { %v2742_v45 = vcombine.low %v2731_v35, %v2735_v44  ;;  %v2743_v46 = vcombine.high %v2731_v35, %v2735_v44  ;;  %v2737_v47 = vpop.permute.xlu0 %2736 }
 0xaca   : > { %v2758_v48 = vcombine.low %v2733_v34, %v2737_v47  ;;  %v2759_v49 = vcombine.high %v2733_v34, %v2737_v47  ;;  %v8127_v8 = vpop.eup %8126 }
 0xacb   : > { %v2750_v50 = vrot.slane %v2742_v45, %v8645_v25  ;;  %v2757_v37 = vrot.slane %v2743_v46, %v8645_v25  ;;  %v3219_v21 = vmul.f32 %v8127_v8, %v8961_v41  ;;  %v3672_v41 = vld [vmem:[#allocation2 + $0x18] sm:$0xff] }
 0xacc   : > { %v2766_v40 = vrot.slane %v2758_v48, %v8645_v25  ;;  %v2773_v51 = vrot.slane %v2759_v49, %v8645_v25 }
 0xace   : > { %v2774_v52 = vcombine.low %v2750_v50, %v2766_v40  ;;  %v2775_v53 = vcombine.high %v2750_v50, %v2766_v40  ;;  %v2790_v54 = vcombine.low %v2757_v37, %v2773_v51  ;;  %v2791_v55 = vcombine.high %v2757_v37, %v2773_v51  ;;  %v8129_v14 = vpop.eup %8128  ;;  %v3671_v37 = vld [vmem:[#allocation2 + $0x10] sm:$0xff]  ;;  %v3670_v40 = vld [vmem:[#allocation2 + $0x8] sm:$0xff] }
 0xacf   : > { %v3221_v22 = vmul.f32 %v8129_v14, %v8121_v30 }
 0xad0   : > { %v2782_v56 = vrot.slane %v2774_v52, %v8647_v32  ;;  %v2789_v57 = vrot.slane %v2775_v53, %v8647_v32  ;;  %v2798_v58 = vrot.slane %v2790_v54, %v8647_v32  ;;  %v2805_v59 = vrot.slane %v2791_v55, %v8647_v32 }
 0xad2   : > { %v2810_v60 = vcombine.low %v2782_v56, %v2789_v57  ;;  %v7412_v61 = vcombine.high %v2782_v56, %v2789_v57  ;;  %v2826_v62 = vcombine.low %v2798_v58, %v2805_v59  ;;  %v7413_v63 = vcombine.high %v2798_v58, %v2805_v59  ;;  %v8131_v18 = vpop.eup %8130  ;;  %v3669_v59 = vld [vmem:[#allocation2] sm:$0xff] }
 0xad3   : > { %v8133_v23 = vpop.eup %8132  ;;  %v3225_v29 = vmul.f32 %v8131_v18, %v8966_v33 }
 0xad4   : > { %v2817_v1 = vrot.slane %v2810_v60, %v8645_v25  ;;  %v2825_v2 = vrot.slane %v7412_v61, %v8645_v25  ;;  %v2833_v3 = vrot.slane %v2826_v62, %v8645_v25  ;;  %v2841_v4 = vrot.slane %v7413_v63, %v8645_v25 }
 0xad5   : > { %v3223_v27 = vmul.f32 %v8133_v23, %v8968_v13 }
 0xad6   : > { %v2842_v6 = vcombine.low %v2817_v1, %v2825_v2  ;;  %v2858_v7 = vcombine.low %v2833_v3, %v2841_v4  ;;  %v2843_v9 = vcombine.high %v2817_v1, %v2825_v2  ;;  %v2859_v10 = vcombine.high %v2833_v3, %v2841_v4 }
 0xad8   : > { %v2850_v5 = vrot.slane %v2842_v6, %v8647_v32  ;;  %v2866_v15 = vrot.slane %v2858_v7, %v8647_v32  ;;  %v2857_v16 = vrot.slane %v2843_v9, %v8647_v32  ;;  %v2873_v17 = vrot.slane %v2859_v10, %v8647_v32 }
 0xada   : > { %v2874_v19 = vcombine.low %v2850_v5, %v2866_v15  ;;  %v2875_v20 = vcombine.high %v2850_v5, %v2866_v15  ;;  %v2876_v24 = vcombine.low %v2857_v16, %v2873_v17  ;;  %v2877_v26 = vcombine.high %v2857_v16, %v2873_v17 }
 0xadc   : > { %7789 = vmatpush3.msra.mxu0 %v2874_v19  ;;  %7794 = vmatpush3.msra.mxu1 %v2875_v20 }
 0xadd   : > { %7791 = vmatmul.mubr.msk.f32.vlgmr.msra.gmra.mxu0 %vm1360_vm2, %v3219_v21  ;;  %7796 = vmatmul.mubr.msk.f32.vlgmr.msra.gmra.mxu1 %vm1360_vm2, %v3221_v22  ;;  %v7428_v22 = vld [vmem:[%s9712_s11] ss:$0 sm:$0xff]  ;;  %s9713_s11 = smov 64  }
 0xade   : > { %7798 = vmatprep.subr.mxu0 %v8336_v0  ;;  %7803 = vmatprep.subr.mxu1 %v8336_v0 }
 0xadf   : > { %7799 = vmatpush3.msra.mxu0 %v2876_v24  ;;  %7804 = vmatpush3.msra.mxu1 %v2877_v26 }
 0xae0   : > { %7800 = vmatprep.mubr.msk.f32.mxu0 %vm8337_vm0, %v8336_v0  ;;  %7805 = vmatprep.mubr.msk.f32.mxu1 %vm8337_vm0, %v8336_v0 }
 0xae1   : > { %7801 = vmatmul.mubr.msk.f32.vlgmr.msra.gmra.mxu0 %vm1360_vm2, %v3223_v27  ;;  %7806 = vmatmul.mubr.msk.f32.vlgmr.msra.gmra.mxu1 %vm1360_vm2, %v3225_v29 }
 0xae2   : > { %7808 = vmatprep.subr.mxu0 %v8336_v0  ;;  %7816 = vmatprep.mubr.msk.f32.mxu0 %vm8337_vm0, %v8336_v0 }
 0xae3   : > { %7819 = vmatprep.subr.mxu1 %v8336_v0  ;;  %7827 = vmatprep.mubr.msk.f32.mxu1 %vm8337_vm0, %v8336_v0 }
 0xae4   : > { %7809 = vmatpush3.msra.mxu0 %v3672_v41 }
 0xae5   : > { %7810 = vmatprep.subr.mxu0 %v8336_v0 }
 0xae6   : > { %7811 = vmatpush3.msra.mxu0 %v3671_v37 }
 0xae7   : > { %7812 = vmatprep.subr.mxu0 %v8336_v0 }
 0xae8   : > { %7813 = vmatpush3.msra.mxu0 %v3670_v40  ;;  %v3870_v40 = vld [vmem:[%s9629_s14 + $0x10] sm:$0xff] }
 0xae9   : > { %7814 = vmatprep.subr.mxu0 %v8336_v0 }
 0xaea   : > { %7815 = vmatpush3.msra.mxu0 %v3669_v59 }
 0xaeb   : > { %7830 = vmatprep.subr.mxu0 %v8336_v0 }
 0xb9d   : > { %v3295_v28 = vpop.f32.mrf.mxu0  ;;  %v3368_v30 = vpop.f32.mrf.mxu1 }
 0xb9f   : > { %v7792_v31 = vpop.f32.mrf.mxu0  ;;  %v7797_v33 = vpop.f32.mrf.mxu1 }
 0xba1   : > { %v3441_v13 = vpop.f32.mrf.mxu0  ;;  %v3514_v12 = vpop.f32.mrf.mxu1 }
 0xba2   : > { %v3518_v11 = vcombine.low %v3295_v28, %v3441_v13  ;;  %v3519_v34 = vcombine.high %v3295_v28, %v3441_v13  ;;  %v3534_v35 = vcombine.low %v3368_v30, %v3514_v12  ;;  %v3535_v38 = vcombine.high %v3368_v30, %v3514_v12  ;;  %v3786_v13 = vld [vmem:[#allocation4 + $0x18] sm:$0xff]  ;;  %v3785_v12 = vld [vmem:[#allocation4 + $0x10] sm:$0xff] }
 0xba3   : > { %v7802_v39 = vpop.f32.mrf.mxu0  ;;  %v7807_v42 = vpop.f32.mrf.mxu1  ;;  %7820 = vmatpush3.msra.mxu1 %v3786_v13 }
 0xba4   : > { %v3526_v43 = vrot.slane %v3518_v11, %v8645_v25  ;;  %v3533_v44 = vrot.slane %v3519_v34, %v8645_v25  ;;  %v3542_v45 = vrot.slane %v3534_v35, %v8645_v25  ;;  %v3549_v46 = vrot.slane %v3535_v38, %v8645_v25  ;;  %7821 = vmatprep.subr.mxu1 %v8336_v0  ;;  %v3784_v11 = vld [vmem:[#allocation4 + $0x8] sm:$0xff]  ;;  %v3875_v34 = vld [vmem:[%s9629_s14 + $0x38] sm:$0xff]  ;;  %v3874_v35 = vld [vmem:[%s9629_s14 + $0x30] sm:$0xff] }
 0xba5   : > { %7822 = vmatpush3.msra.mxu1 %v3785_v12  ;;  %v3873_v38 = vld [vmem:[%s9629_s14 + $0x28] sm:$0xff]  ;;  %v3872_v39 = vld [vmem:[%s9629_s14 + $0x20] sm:$0xff]  ;;  %v3871_v42 = vld [vmem:[%s9629_s14 + $0x18] sm:$0xff] }
 0xba6   : > { %v3550_v47 = vcombine.low %v3526_v43, %v3542_v45  ;;  %v3551_v48 = vcombine.high %v3526_v43, %v3542_v45  ;;  %v3566_v49 = vcombine.low %v3533_v44, %v3549_v46  ;;  %v3567_v50 = vcombine.high %v3533_v44, %v3549_v46  ;;  %7823 = vmatprep.subr.mxu1 %v8336_v0 }
 0xba7   : > { %7824 = vmatpush3.msra.mxu1 %v3784_v11 }
 0xba8   : > { %v3558_v51 = vrot.slane %v3550_v47, %v8647_v32  ;;  %v3565_v52 = vrot.slane %v3551_v48, %v8647_v32  ;;  %v3574_v53 = vrot.slane %v3566_v49, %v8647_v32  ;;  %v3581_v54 = vrot.slane %v3567_v50, %v8647_v32  ;;  %7825 = vmatprep.subr.mxu1 %v8336_v0  ;;  %v7430_v47 = vld [vmem:[%s9633_s18] ss:$0 sm:$0xff] }
 0xba9   : > { %v7431_v49 = vld [vmem:[%s9634_s19] ss:$0 sm:$0xff] }
 0xbaa   : > { %v3586_v55 = vcombine.low %v3558_v51, %v3565_v52  ;;  %v7426_v56 = vcombine.high %v3558_v51, %v3565_v52  ;;  %v3602_v57 = vcombine.low %v3574_v53, %v3581_v54  ;;  %v7427_v58 = vcombine.high %v3574_v53, %v3581_v54  ;;  %v3869_v51 = vld [vmem:[%s9629_s14 + $0x8] sm:$0xff]  ;;  %v3868_v52 = vld [vmem:[%s9629_s14] sm:$0xff] }
 0xbab   : > { %v7432_v53 = vld [vmem:[#allocation6] ss:$0 sm:$0xff] }
 0xbac   : > { %v3593_v60 = vrot.slane %v3586_v55, %v8645_v25  ;;  %v3601_v61 = vrot.slane %v7426_v56, %v8645_v25  ;;  %v3609_v62 = vrot.slane %v3602_v57, %v8645_v25  ;;  %v3617_v63 = vrot.slane %v7427_v58, %v8645_v25  ;;  %v7434_v58 = vld [vmem:[#allocation7] ss:$0 sm:$0xff] }
 0xbae   : > { %v3619_v1 = vcombine.high %v3593_v60, %v3601_v61  ;;  %v3635_v2 = vcombine.high %v3609_v62, %v3617_v63  ;;  %v3618_v3 = vcombine.low %v3593_v60, %v3601_v61  ;;  %v3634_v4 = vcombine.low %v3609_v62, %v3617_v63 }
 0xbb0   : > { %v3633_v6 = vrot.slane %v3619_v1, %v8647_v32  ;;  %v3649_v7 = vrot.slane %v3635_v2, %v8647_v32  ;;  %v3626_v9 = vrot.slane %v3618_v3, %v8647_v32  ;;  %v3642_v10 = vrot.slane %v3634_v4, %v8647_v32 }
 0xbb2   : > { %v3652_v8 = vcombine.low %v3633_v6, %v3649_v7  ;;  %v3651_v14 = vcombine.high %v3626_v9, %v3642_v10  ;;  %v3650_v5 = vcombine.low %v3626_v9, %v3642_v10  ;;  %v3653_v15 = vcombine.high %v3633_v6, %v3649_v7  ;;  %v7441_v7 = vld [vmem:[%s9696_s3 + $0x38] sm:$0xff]  ;;  %v7440_v9 = vld [vmem:[%s9696_s3 + $0x30] sm:$0xff]  ;;  %v7439_v10 = vld [vmem:[%s9696_s3 + $0x28] sm:$0xff] }
 0xbb4   : > { %3659 = vrot.lane.b32.xlu0 %v3652_v8, %s9709_s8  ;;  %3655 = vrot.lane.b32.xlu1 %v3651_v14, %s9710_s4  ;;  %v7438_v8 = vld [vmem:[%s9696_s3 + $0x20] sm:$0xff] }
 0xbb8   : > { %3663 = vrot.lane.b32.xlu1 %v3653_v15, %s9711_s30 }
 0xc26   : > { %v3656_v16 = vpop.permute.xlu1 %3655  ;;  %v3660_v17 = vpop.permute.xlu0 %3659 }
 0xc27   : > { %v3666_v18 = vsel %vm1360_vm2, %v3650_v5, %v3656_v16 }
 0xc28   : > { %v3667_v20 = vsel %vm2150_vm3, %v3666_v18, %v3660_v17  ;;  %v7436_v17 = vld [vmem:[%s9635_s20] ss:$0 sm:$0xff] }
 0xc2a   : > { %v3664_v19 = vpop.permute.xlu1 %3663 }
 0xc2b   : > { %v3668_v21 = vsel %vm2152_vm4, %v3667_v20, %v3664_v19  ;;  %v7437_v19 = vld [vmem:[%s9636_s21] ss:$0 sm:$0xff] }
 0xc2c   : > { %7817 = vmatmul.mubr.msk.f32.vlgmr.msra.gmra.mxu0 %vm836_vm1, %v3668_v21 }
 0xc2d   : > { %7846 = vmatprep.mubr.msk.f32.mxu0 %vm8337_vm0, %v8336_v0  ;;  %7831 = vmatpush3.msra.mxu0 %v3875_v34 }
 0xc2e   : > { %7832 = vmatprep.subr.mxu0 %v8336_v0 }
 0xc2f   : > { %7833 = vmatpush3.msra.mxu0 %v3874_v35 }
 0xc30   : > { %7834 = vmatprep.subr.mxu0 %v8336_v0 }
 0xc31   : > { %7835 = vmatpush3.msra.mxu0 %v3873_v38 }
 0xc32   : > { %7836 = vmatprep.subr.mxu0 %v8336_v0 }
 0xc33   : > { %7837 = vmatpush3.msra.mxu0 %v3872_v39 }
 0xc34   : > { %7838 = vmatprep.subr.mxu0 %v8336_v0 }
 0xc35   : > { %7839 = vmatpush3.msra.mxu0 %v3871_v42 }
 0xc36   : > { %7840 = vmatprep.subr.mxu0 %v8336_v0 }
 0xc37   : > { %7841 = vmatpush3.msra.mxu0 %v3870_v40 }
 0xc38   : > { %7842 = vmatprep.subr.mxu0 %v8336_v0 }
 0xc39   : > { %7843 = vmatpush3.msra.mxu0 %v3869_v51 }
 0xc3a   : > { %7844 = vmatprep.subr.mxu0 %v8336_v0 }
 0xc3b   : > { %7845 = vmatpush3.msra.mxu0 %v3868_v52 }
 0xc3c   : > { %7870 = vmatprep.subr.mxu0 %v8336_v0 }
 0xcec   : > { %v3749_v23 = vpop.f32.mrf.mxu0 }
 0xced   : > { %v3750_v24 = vadd.f32 %v7428_v22, %v3749_v23  ;;  %v7443_v22 = vld [vmem:[%s9698_s2 + $0x1] ss:$0 sm:$0xff] }
 0xcee   : > { %v7818_v26 = vpop.f32.mrf.mxu0 }
 0xcef   : > { %v3753_v27 = vadd.f32 %v3750_v24, %v8867_v36  ;;  %v3783_v36 = vld [vmem:[#allocation4] sm:$0xff] }
 0xcf0   : > { %7826 = vmatpush3.msra.mxu1 %v3783_v36 }
 0xcf1   : > { %v3756_v29 = vsel %vm836_vm1, %v3753_v27, 0.0  ;;  %7849 = vmatprep.subr.mxu1 %v8336_v0 }
 0xcf2   : > { %3757 = vadd.xlane.f32.xlu0 %v3756_v29 }
 0xd7b   : > { %v3758_v41 = vpop.xlane.xlu0 %3757 }
 0xd7c   : > { %v3759_v28 = vmul.f32 0.03125, %v3758_v41 }
 0xd7e   : > { %v3760_v30 = vsub.f32 %v3753_v27, %v3759_v28 }
 0xd80   : > { %v3761_v31 = vmul.f32 %v3760_v30, %v3760_v30 }
 0xd82   : > { %v3762_v33 = vsel %vm836_vm1, %v3761_v31, 0.0 }
 0xd83   : > { %3763 = vadd.xlane.f32.xlu1 %v3762_v33 }
 0xe0c   : > { %v3764_v43 = vpop.xlane.xlu1 %3763 }
 0xe0d   : > { %v3765_v44 = vmul.f32 0.03125, %v3764_v43 }
 0xe0f   : > { %v3766_v45 = vadd.f32 1e-05, %v3765_v44 }
 0xe11   : > { %8134 = vrsqrt.f32 %v3766_v45 }
 0xe1e   : > { %v8135_v46 = vpop.eup %8134 }
 0xe1f   : > { %v3768_v48 = vmul.f32 %v8135_v46, %v3760_v30 }
 0xe21   : > { %v3775_v50 = vmul.f32 %v7430_v47, %v3768_v48 }
 0xe23   : > { %v3782_v37 = vadd.f32 %v7431_v49, %v3775_v50 }
 0xe25   : > { %7828 = vmatmul.mubr.msk.f32.vlgmr.msra.gmra.mxu1 %vm836_vm1, %v3782_v37 }
 0xe26   : > { %7857 = vmatprep.mubr.msk.f32.mxu1 %vm8337_vm0, %v8336_v0  ;;  %7850 = vmatpush3.msra.mxu1 %v7441_v7 }
 0xe27   : > { %7851 = vmatprep.subr.mxu1 %v8336_v0 }
 0xe28   : > { %7852 = vmatpush3.msra.mxu1 %v7440_v9 }
 0xe29   : > { %7853 = vmatprep.subr.mxu1 %v8336_v0 }
 0xe2a   : > { %7854 = vmatpush3.msra.mxu1 %v7439_v10 }
 0xe2b   : > { %7855 = vmatprep.subr.mxu1 %v8336_v0 }
 0xe2c   : > { %7856 = vmatpush3.msra.mxu1 %v7438_v8 }
 0xe2d   : > { %7860 = vmatprep.subr.mxu1 %v8336_v0 }
 0xee5   : > { %v3863_v54 = vpop.f32.mrf.mxu1 }
 0xee6   : > { %v3864_v55 = vadd.f32 %v7432_v53, %v3863_v54 }
 0xee7   : > { %v7829_v56 = vpop.f32.mrf.mxu1 }
 0xee8   : > { %v3867_v57 = vmax.f32 %v3864_v55, 0.0 }
 0xeea   : > { %7847 = vmatmul.mubr.msk.f32.vlgmr.msra.gmra.mxu0 %vm3883_vm5, %v3867_v57 }
 0xeeb   : > { %7872 = vmatprep.mubr.msk.f32.mxu0 %vm8337_vm0, %v8336_v0 }
 0xfaa   : > { %v3953_v59 = vpop.f32.mrf.mxu0 }
 0xfab   : > { %v3954_v60 = vadd.f32 %v7434_v58, %v3953_v59 }
 0xfac   : > { %v7848_v61 = vpop.f32.mrf.mxu0 }
 0xfad   : > { %v3957_v62 = vadd.f32 %v3954_v60, %v3782_v37 }
 0xfaf   : > { %v3960_v63 = vsel %vm836_vm1, %v3957_v62, 0.0 }
 0xfb0   : > { %3961 = vadd.xlane.f32.xlu0 %v3960_v63 }
0x1039   : > { %v3962_v1 = vpop.xlane.xlu0 %3961 }
0x103a   : > { %v3963_v2 = vmul.f32 0.03125, %v3962_v1 }
0x103c   : > { %v3964_v3 = vsub.f32 %v3957_v62, %v3963_v2 }
0x103e   : > { %v3965_v4 = vmul.f32 %v3964_v3, %v3964_v3 }
0x1040   : > { %v3966_v6 = vsel %vm836_vm1, %v3965_v4, 0.0 }
0x1041   : > { %3967 = vadd.xlane.f32.xlu0 %v3966_v6 }
0x10ca   : > { %v3968_v14 = vpop.xlane.xlu0 %3967 }
0x10cb   : > { %v3969_v5 = vmul.f32 0.03125, %v3968_v14 }
0x10cd   : > { %v3970_v15 = vadd.f32 1e-05, %v3969_v5 }
0x10cf   : > { %8136 = vrsqrt.f32 %v3970_v15 }
0x10dc   : > { %v8137_v16 = vpop.eup %8136 }
0x10dd   : > { %v3972_v18 = vmul.f32 %v8137_v16, %v3964_v3 }
0x10df   : > { %v3979_v20 = vmul.f32 %v7436_v17, %v3972_v18 }
0x10e1   : > { %v9120_v21 = vadd.f32 %v7437_v19, %v3979_v20 }
0x10e3   : > { %7858 = vmatmul.mubr.msk.f32.vlgmr.msra.gmra.mxu1 %vm836_vm1, %v9120_v21 }
0x10e4   : > { %7862 = vmatprep.mubr.msk.f32.mxu1 %vm8337_vm0, %v8336_v0 }
0x11a3   : > { %v4069_v23 = vpop.f32.mrf.mxu1 }
0x11a4   : > { %v9129_v24 = vadd.f32 %v7443_v22, %v4069_v23 }
0x11a5   : > { %v7859_v26 = vpop.f32.mrf.mxu1 }
0x11a6   : > { %4223 = vrot.lane.b32.xlu0 %v9129_v24, %s9704_s1  ;;  %4221 = vrot.lane.b32.xlu1 %v9129_v24, %s9705_s0  ;;  %v4073_v27 = vmul.f32 0.35355338, %v9129_v24 }
0x11aa   : > { %4225 = vrot.lane.b32.xlu1 %v9129_v24, %s9706_s27 }
0x11ae   : > { %4227 = vrot.lane.b32.xlu1 %v9129_v24, %s9708_s28 }
0x11b2   : > { %4075 = vrot.lane.b32.xlu1 %v4073_v27, %s9705_s0 }
0x1218   : > { %v9141_v29 = vpop.permute.xlu0 %4223  ;;  %v9143_v41 = vpop.permute.xlu1 %4221 }
0x1219   : > { %4229 = vrot.lane.b32.xlu0 %v9143_v41, %s9708_s28  ;;  %4231 = vrot.lane.b32.xlu1 %v9141_v29, %s9708_s28 }
0x121c   : > { %v9149_v28 = vpop.permute.xlu1 %4225 }
0x121d   : > { %4233 = vrot.lane.b32.xlu0 %v9149_v28, %s9708_s28  ;;  %4081 = vrot.lane.b32.xlu1 %v4073_v27, %s9706_s27 }
0x1220   : > { %v4228_v30 = vpop.permute.xlu1 %4227 }
0x1221   : > { %4078 = vrot.lane.b32.xlu0 %v4073_v27, %s9704_s1 }
0x1224   : > { %v4076_v31 = vpop.permute.xlu1 %4075 }
0x128b   : > { %v4230_v33 = vpop.permute.xlu0 %4229  ;;  %v4232_v13 = vpop.permute.xlu1 %4231 }
0x128c   : > { %v4239_v12 = vcombine.low %v4228_v30, %v4232_v13  ;;  %v4240_v11 = vcombine.high %v4228_v30, %v4232_v13 }
0x128e   : > { %v4247_v39 = vrot.slane %v4239_v12, %v8645_v25  ;;  %v4254_v42 = vrot.slane %v4240_v11, %v8645_v25 }
0x128f   : > { %v4234_v36 = vpop.permute.xlu0 %4233  ;;  %v4082_v38 = vpop.permute.xlu1 %4081 }
0x1290   : > { %v4255_v34 = vcombine.low %v4230_v33, %v4234_v36  ;;  %v4256_v35 = vcombine.high %v4230_v33, %v4234_v36  ;;  %v4100_v45 = vcombine.low %v4076_v31, %v4082_v38  ;;  %v4101_v46 = vcombine.high %v4076_v31, %v4082_v38 }
0x1292   : > { %v4263_v43 = vrot.slane %v4255_v34, %v8645_v25  ;;  %v4270_v44 = vrot.slane %v4256_v35, %v8645_v25  ;;  %v4108_v56 = vrot.slane %v4100_v45, %v8645_v25  ;;  %v4115_v57 = vrot.slane %v4101_v46, %v8645_v25 }
0x1293   : > { %v4079_v47 = vpop.permute.xlu0 %4078 }
0x1294   : > { %v4271_v48 = vcombine.low %v4247_v39, %v4263_v43  ;;  %v4272_v49 = vcombine.high %v4247_v39, %v4263_v43  ;;  %v4287_v50 = vcombine.low %v4254_v42, %v4270_v44  ;;  %v4288_v37 = vcombine.high %v4254_v42, %v4270_v44 }
0x1295   : > { %v4084_v40 = vcombine.low %v4073_v27, %v4079_v47  ;;  %v4085_v51 = vcombine.high %v4073_v27, %v4079_v47 }
0x1296   : > { %v4279_v52 = vrot.slane %v4271_v48, %v8647_v32  ;;  %v4286_v53 = vrot.slane %v4272_v49, %v8647_v32  ;;  %v4295_v54 = vrot.slane %v4287_v50, %v8647_v32  ;;  %v4302_v55 = vrot.slane %v4288_v37, %v8647_v32 }
0x1297   : > { %v4092_v58 = vrot.slane %v4084_v40, %v8645_v25  ;;  %v4099_v59 = vrot.slane %v4085_v51, %v8645_v25 }
0x1298   : > { %v4307_v60 = vcombine.low %v4279_v52, %v4286_v53  ;;  %v7447_v61 = vcombine.high %v4279_v52, %v4286_v53  ;;  %v4323_v62 = vcombine.low %v4295_v54, %v4302_v55  ;;  %v7448_v63 = vcombine.high %v4295_v54, %v4302_v55 }
0x1299   : > { %v4116_v1 = vcombine.low %v4092_v58, %v4108_v56  ;;  %v4117_v2 = vcombine.high %v4092_v58, %v4108_v56  ;;  %v4132_v3 = vcombine.low %v4099_v59, %v4115_v57  ;;  %v4133_v4 = vcombine.high %v4099_v59, %v4115_v57 }
0x129a   : > { %v4314_v6 = vrot.slane %v4307_v60, %v8645_v25  ;;  %v4322_v7 = vrot.slane %v7447_v61, %v8645_v25  ;;  %v4330_v9 = vrot.slane %v4323_v62, %v8645_v25  ;;  %v4338_v10 = vrot.slane %v7448_v63, %v8645_v25 }
0x129b   : > { %v4124_v8 = vrot.slane %v4116_v1, %v8647_v32  ;;  %v4131_v14 = vrot.slane %v4117_v2, %v8647_v32  ;;  %v4140_v5 = vrot.slane %v4132_v3, %v8647_v32  ;;  %v4147_v15 = vrot.slane %v4133_v4, %v8647_v32 }
0x129c   : > { %v4339_v16 = vcombine.low %v4314_v6, %v4322_v7  ;;  %v4340_v17 = vcombine.high %v4314_v6, %v4322_v7  ;;  %v4355_v18 = vcombine.low %v4330_v9, %v4338_v10  ;;  %v4356_v19 = vcombine.high %v4330_v9, %v4338_v10 }
0x129d   : > { %v4152_v20 = vcombine.low %v4124_v8, %v4131_v14  ;;  %v7445_v22 = vcombine.high %v4124_v8, %v4131_v14  ;;  %v4168_v23 = vcombine.low %v4140_v5, %v4147_v15  ;;  %v7446_v26 = vcombine.high %v4140_v5, %v4147_v15 }
0x129e   : > { %v4347_v27 = vrot.slane %v4339_v16, %v8647_v32  ;;  %v4363_v30 = vrot.slane %v4355_v18, %v8647_v32  ;;  %v4354_v31 = vrot.slane %v4340_v17, %v8647_v32  ;;  %v4370_v33 = vrot.slane %v4356_v19, %v8647_v32 }
0x129f   : > { %v4159_v13 = vrot.slane %v4152_v20, %v8645_v25  ;;  %v4167_v12 = vrot.slane %v7445_v22, %v8645_v25  ;;  %v4175_v11 = vrot.slane %v4168_v23, %v8645_v25  ;;  %v4183_v36 = vrot.slane %v7446_v26, %v8645_v25 }
0x12a0   : > { %v4371_v34 = vcombine.low %v4347_v27, %v4363_v30  ;;  %v4373_v35 = vcombine.low %v4354_v31, %v4370_v33  ;;  %v4372_v50 = vcombine.high %v4347_v27, %v4363_v30  ;;  %v4374_v40 = vcombine.high %v4354_v31, %v4370_v33 }
0x12a1   : > { %v4184_v38 = vcombine.low %v4159_v13, %v4167_v12  ;;  %v4185_v39 = vcombine.high %v4159_v13, %v4167_v12  ;;  %v4200_v42 = vcombine.low %v4175_v11, %v4183_v36  ;;  %v4201_v43 = vcombine.high %v4175_v11, %v4183_v36 }
0x12a2   : > { %7861 = vmatpush3.xpose.msk.msra.mxu1 %vm1360_vm2, %v4371_v34  ;;  %7871 = vmatpush3.xpose.msk.msra.mxu0 %vm1360_vm2, %v4373_v35 }
0x12a3   : > { %7865 = vmatprep.subr.mxu1 %v8336_v0  ;;  %v4192_v44 = vrot.slane %v4184_v38, %v8647_v32  ;;  %v4208_v45 = vrot.slane %v4200_v42, %v8647_v32  ;;  %v4199_v46 = vrot.slane %v4185_v39, %v8647_v32  ;;  %v4215_v47 = vrot.slane %v4201_v43, %v8647_v32 }
0x12a4   : > { %7880 = vmatprep.subr.mxu0 %v8336_v0 }
0x12a5   : > { %v4216_v48 = vcombine.low %v4192_v44, %v4208_v45  ;;  %v4218_v49 = vcombine.low %v4199_v46, %v4215_v47  ;;  %v4217_v37 = vcombine.high %v4192_v44, %v4208_v45  ;;  %v4219_v51 = vcombine.high %v4199_v46, %v4215_v47 }
0x12a7   : > { %7863 = vmatmul.mubr.msk.f32.vlgmr.msra.gmra.mxu1 %vm1360_vm2, %v4216_v48  ;;  %7873 = vmatmul.mubr.msk.f32.vlgmr.msra.gmra.mxu0 %vm1360_vm2, %v4218_v49 }
0x12a8   : > { %7866 = vmatpush3.xpose.msk.msra.mxu1 %vm1360_vm2, %v4372_v50  ;;  %7867 = vmatprep.mubr.msk.f32.mxu1 %vm8337_vm0, %v8336_v0 }
0x12a9   : > { %7875 = vmatprep.subr.mxu1 %v8336_v0  ;;  %7882 = vmatprep.mubr.msk.f32.mxu0 %vm8337_vm0, %v8336_v0 }
0x12ab   : > { %7868 = vmatmul.mubr.msk.f32.vlgmr.msra.gmra.mxu1 %vm1360_vm2, %v4217_v37 }
0x12ac   : > { %7876 = vmatpush3.xpose.msk.msra.mxu1 %vm1360_vm2, %v4374_v40  ;;  %7877 = vmatprep.mubr.msk.f32.mxu1 %vm8337_vm0, %v8336_v0 }
0x12ad   : > { %7885 = vmatprep.subr.mxu1 %v8336_v0 }
0x12af   : > { %7878 = vmatmul.mubr.msk.f32.vlgmr.msra.gmra.mxu1 %vm1360_vm2, %v4219_v51 }
0x12b0   : > { %7887 = vmatprep.mubr.msk.f32.mxu1 %vm8337_vm0, %v8336_v0 }
0x1367   : > { %v4595_v52 = vpop.f32.mrf.mxu1  ;;  %v4747_v53 = vpop.f32.mrf.mxu0 }
0x1368   : > { %v4827_v54 = vsel %vm1360_vm2, %v4595_v52, -inf  ;;  %v4833_v59 = vsel %vm1360_vm2, %v4747_v53, -inf }
0x1369   : > { %4828 = vmax.xlane.f32.xlu0 %v4827_v54  ;;  %v7864_v55 = vpop.f32.mrf.mxu1  ;;  %v7874_v56 = vpop.f32.mrf.mxu0 }
0x136b   : > { %v4671_v57 = vpop.f32.mrf.mxu1 }
0x136c   : > { %v4830_v58 = vsel %vm1360_vm2, %v4671_v57, -inf }
0x136d   : > { %4831 = vmax.xlane.f32.xlu1 %v4830_v58  ;;  %v7869_v60 = vpop.f32.mrf.mxu1  ;;  %4834 = vmax.xlane.f32.xlu0 %v4833_v59 }
0x136f   : > { %v4823_v61 = vpop.f32.mrf.mxu1 }
0x1370   : > { %v4836_v62 = vsel %vm1360_vm2, %v4823_v61, -inf }
0x1371   : > { %v7879_v63 = vpop.f32.mrf.mxu1  ;;  %4837 = vmax.xlane.f32.xlu0 %v4836_v62 }
0x137e   : > { %4375 = vrot.lane.b32.xlu1 %v9129_v24, %s9713_s11 }
0x13f2   : > { %v4829_v1 = vpop.xlane.xlu0 %4828 }
0x13f3   : > { %v4839_v2 = vsub.f32 %v4595_v52, %v4829_v1 }
0x13f5   : > { %v4843_v3 = vmul.f32 1.442695, %v4839_v2 }
0x13f6   : > { %v4832_v4 = vpop.xlane.xlu1 %4831  ;;  %v4835_v6 = vpop.xlane.xlu0 %4834 }
0x13f7   : > { %8138 = vpow2.f32 %v4843_v3  ;;  %v4840_v7 = vsub.f32 %v4671_v57, %v4832_v4  ;;  %v4841_v9 = vsub.f32 %v4747_v53, %v4835_v6 }
0x13f9   : > { %v4845_v10 = vmul.f32 1.442695, %v4840_v7  ;;  %v4847_v8 = vmul.f32 1.442695, %v4841_v9 }
0x13fa   : > { %v4838_v14 = vpop.xlane.xlu0 %4837  ;;  %v4376_v26 = vpop.permute.xlu1 %4375 }
0x13fb   : > { %8140 = vpow2.f32 %v4845_v10  ;;  %v4842_v5 = vsub.f32 %v4823_v61, %v4838_v14 }
0x13fc   : > { %8142 = vpow2.f32 %v4847_v8 }
0x13fd   : > { %v4849_v15 = vmul.f32 1.442695, %v4842_v5 }
0x13ff   : > { %8144 = vpow2.f32 %v4849_v15 }
0x1404   : > { %v9213_v16 = vpop.eup %8138 }
0x1405   : > { %v4851_v24 = vsel %vm1360_vm2, %v9213_v16, 0.0 }
0x1406   : > { %4852 = vadd.xlane.f32.xlu1 %v4851_v24 }
0x1408   : > { %v8141_v17 = vpop.eup %8140 }
0x1409   : > { %v9217_v18 = vpop.eup %8142  ;;  %v4854_v19 = vsel %vm1360_vm2, %v8141_v17, 0.0 }
0x140a   : > { %4855 = vadd.xlane.f32.xlu0 %v4854_v19  ;;  %v4857_v20 = vsel %vm1360_vm2, %v9217_v18, 0.0 }
0x140b   : > { %4858 = vadd.xlane.f32.xlu1 %v4857_v20 }
0x140c   : > { %v9222_v22 = vpop.eup %8144 }
0x140d   : > { %v4860_v23 = vsel %vm1360_vm2, %v9222_v22, 0.0 }
0x140e   : > { %4861 = vadd.xlane.f32.xlu0 %v4860_v23 }
0x141c   : > { %4379 = vrot.lane.b32.xlu1 %v9141_v29, %s9713_s11 }
0x1420   : > { %4381 = vrot.lane.b32.xlu1 %v9149_v28, %s9713_s11 }
0x1424   : > { %4377 = vrot.lane.b32.xlu0 %v9143_v41, %s9713_s11 }
0x148f   : > { %v4853_v27 = vpop.xlane.xlu1 %4852 }
0x1490   : > { %8146 = vrcp.f32 %v4853_v27 }
0x1493   : > { %v4856_v30 = vpop.xlane.xlu0 %4855 }
0x1494   : > { %v4859_v31 = vpop.xlane.xlu1 %4858  ;;  %8148 = vrcp.f32 %v4856_v30 }
0x1495   : > { %8150 = vrcp.f32 %v4859_v31 }
0x1497   : > { %v4862_v33 = vpop.xlane.xlu0 %4861 }
0x1498   : > { %v4380_v13 = vpop.permute.xlu1 %4379  ;;  %8152 = vrcp.f32 %v4862_v33 }
0x1499   : > { %v4387_v12 = vcombine.low %v4376_v26, %v4380_v13  ;;  %v4388_v11 = vcombine.high %v4376_v26, %v4380_v13 }
0x149b   : > { %v4378_v36 = vpop.permute.xlu0 %4377  ;;  %v4395_v29 = vrot.slane %v4387_v12, %v8645_v25  ;;  %v4402_v28 = vrot.slane %v4388_v11, %v8645_v25 }
0x149c   : > { %v4382_v34 = vpop.permute.xlu1 %4381 }
0x149d   : > { %v4403_v35 = vcombine.low %v4378_v36, %v4382_v34  ;;  %v4404_v38 = vcombine.high %v4378_v36, %v4382_v34  ;;  %v8147_v60 = vpop.eup %8146 }
0x149e   : > { %v4864_v7 = vmul.f32 %v8147_v60, %v9213_v16  ;;  %v7468_v16 = vld [vmem:[%s9699_s6 + $0x38] sm:$0xff] }
0x149f   : > { %v4411_v41 = vrot.slane %v4403_v35, %v8645_v25  ;;  %v4418_v39 = vrot.slane %v4404_v38, %v8645_v25 }
0x14a1   : > { %v4419_v42 = vcombine.low %v4395_v29, %v4411_v41  ;;  %v4420_v43 = vcombine.high %v4395_v29, %v4411_v41  ;;  %v4435_v44 = vcombine.low %v4402_v28, %v4418_v39  ;;  %v4436_v45 = vcombine.high %v4402_v28, %v4418_v39  ;;  %v8149_v61 = vpop.eup %8148  ;;  %v7467_v28 = vld [vmem:[%s9699_s6 + $0x30] sm:$0xff]  ;;  %v7466_v41 = vld [vmem:[%s9699_s6 + $0x28] sm:$0xff] }
0x14a2   : > { %v8151_v3 = vpop.eup %8150  ;;  %v4866_v9 = vmul.f32 %v8149_v61, %v8141_v17 }
0x14a3   : > { %v4427_v46 = vrot.slane %v4419_v42, %v8647_v32  ;;  %v4434_v47 = vrot.slane %v4420_v43, %v8647_v32  ;;  %v4443_v48 = vrot.slane %v4435_v44, %v8647_v32  ;;  %v4450_v49 = vrot.slane %v4436_v45, %v8647_v32 }
0x14a4   : > { %v4868_v5 = vmul.f32 %v8151_v3, %v9217_v18 }
0x14a5   : > { %v4455_v50 = vcombine.low %v4427_v46, %v4434_v47  ;;  %v7449_v37 = vcombine.high %v4427_v46, %v4434_v47  ;;  %v4471_v40 = vcombine.low %v4443_v48, %v4450_v49  ;;  %v7450_v51 = vcombine.high %v4443_v48, %v4450_v49  ;;  %v8153_v10 = vpop.eup %8152  ;;  %v7465_v49 = vld [vmem:[%s9699_s6 + $0x20] sm:$0xff] }
0x14a6   : > { %v4870_v15 = vmul.f32 %v8153_v10, %v9222_v22 }
0x14a7   : > { %v4462_v52 = vrot.slane %v4455_v50, %v8645_v25  ;;  %v4470_v53 = vrot.slane %v7449_v37, %v8645_v25  ;;  %v4478_v54 = vrot.slane %v4471_v40, %v8645_v25  ;;  %v4486_v55 = vrot.slane %v7450_v51, %v8645_v25 }
0x14a9   : > { %v4487_v56 = vcombine.low %v4462_v52, %v4470_v53  ;;  %v4503_v57 = vcombine.low %v4478_v54, %v4486_v55  ;;  %v4488_v58 = vcombine.high %v4462_v52, %v4470_v53  ;;  %v4504_v59 = vcombine.high %v4478_v54, %v4486_v55 }
0x14ab   : > { %v4495_v62 = vrot.slane %v4487_v56, %v8647_v32  ;;  %v4511_v63 = vrot.slane %v4503_v57, %v8647_v32  ;;  %v4502_v1 = vrot.slane %v4488_v58, %v8647_v32  ;;  %v4518_v2 = vrot.slane %v4504_v59, %v8647_v32 }
0x14ad   : > { %v4519_v4 = vcombine.low %v4495_v62, %v4511_v63  ;;  %v4520_v6 = vcombine.high %v4495_v62, %v4511_v63  ;;  %v4521_v8 = vcombine.low %v4502_v1, %v4518_v2  ;;  %v4522_v14 = vcombine.high %v4502_v1, %v4518_v2 }
0x14af   : > { %7881 = vmatpush3.msra.mxu0 %v4519_v4  ;;  %7886 = vmatpush3.msra.mxu1 %v4520_v6 }
0x14b0   : > { %7883 = vmatmul.mubr.msk.f32.vlgmr.msra.gmra.mxu0 %vm1360_vm2, %v4864_v7  ;;  %7888 = vmatmul.mubr.msk.f32.vlgmr.msra.gmra.mxu1 %vm1360_vm2, %v4866_v9  ;;  %v7470_v9 = vld [vmem:[%s9700_s26 + $0x1] ss:$0 sm:$0xff] }
0x14b1   : > { %7890 = vmatprep.subr.mxu0 %v8336_v0  ;;  %7895 = vmatprep.subr.mxu1 %v8336_v0 }
0x14b2   : > { %7891 = vmatpush3.msra.mxu0 %v4521_v8  ;;  %7896 = vmatpush3.msra.mxu1 %v4522_v14 }
0x14b3   : > { %7892 = vmatprep.mubr.msk.f32.mxu0 %vm8337_vm0, %v8336_v0  ;;  %7897 = vmatprep.mubr.msk.f32.mxu1 %vm8337_vm0, %v8336_v0 }
0x14b4   : > { %7893 = vmatmul.mubr.msk.f32.vlgmr.msra.gmra.mxu0 %vm1360_vm2, %v4868_v5  ;;  %7898 = vmatmul.mubr.msk.f32.vlgmr.msra.gmra.mxu1 %vm1360_vm2, %v4870_v15 }
0x14b5   : > { %7900 = vmatprep.subr.mxu0 %v8336_v0  ;;  %7908 = vmatprep.mubr.msk.f32.mxu0 %vm8337_vm0, %v8336_v0 }
0x14b6   : > { %7911 = vmatprep.subr.mxu1 %v8336_v0  ;;  %7919 = vmatprep.mubr.msk.f32.mxu1 %vm8337_vm0, %v8336_v0 }
0x14b7   : > { %7901 = vmatpush3.msra.mxu0 %v7468_v16  ;;  %v7486_v16 = vld [vmem:[%s9701_s7 + $0x38] sm:$0xff] }
0x14b8   : > { %7902 = vmatprep.subr.mxu0 %v8336_v0 }
0x14b9   : > { %7903 = vmatpush3.msra.mxu0 %v7467_v28  ;;  %v7474_v28 = vld [vmem:[%s9631_s16 + $0x1] ss:$0 sm:$0xff] }
0x14ba   : > { %7904 = vmatprep.subr.mxu0 %v8336_v0 }
0x14bb   : > { %7905 = vmatpush3.msra.mxu0 %v7466_v41 }
0x14bc   : > { %7906 = vmatprep.subr.mxu0 %v8336_v0 }
0x14bd   : > { %7907 = vmatpush3.msra.mxu0 %v7465_v49 }
0x14be   : > { %7922 = vmatprep.subr.mxu0 %v8336_v0 }
0x1570   : > { %v4940_v24 = vpop.f32.mrf.mxu0  ;;  %v5013_v17 = vpop.f32.mrf.mxu1 }
0x1572   : > { %v7884_v18 = vpop.f32.mrf.mxu0  ;;  %v7889_v19 = vpop.f32.mrf.mxu1 }
0x1573   : > { %v8176_v18 = vld [vmem:[%s8821_s12] sm:$0xff] }
0x1574   : > { %v5086_v20 = vpop.f32.mrf.mxu0  ;;  %v5159_v22 = vpop.f32.mrf.mxu1 }
0x1575   : > { %v5163_v23 = vcombine.low %v4940_v24, %v5086_v20  ;;  %v5164_v26 = vcombine.high %v4940_v24, %v5086_v20  ;;  %v5179_v27 = vcombine.low %v5013_v17, %v5159_v22  ;;  %v5180_v30 = vcombine.high %v5013_v17, %v5159_v22  ;;  %v7485_v24 = vld [vmem:[%s9701_s7 + $0x30] sm:$0xff]  ;;  %v7484_v17 = vld [vmem:[%s9701_s7 + $0x28] sm:$0xff] }
0x1576   : > { %v7894_v31 = vpop.f32.mrf.mxu0  ;;  %v7899_v33 = vpop.f32.mrf.mxu1 }
0x1577   : > { %v5171_v13 = vrot.slane %v5163_v23, %v8645_v25  ;;  %v5178_v12 = vrot.slane %v5164_v26, %v8645_v25  ;;  %v5187_v11 = vrot.slane %v5179_v27, %v8645_v25  ;;  %v5194_v36 = vrot.slane %v5180_v30, %v8645_v25  ;;  %v7479_v27 = vld [vmem:[%s9703_s25 + $0x38] sm:$0xff]  ;;  %v7478_v30 = vld [vmem:[%s9703_s25 + $0x30] sm:$0xff]  ;;  %v7477_v31 = vld [vmem:[%s9703_s25 + $0x28] sm:$0xff] }
0x1578   : > { %7912 = vmatpush3.msra.mxu1 %v7479_v27  ;;  %v7476_v33 = vld [vmem:[%s9703_s25 + $0x20] sm:$0xff] }
0x1579   : > { %v5195_v34 = vcombine.low %v5171_v13, %v5187_v11  ;;  %v5196_v35 = vcombine.high %v5171_v13, %v5187_v11  ;;  %v5211_v38 = vcombine.low %v5178_v12, %v5194_v36  ;;  %v5212_v29 = vcombine.high %v5178_v12, %v5194_v36  ;;  %7913 = vmatprep.subr.mxu1 %v8336_v0  ;;  %v7488_v13 = vld [vmem:[%s9624_s9 + $0x1] ss:$0 sm:$0xff] }
0x157a   : > { %7914 = vmatpush3.msra.mxu1 %v7478_v30 }
0x157b   : > { %v5203_v39 = vrot.slane %v5195_v34, %v8647_v32  ;;  %v5210_v42 = vrot.slane %v5196_v35, %v8647_v32  ;;  %v5219_v43 = vrot.slane %v5211_v38, %v8647_v32  ;;  %v5226_v44 = vrot.slane %v5212_v29, %v8647_v32  ;;  %7915 = vmatprep.subr.mxu1 %v8336_v0 }
0x157c   : > { %7916 = vmatpush3.msra.mxu1 %v7477_v31 }
0x157d   : > { %v5231_v45 = vcombine.low %v5203_v39, %v5210_v42  ;;  %v7463_v46 = vcombine.high %v5203_v39, %v5210_v42  ;;  %v5247_v47 = vcombine.low %v5219_v43, %v5226_v44  ;;  %v7464_v48 = vcombine.high %v5219_v43, %v5226_v44  ;;  %7917 = vmatprep.subr.mxu1 %v8336_v0  ;;  %v7475_v39 = vld [vmem:[%s9632_s17 + $0x1] ss:$0 sm:$0xff] }
0x157e   : > { %7918 = vmatpush3.msra.mxu1 %v7476_v33 }
0x157f   : > { %v5238_v50 = vrot.slane %v5231_v45, %v8645_v25  ;;  %v5246_v37 = vrot.slane %v7463_v46, %v8645_v25  ;;  %v5254_v40 = vrot.slane %v5247_v47, %v8645_v25  ;;  %v5262_v51 = vrot.slane %v7464_v48, %v8645_v25  ;;  %7933 = vmatprep.subr.mxu1 %v8336_v0 }
0x1581   : > { %v5264_v52 = vcombine.high %v5238_v50, %v5246_v37  ;;  %v5280_v53 = vcombine.high %v5254_v40, %v5262_v51  ;;  %v5263_v54 = vcombine.low %v5238_v50, %v5246_v37  ;;  %v5279_v55 = vcombine.low %v5254_v40, %v5262_v51 }
0x1583   : > { %v5278_v56 = vrot.slane %v5264_v52, %v8647_v32  ;;  %v5294_v57 = vrot.slane %v5280_v53, %v8647_v32  ;;  %v5271_v58 = vrot.slane %v5263_v54, %v8647_v32  ;;  %v5287_v59 = vrot.slane %v5279_v55, %v8647_v32 }
0x1585   : > { %v5297_v60 = vcombine.low %v5278_v56, %v5294_v57  ;;  %v5296_v61 = vcombine.high %v5271_v58, %v5287_v59  ;;  %v5295_v62 = vcombine.low %v5271_v58, %v5287_v59  ;;  %v5298_v63 = vcombine.high %v5278_v56, %v5294_v57 }
0x1587   : > { %5304 = vrot.lane.b32.xlu1 %v5297_v60, %s9709_s8  ;;  %5300 = vrot.lane.b32.xlu0 %v5296_v61, %s9710_s4 }
0x158b   : > { %5308 = vrot.lane.b32.xlu0 %v5298_v63, %s9711_s30 }
0x15f9   : > { %v5301_v1 = vpop.permute.xlu0 %5300  ;;  %v5305_v2 = vpop.permute.xlu1 %5304 }
0x15fa   : > { %v5311_v3 = vsel %vm1360_vm2, %v5295_v62, %v5301_v1 }
0x15fb   : > { %v5312_v6 = vsel %vm2150_vm3, %v5311_v3, %v5305_v2 }
0x15fd   : > { %v5309_v4 = vpop.permute.xlu0 %5308 }
0x15fe   : > { %v5313_v7 = vsel %vm2152_vm4, %v5312_v6, %v5309_v4 }
0x15ff   : > { %7909 = vmatmul.mubr.msk.f32.vlgmr.msra.gmra.mxu0 %vm836_vm1, %v5313_v7 }
0x1600   : > { %7930 = vmatprep.mubr.msk.f32.mxu0 %vm8337_vm0, %v8336_v0  ;;  %7923 = vmatpush3.msra.mxu0 %v7486_v16 }
0x1601   : > { %7924 = vmatprep.subr.mxu0 %v8336_v0 }
0x1602   : > { %7925 = vmatpush3.msra.mxu0 %v7485_v24 }
0x1603   : > { %7926 = vmatprep.subr.mxu0 %v8336_v0 }
0x1604   : > { %7927 = vmatpush3.msra.mxu0 %v7484_v17 }
0x1605   : > { %7928 = vmatprep.subr.mxu0 %v8336_v0 }
0x16bf   : > { %v5396_v10 = vpop.f32.mrf.mxu0 }
0x16c0   : > { %v5397_v8 = vadd.f32 %v7470_v9, %v5396_v10 }
0x16c1   : > { %v7910_v14 = vpop.f32.mrf.mxu0 }
0x16c2   : > { %v5400_v5 = vadd.f32 %v5397_v8, %v9120_v21  ;;  %v7483_v21 = vld [vmem:[%s9701_s7 + $0x20] sm:$0xff] }
0x16c3   : > { %7929 = vmatpush3.msra.mxu0 %v7483_v21 }
0x16c4   : > { %v5405_v15 = vsel %vm836_vm1, %v5400_v5, 0.0  ;;  %7931 = vmatmul.mubr.msk.f32.vlgmr.msra.gmra.mxu0 %vm836_vm1, %v8176_v18  ;;  %7943 = vmatprep.subr.mxu0 %v8336_v0 }
0x16c5   : > { %5406 = vadd.xlane.f32.xlu1 %v5405_v15  ;;  %7945 = vmatprep.mubr.msk.f32.mxu0 %vm8337_vm0, %v8336_v0 }
0x174e   : > { %v5407_v19 = vpop.xlane.xlu1 %5406 }
0x174f   : > { %v5408_v20 = vmul.f32 0.03125, %v5407_v19  ;;  %v7481_v19 = vld [vmem:[%s9707_s29 + $0x1] ss:$0 sm:$0xff] }
0x1751   : > { %v5409_v22 = vsub.f32 %v5400_v5, %v5408_v20 }
0x1753   : > { %v5410_v23 = vmul.f32 %v5409_v22, %v5409_v22 }
0x1755   : > { %v5411_v26 = vsel %vm836_vm1, %v5410_v23, 0.0 }
0x1756   : > { %5412 = vadd.xlane.f32.xlu0 %v5411_v26 }
0x1784   : > { %v5598_v12 = vpop.f32.mrf.mxu0 }
0x1785   : > { %v9353_v11 = vadd.f32 %v7488_v13, %v5598_v12 }
0x1786   : > { %v7932_v36 = vpop.f32.mrf.mxu0 }
0x1787   : > { %5752 = vrot.lane.b32.xlu1 %v9353_v11, %s9704_s1  ;;  %5749 = vrot.lane.b32.xlu0 %v9353_v11, %s9705_s0 }
0x178b   : > { %5755 = vrot.lane.b32.xlu1 %v9353_v11, %s9706_s27 }
0x17df   : > { %v5413_v34 = vpop.xlane.xlu0 %5412 }
0x17e0   : > { %v5414_v35 = vmul.f32 0.03125, %v5413_v34 }
0x17e2   : > { %v5415_v38 = vadd.f32 1e-05, %v5414_v35 }
0x17e4   : > { %8154 = vrsqrt.f32 %v5415_v38 }
0x17f1   : > { %v8155_v29 = vpop.eup %8154 }
0x17f2   : > { %v5417_v41 = vmul.f32 %v8155_v29, %v5409_v22 }
0x17f4   : > { %v5424_v42 = vmul.f32 %v7474_v28, %v5417_v41 }
0x17f6   : > { %v9367_v43 = vadd.f32 %v7475_v39, %v5424_v42 }
0x17f8   : > { %7920 = vmatmul.mubr.msk.f32.vlgmr.msra.gmra.mxu1 %vm836_vm1, %v9367_v43 }
0x17f9   : > { %7935 = vmatprep.mubr.msk.f32.mxu1 %vm8337_vm0, %v8336_v0  ;;  %v9373_v44 = vpop.permute.xlu1 %5752  ;;  %v9381_v48 = vpop.permute.xlu0 %5749 }
0x17fa   : > { %v5758_v45 = vcombine.low %v9353_v11, %v9373_v44  ;;  %v5759_v46 = vcombine.high %v9353_v11, %v9373_v44 }
0x17fc   : > { %v5766_v49 = vrot.slane %v5758_v45, %v8645_v25  ;;  %v5773_v50 = vrot.slane %v5759_v46, %v8645_v25 }
0x17fd   : > { %v9379_v47 = vpop.permute.xlu1 %5755 }
0x17fe   : > { %v5774_v37 = vcombine.low %v9381_v48, %v9379_v47  ;;  %v5775_v40 = vcombine.high %v9381_v48, %v9379_v47 }
0x1800   : > { %v5782_v51 = vrot.slane %v5774_v37, %v8645_v25  ;;  %v5789_v52 = vrot.slane %v5775_v40, %v8645_v25 }
0x1802   : > { %v5790_v53 = vcombine.low %v5766_v49, %v5782_v51  ;;  %v5791_v54 = vcombine.high %v5766_v49, %v5782_v51  ;;  %v5806_v55 = vcombine.low %v5773_v50, %v5789_v52  ;;  %v5807_v56 = vcombine.high %v5773_v50, %v5789_v52 }
0x1804   : > { %v5798_v57 = vrot.slane %v5790_v53, %v8647_v32  ;;  %v5805_v58 = vrot.slane %v5791_v54, %v8647_v32  ;;  %v5814_v59 = vrot.slane %v5806_v55, %v8647_v32  ;;  %v5821_v60 = vrot.slane %v5807_v56, %v8647_v32 }
0x1806   : > { %v5826_v61 = vcombine.low %v5798_v57, %v5805_v58  ;;  %v7492_v62 = vcombine.high %v5798_v57, %v5805_v58  ;;  %v5842_v63 = vcombine.low %v5814_v59, %v5821_v60  ;;  %v7493_v1 = vcombine.high %v5814_v59, %v5821_v60 }
0x1808   : > { %v5833_v2 = vrot.slane %v5826_v61, %v8645_v25  ;;  %v5841_v3 = vrot.slane %v7492_v62, %v8645_v25  ;;  %v5849_v4 = vrot.slane %v5842_v63, %v8645_v25  ;;  %v5857_v6 = vrot.slane %v7493_v1, %v8645_v25 }
0x180a   : > { %v5858_v7 = vcombine.low %v5833_v2, %v5841_v3  ;;  %v5859_v9 = vcombine.high %v5833_v2, %v5841_v3  ;;  %v5874_v10 = vcombine.low %v5849_v4, %v5857_v6  ;;  %v5875_v8 = vcombine.high %v5849_v4, %v5857_v6 }
0x180c   : > { %v5866_v14 = vrot.slane %v5858_v7, %v8647_v32  ;;  %v5882_v5 = vrot.slane %v5874_v10, %v8647_v32  ;;  %v9402_v15 = vrot.slane %v5859_v9, %v8647_v32  ;;  %v9405_v16 = vrot.slane %v5875_v8, %v8647_v32 }
0x180e   : > { %v5890_v24 = vcombine.low %v5866_v14, %v5882_v5  ;;  %v5892_v17 = vcombine.low %v9402_v15, %v9405_v16  ;;  %v5891_v21 = vcombine.high %v5866_v14, %v5882_v5  ;;  %v5893_v18 = vcombine.high %v9402_v15, %v9405_v16 }
0x1810   : > { %7934 = vmatpush3.xpose.msk.msra.mxu1 %vm1360_vm2, %v5890_v24  ;;  %7944 = vmatpush3.xpose.msk.msra.mxu0 %vm1360_vm2, %v5892_v17 }
0x1811   : > { %7938 = vmatprep.subr.mxu1 %v8336_v0  ;;  %7953 = vmatprep.subr.mxu0 %v8336_v0 }
0x18b8   : > { %v5514_v20 = vpop.f32.mrf.mxu1 }
0x18b9   : > { %v5515_v22 = vadd.f32 %v7481_v19, %v5514_v20 }
0x18ba   : > { %v7921_v23 = vpop.f32.mrf.mxu1 }
0x18bb   : > { %v5518_v26 = vmul.f32 0.35355338, %v5515_v22 }
0x18bd   : > { %5606 = vrot.lane.b32.xlu1 %v5518_v26, %s9704_s1  ;;  %5603 = vrot.lane.b32.xlu0 %v5518_v26, %s9705_s0  ;;  %s9717_s0 = sld [smem:[#allocation31_spill]] }
0x18c1   : > { %5609 = vrot.lane.b32.xlu0 %v5518_v26, %s9706_s27  ;;  %s9714_s27 = sld [smem:[#allocation25_spill]] }
0x192f   : > { %v5607_v27 = vpop.permute.xlu1 %5606  ;;  %v5604_v30 = vpop.permute.xlu0 %5603 }
0x1930   : > { %v5612_v31 = vcombine.low %v5518_v26, %v5607_v27  ;;  %v5613_v33 = vcombine.high %v5518_v26, %v5607_v27 }
0x1932   : > { %v5620_v34 = vrot.slane %v5612_v31, %v8645_v25  ;;  %v5627_v35 = vrot.slane %v5613_v33, %v8645_v25 }
0x1933   : > { %v5610_v13 = vpop.permute.xlu0 %5609 }
0x1934   : > { %v5628_v12 = vcombine.low %v5604_v30, %v5610_v13  ;;  %v5629_v36 = vcombine.high %v5604_v30, %v5610_v13 }
0x1936   : > { %v5636_v38 = vrot.slane %v5628_v12, %v8645_v25  ;;  %v5643_v29 = vrot.slane %v5629_v36, %v8645_v25 }
0x1938   : > { %v5644_v28 = vcombine.low %v5620_v34, %v5636_v38  ;;  %v5645_v41 = vcombine.high %v5620_v34, %v5636_v38  ;;  %v5660_v39 = vcombine.low %v5627_v35, %v5643_v29  ;;  %v5661_v42 = vcombine.high %v5627_v35, %v5643_v29 }
0x193a   : > { %v5652_v45 = vrot.slane %v5644_v28, %v8647_v32  ;;  %v5659_v46 = vrot.slane %v5645_v41, %v8647_v32  ;;  %v5668_v49 = vrot.slane %v5660_v39, %v8647_v32  ;;  %v5675_v50 = vrot.slane %v5661_v42, %v8647_v32 }
0x193c   : > { %v5680_v37 = vcombine.low %v5652_v45, %v5659_v46  ;;  %v7490_v40 = vcombine.high %v5652_v45, %v5659_v46  ;;  %v5696_v51 = vcombine.low %v5668_v49, %v5675_v50  ;;  %v7491_v52 = vcombine.high %v5668_v49, %v5675_v50 }
0x193e   : > { %v5687_v53 = vrot.slane %v5680_v37, %v8645_v25  ;;  %v5695_v54 = vrot.slane %v7490_v40, %v8645_v25  ;;  %v5703_v55 = vrot.slane %v5696_v51, %v8645_v25  ;;  %v5711_v56 = vrot.slane %v7491_v52, %v8645_v25 }
0x1940   : > { %v5712_v57 = vcombine.low %v5687_v53, %v5695_v54  ;;  %v5713_v58 = vcombine.high %v5687_v53, %v5695_v54  ;;  %v5728_v59 = vcombine.low %v5703_v55, %v5711_v56  ;;  %v5729_v60 = vcombine.high %v5703_v55, %v5711_v56 }
0x1942   : > { %v5720_v61 = vrot.slane %v5712_v57, %v8647_v32  ;;  %v5736_v62 = vrot.slane %v5728_v59, %v8647_v32  ;;  %v5727_v63 = vrot.slane %v5713_v58, %v8647_v32  ;;  %v5743_v1 = vrot.slane %v5729_v60, %v8647_v32 }
0x1944   : > { %v5744_v2 = vcombine.low %v5720_v61, %v5736_v62  ;;  %v5746_v3 = vcombine.low %v5727_v63, %v5743_v1  ;;  %v5745_v4 = vcombine.high %v5720_v61, %v5736_v62  ;;  %v5747_v6 = vcombine.high %v5727_v63, %v5743_v1 }
0x1946   : > { %7936 = vmatmul.mubr.msk.f32.vlgmr.msra.gmra.mxu1 %vm1360_vm2, %v5744_v2  ;;  %7946 = vmatmul.mubr.msk.f32.vlgmr.msra.gmra.mxu0 %vm1360_vm2, %v5746_v3 }
0x1947   : > { %7939 = vmatpush3.xpose.msk.msra.mxu1 %vm1360_vm2, %v5891_v21  ;;  %7940 = vmatprep.mubr.msk.f32.mxu1 %vm8337_vm0, %v8336_v0 }
0x1948   : > { %7948 = vmatprep.subr.mxu1 %v8336_v0  ;;  %7955 = vmatprep.mubr.msk.f32.mxu0 %vm8337_vm0, %v8336_v0 }
0x194a   : > { %7941 = vmatmul.mubr.msk.f32.vlgmr.msra.gmra.mxu1 %vm1360_vm2, %v5745_v4 }
0x194b   : > { %7949 = vmatpush3.xpose.msk.msra.mxu1 %vm1360_vm2, %v5893_v18  ;;  %7950 = vmatprep.mubr.msk.f32.mxu1 %vm8337_vm0, %v8336_v0 }
0x194c   : > { %7958 = vmatprep.subr.mxu1 %v8336_v0 }
0x194e   : > { %7951 = vmatmul.mubr.msk.f32.vlgmr.msra.gmra.mxu1 %vm1360_vm2, %v5747_v6 }
0x194f   : > { %7960 = vmatprep.mubr.msk.f32.mxu1 %vm8337_vm0, %v8336_v0 }
0x1a06   : > { %v6114_v7 = vpop.f32.mrf.mxu1  ;;  %v6266_v9 = vpop.f32.mrf.mxu0 }
0x1a07   : > { %v6346_v10 = vsel %vm1360_vm2, %v6114_v7, -inf  ;;  %v6352_v21 = vsel %vm1360_vm2, %v6266_v9, -inf }
0x1a08   : > { %6347 = vmax.xlane.f32.xlu1 %v6346_v10  ;;  %v7937_v8 = vpop.f32.mrf.mxu1  ;;  %v7947_v14 = vpop.f32.mrf.mxu0 }
0x1a0a   : > { %v6190_v5 = vpop.f32.mrf.mxu1 }
0x1a0b   : > { %v6349_v15 = vsel %vm1360_vm2, %v6190_v5, -inf }
0x1a0c   : > { %6350 = vmax.xlane.f32.xlu0 %v6349_v15  ;;  %v7942_v16 = vpop.f32.mrf.mxu1 }
0x1a0e   : > { %v6342_v24 = vpop.f32.mrf.mxu1 }
0x1a0f   : > { %v6355_v17 = vsel %vm1360_vm2, %v6342_v24, -inf }
0x1a10   : > { %6356 = vmax.xlane.f32.xlu1 %v6355_v17  ;;  %v7952_v18 = vpop.f32.mrf.mxu1  ;;  %6353 = vmax.xlane.f32.xlu0 %v6352_v21 }
0x1a21   : > { %5896 = vrot.lane.b32.xlu1 %v9381_v48, %s9708_s28 }
0x1a26   : > { %5894 = vrot.lane.b32.xlu0 %v9353_v11, %s9708_s28 }
0x1a91   : > { %v6348_v19 = vpop.xlane.xlu1 %6347 }
0x1a92   : > { %v6358_v20 = vsub.f32 %v6114_v7, %v6348_v19 }
0x1a94   : > { %v6362_v22 = vmul.f32 1.442695, %v6358_v20 }
0x1a95   : > { %v6351_v23 = vpop.xlane.xlu0 %6350 }
0x1a96   : > { %8156 = vpow2.f32 %v6362_v22  ;;  %v6359_v26 = vsub.f32 %v6190_v5, %v6351_v23 }
0x1a98   : > { %v6364_v27 = vmul.f32 1.442695, %v6359_v26 }
0x1a99   : > { %v6357_v30 = vpop.xlane.xlu1 %6356  ;;  %v6354_v31 = vpop.xlane.xlu0 %6353 }
0x1a9a   : > { %8158 = vpow2.f32 %v6364_v27  ;;  %v6361_v33 = vsub.f32 %v6342_v24, %v6357_v30  ;;  %v6360_v13 = vsub.f32 %v6266_v9, %v6354_v31 }
0x1a9c   : > { %v6368_v12 = vmul.f32 1.442695, %v6361_v33  ;;  %v6366_v36 = vmul.f32 1.442695, %v6360_v13 }
0x1a9d   : > { %v5897_v39 = vpop.permute.xlu1 %5896  ;;  %v5895_v42 = vpop.permute.xlu0 %5894 }
0x1a9e   : > { %8160 = vpow2.f32 %v6368_v12 }
0x1a9f   : > { %8162 = vpow2.f32 %v6366_v36 }
0x1aa3   : > { %v9461_v48 = vpop.eup %8156 }
0x1aa4   : > { %v6370_v11 = vsel %vm1360_vm2, %v9461_v48, 0.0 }
0x1aa5   : > { %6371 = vadd.xlane.f32.xlu0 %v6370_v11 }
0x1aa7   : > { %v8159_v34 = vpop.eup %8158 }
0x1aa8   : > { %v6373_v35 = vsel %vm1360_vm2, %v8159_v34, 0.0 }
0x1aa9   : > { %6374 = vadd.xlane.f32.xlu1 %v6373_v35 }
0x1aab   : > { %v9466_v38 = vpop.eup %8160 }
0x1aac   : > { %v9468_v29 = vpop.eup %8162  ;;  %v6379_v28 = vsel %vm1360_vm2, %v9466_v38, 0.0 }
0x1aad   : > { %6380 = vadd.xlane.f32.xlu1 %v6379_v28  ;;  %v6376_v41 = vsel %vm1360_vm2, %v9468_v29, 0.0 }
0x1aae   : > { %6377 = vadd.xlane.f32.xlu0 %v6376_v41 }
0x1abe   : > { %5898 = vrot.lane.b32.xlu1 %v9373_v44, %s9708_s28 }
0x1ac4   : > { %5900 = vrot.lane.b32.xlu0 %v9379_v47, %s9708_s28 }
0x1b2e   : > { %v6372_v46 = vpop.xlane.xlu0 %6371 }
0x1b2f   : > { %8164 = vrcp.f32 %v6372_v46 }
0x1b32   : > { %v6375_v45 = vpop.xlane.xlu1 %6374 }
0x1b33   : > { %8166 = vrcp.f32 %v6375_v45 }
0x1b36   : > { %v6381_v49 = vpop.xlane.xlu1 %6380 }
0x1b37   : > { %v6378_v50 = vpop.xlane.xlu0 %6377  ;;  %8168 = vrcp.f32 %v6381_v49 }
0x1b38   : > { %8170 = vrcp.f32 %v6378_v50 }
0x1b3a   : > { %v5899_v37 = vpop.permute.xlu1 %5898 }
0x1b3b   : > { %v5906_v40 = vcombine.low %v5895_v42, %v5899_v37  ;;  %v5907_v51 = vcombine.high %v5895_v42, %v5899_v37  ;;  %v5901_v52 = vpop.permute.xlu0 %5900 }
0x1b3c   : > { %v5922_v53 = vcombine.low %v5897_v39, %v5901_v52  ;;  %v5923_v54 = vcombine.high %v5897_v39, %v5901_v52  ;;  %v8165_v24 = vpop.eup %8164 }
0x1b3d   : > { %v5914_v55 = vrot.slane %v5906_v40, %v8645_v25  ;;  %v5921_v44 = vrot.slane %v5907_v51, %v8645_v25  ;;  %v6383_v27 = vmul.f32 %v8165_v24, %v9461_v48  ;;  %v6837_v48 = vld [vmem:[#allocation2 + $0x38] sm:$0xff] }
0x1b3e   : > { %v5930_v47 = vrot.slane %v5922_v53, %v8645_v25  ;;  %v5937_v56 = vrot.slane %v5923_v54, %v8645_v25 }
0x1b40   : > { %v5938_v57 = vcombine.low %v5914_v55, %v5930_v47  ;;  %v5939_v58 = vcombine.high %v5914_v55, %v5930_v47  ;;  %v5954_v59 = vcombine.low %v5921_v44, %v5937_v56  ;;  %v5955_v60 = vcombine.high %v5921_v44, %v5937_v56  ;;  %v8167_v17 = vpop.eup %8166  ;;  %v6836_v44 = vld [vmem:[#allocation2 + $0x30] sm:$0xff]  ;;  %v6835_v47 = vld [vmem:[#allocation2 + $0x28] sm:$0xff] }
0x1b41   : > { %v6385_v30 = vmul.f32 %v8167_v17, %v8159_v34 }
0x1b42   : > { %v5946_v61 = vrot.slane %v5938_v57, %v8647_v32  ;;  %v5953_v62 = vrot.slane %v5939_v58, %v8647_v32  ;;  %v5962_v63 = vrot.slane %v5954_v59, %v8647_v32  ;;  %v5969_v1 = vrot.slane %v5955_v60, %v8647_v32 }
0x1b44   : > { %v5974_v2 = vcombine.low %v5946_v61, %v5953_v62  ;;  %v7494_v3 = vcombine.high %v5946_v61, %v5953_v62  ;;  %v5990_v4 = vcombine.low %v5962_v63, %v5969_v1  ;;  %v7495_v6 = vcombine.high %v5962_v63, %v5969_v1  ;;  %v8169_v22 = vpop.eup %8168  ;;  %v6834_v1 = vld [vmem:[#allocation2 + $0x20] sm:$0xff] }
0x1b45   : > { %v8171_v31 = vpop.eup %8170  ;;  %v6389_v36 = vmul.f32 %v8169_v22, %v9466_v38 }
0x1b46   : > { %v5981_v7 = vrot.slane %v5974_v2, %v8645_v25  ;;  %v5989_v9 = vrot.slane %v7494_v3, %v8645_v25  ;;  %v5997_v10 = vrot.slane %v5990_v4, %v8645_v25  ;;  %v6005_v8 = vrot.slane %v7495_v6, %v8645_v25 }
0x1b47   : > { %v6387_v12 = vmul.f32 %v8171_v31, %v9468_v29 }
0x1b48   : > { %v6006_v14 = vcombine.low %v5981_v7, %v5989_v9  ;;  %v6022_v5 = vcombine.low %v5997_v10, %v6005_v8  ;;  %v6007_v15 = vcombine.high %v5981_v7, %v5989_v9  ;;  %v6023_v16 = vcombine.high %v5997_v10, %v6005_v8 }
0x1b4a   : > { %v6014_v21 = vrot.slane %v6006_v14, %v8647_v32  ;;  %v6030_v18 = vrot.slane %v6022_v5, %v8647_v32  ;;  %v6021_v19 = vrot.slane %v6007_v15, %v8647_v32  ;;  %v6037_v20 = vrot.slane %v6023_v16, %v8647_v32 }
0x1b4c   : > { %v6038_v23 = vcombine.low %v6014_v21, %v6030_v18  ;;  %v6039_v26 = vcombine.high %v6014_v21, %v6030_v18  ;;  %v6040_v33 = vcombine.low %v6021_v19, %v6037_v20  ;;  %v6041_v13 = vcombine.high %v6021_v19, %v6037_v20 }
0x1b4e   : > { %7954 = vmatpush3.msra.mxu0 %v6038_v23  ;;  %7959 = vmatpush3.msra.mxu1 %v6039_v26 }
0x1b4f   : > { %7956 = vmatmul.mubr.msk.f32.vlgmr.msra.gmra.mxu0 %vm1360_vm2, %v6383_v27  ;;  %7961 = vmatmul.mubr.msk.f32.vlgmr.msra.gmra.mxu1 %vm1360_vm2, %v6385_v30 }
0x1b50   : > { %7963 = vmatprep.subr.mxu0 %v8336_v0  ;;  %7968 = vmatprep.subr.mxu1 %v8336_v0 }
0x1b51   : > { %7964 = vmatpush3.msra.mxu0 %v6040_v33  ;;  %7969 = vmatpush3.msra.mxu1 %v6041_v13 }
0x1b52   : > { %7965 = vmatprep.mubr.msk.f32.mxu0 %vm8337_vm0, %v8336_v0  ;;  %7970 = vmatprep.mubr.msk.f32.mxu1 %vm8337_vm0, %v8336_v0 }
0x1b53   : > { %7966 = vmatmul.mubr.msk.f32.vlgmr.msra.gmra.mxu0 %vm1360_vm2, %v6387_v12  ;;  %7971 = vmatmul.mubr.msk.f32.vlgmr.msra.gmra.mxu1 %vm1360_vm2, %v6389_v36 }
0x1b54   : > { %7973 = vmatprep.subr.mxu0 %v8336_v0  ;;  %7981 = vmatprep.mubr.msk.f32.mxu0 %vm8337_vm0, %v8336_v0 }
0x1b55   : > { %7984 = vmatprep.subr.mxu1 %v8336_v0  ;;  %7992 = vmatprep.mubr.msk.f32.mxu1 %vm8337_vm0, %v8336_v0 }
0x1b56   : > { %7974 = vmatpush3.msra.mxu0 %v6837_v48 }
0x1b57   : > { %7975 = vmatprep.subr.mxu0 %v8336_v0 }
0x1b58   : > { %7976 = vmatpush3.msra.mxu0 %v6836_v44  ;;  %v7520_v44 = vld [vmem:[%s9629_s14 + $0x48] sm:$0xff] }
0x1b59   : > { %7977 = vmatprep.subr.mxu0 %v8336_v0 }
0x1b5a   : > { %7978 = vmatpush3.msra.mxu0 %v6835_v47  ;;  %v7519_v47 = vld [vmem:[%s9629_s14 + $0x40] sm:$0xff] }
0x1b5b   : > { %7979 = vmatprep.subr.mxu0 %v8336_v0 }
0x1b5c   : > { %7980 = vmatpush3.msra.mxu0 %v6834_v1 }
0x1b5d   : > { %7995 = vmatprep.subr.mxu0 %v8336_v0 }
0x1c0f   : > { %v6459_v11 = vpop.f32.mrf.mxu0  ;;  %v6532_v34 = vpop.f32.mrf.mxu1 }
0x1c11   : > { %v7957_v35 = vpop.f32.mrf.mxu0  ;;  %v7962_v38 = vpop.f32.mrf.mxu1 }
0x1c12   : > { %v6955_v35 = vld [vmem:[#allocation4 + $0x38] sm:$0xff]  ;;  %v6954_v38 = vld [vmem:[#allocation4 + $0x30] sm:$0xff] }
0x1c13   : > { %v6605_v29 = vpop.f32.mrf.mxu0  ;;  %v6678_v28 = vpop.f32.mrf.mxu1  ;;  %7985 = vmatpush3.msra.mxu1 %v6955_v35 }
0x1c14   : > { %v6682_v41 = vcombine.low %v6459_v11, %v6605_v29  ;;  %v6683_v39 = vcombine.high %v6459_v11, %v6605_v29  ;;  %v6698_v42 = vcombine.low %v6532_v34, %v6678_v28  ;;  %v6699_v45 = vcombine.high %v6532_v34, %v6678_v28  ;;  %7986 = vmatprep.subr.mxu1 %v8336_v0  ;;  %v6953_v29 = vld [vmem:[#allocation4 + $0x28] sm:$0xff]  ;;  %v7526_v28 = vld [vmem:[%s9629_s14 + $0x78] sm:$0xff] }
0x1c15   : > { %v7967_v46 = vpop.f32.mrf.mxu0  ;;  %v7972_v49 = vpop.f32.mrf.mxu1  ;;  %7987 = vmatpush3.msra.mxu1 %v6954_v38 }
0x1c16   : > { %v6690_v50 = vrot.slane %v6682_v41, %v8645_v25  ;;  %v6697_v37 = vrot.slane %v6683_v39, %v8645_v25  ;;  %v6706_v40 = vrot.slane %v6698_v42, %v8645_v25  ;;  %v6713_v51 = vrot.slane %v6699_v45, %v8645_v25  ;;  %7988 = vmatprep.subr.mxu1 %v8336_v0  ;;  %v7525_v41 = vld [vmem:[%s9629_s14 + $0x70] sm:$0xff]  ;;  %v7524_v39 = vld [vmem:[%s9629_s14 + $0x68] sm:$0xff]  ;;  %v7523_v42 = vld [vmem:[%s9629_s14 + $0x60] sm:$0xff] }
0x1c17   : > { %7989 = vmatpush3.msra.mxu1 %v6953_v29  ;;  %v7522_v45 = vld [vmem:[%s9629_s14 + $0x58] sm:$0xff] }
0x1c18   : > { %v6714_v52 = vcombine.low %v6690_v50, %v6706_v40  ;;  %v6715_v53 = vcombine.high %v6690_v50, %v6706_v40  ;;  %v6730_v54 = vcombine.low %v6697_v37, %v6713_v51  ;;  %v6731_v55 = vcombine.high %v6697_v37, %v6713_v51  ;;  %7990 = vmatprep.subr.mxu1 %v8336_v0  ;;  %v7515_v40 = vld [vmem:[%s9633_s18 + $0x1] ss:$0 sm:$0xff] }
0x1c1a   : > { %v6722_v56 = vrot.slane %v6714_v52, %v8647_v32  ;;  %v6729_v57 = vrot.slane %v6715_v53, %v8647_v32  ;;  %v6738_v58 = vrot.slane %v6730_v54, %v8647_v32  ;;  %v6745_v59 = vrot.slane %v6731_v55, %v8647_v32  ;;  %v7516_v52 = vld [vmem:[%s9634_s19 + $0x1] ss:$0 sm:$0xff]  ;;  %v7521_v55 = vld [vmem:[%s9629_s14 + $0x50] sm:$0xff] }
0x1c1c   : > { %v6750_v60 = vcombine.low %v6722_v56, %v6729_v57  ;;  %v7508_v61 = vcombine.high %v6722_v56, %v6729_v57  ;;  %v6766_v62 = vcombine.low %v6738_v58, %v6745_v59  ;;  %v7509_v63 = vcombine.high %v6738_v58, %v6745_v59  ;;  %v7517_v56 = vld [vmem:[#allocation6 + $0x1] ss:$0 sm:$0xff] }
0x1c1e   : > { %v6757_v2 = vrot.slane %v6750_v60, %v8645_v25  ;;  %v6765_v3 = vrot.slane %v7508_v61, %v8645_v25  ;;  %v6773_v4 = vrot.slane %v6766_v62, %v8645_v25  ;;  %v6781_v6 = vrot.slane %v7509_v63, %v8645_v25  ;;  %v7527_v61 = vld [vmem:[#allocation7 + $0x1] ss:$0 sm:$0xff] }
0x1c20   : > { %v6783_v7 = vcombine.high %v6757_v2, %v6765_v3  ;;  %v6799_v9 = vcombine.high %v6773_v4, %v6781_v6  ;;  %v6782_v10 = vcombine.low %v6757_v2, %v6765_v3  ;;  %v6798_v8 = vcombine.low %v6773_v4, %v6781_v6 }
0x1c22   : > { %v6797_v14 = vrot.slane %v6783_v7, %v8647_v32  ;;  %v6813_v5 = vrot.slane %v6799_v9, %v8647_v32  ;;  %v6790_v15 = vrot.slane %v6782_v10, %v8647_v32  ;;  %v6806_v16 = vrot.slane %v6798_v8, %v8647_v32  ;;  %v7511_v32 = vld [vmem:[%s9714_s27 + $0x1] ss:$0 sm:$0xff]  ;;  %s822_s27 = scalar_lea.vmem %s9717_s0, %s9715_s23 }
0x1c23   : > { %v7163_v8 = vld [vmem:[#allocation9 + $0x18] sm:$0xff] }
0x1c24   : > { %v6816_v24 = vcombine.low %v6797_v14, %v6813_v5  ;;  %v6815_v17 = vcombine.high %v6790_v15, %v6806_v16  ;;  %v6814_v21 = vcombine.low %v6790_v15, %v6806_v16  ;;  %v6817_v25 = vcombine.high %v6797_v14, %v6813_v5  ;;  %v7162_v14 = vld [vmem:[#allocation9 + $0x10] sm:$0xff]  ;;  %v7161_v5 = vld [vmem:[#allocation9 + $0x8] sm:$0xff]  ;;  %v7160_v15 = vld [vmem:[#allocation9] sm:$0xff] }
0x1c26   : > { %6823 = vrot.lane.b32.xlu0 %v6816_v24, %s9709_s8  ;;  %6819 = vrot.lane.b32.xlu1 %v6815_v17, %s9710_s4 }
0x1c2a   : > { %6827 = vrot.lane.b32.xlu1 %v6817_v25, %s9711_s30  ;;  %v7531_v25 = vld [vmem:[%s9635_s20 + $0x1] ss:$0 sm:$0xff] }
0x1c98   : > { %v6820_v18 = vpop.permute.xlu1 %6819  ;;  %v6824_v19 = vpop.permute.xlu0 %6823 }
0x1c99   : > { %v6830_v20 = vsel %vm1360_vm2, %v6814_v21, %v6820_v18 }
0x1c9a   : > { %v6831_v23 = vsel %vm2150_vm3, %v6830_v20, %v6824_v19  ;;  %v7532_v19 = vld [vmem:[%s9636_s21 + $0x1] ss:$0 sm:$0xff] }
0x1c9c   : > { %v6828_v22 = vpop.permute.xlu1 %6827 }
0x1c9d   : > { %v6832_v26 = vsel %vm2152_vm4, %v6831_v23, %v6828_v22 }
0x1c9e   : > { %7982 = vmatmul.mubr.msk.f32.vlgmr.msra.gmra.mxu0 %vm836_vm1, %v6832_v26 }
0x1c9f   : > { %8011 = vmatprep.mubr.msk.f32.mxu0 %vm8337_vm0, %v8336_v0  ;;  %7996 = vmatpush3.msra.mxu0 %v7526_v28 }
0x1ca0   : > { %7997 = vmatprep.subr.mxu0 %v8336_v0 }
0x1ca1   : > { %7998 = vmatpush3.msra.mxu0 %v7525_v41 }
0x1ca2   : > { %7999 = vmatprep.subr.mxu0 %v8336_v0 }
0x1ca3   : > { %8000 = vmatpush3.msra.mxu0 %v7524_v39 }
0x1ca4   : > { %8001 = vmatprep.subr.mxu0 %v8336_v0 }
0x1ca5   : > { %8002 = vmatpush3.msra.mxu0 %v7523_v42 }
0x1ca6   : > { %8003 = vmatprep.subr.mxu0 %v8336_v0 }
0x1ca7   : > { %8004 = vmatpush3.msra.mxu0 %v7522_v45 }
0x1ca8   : > { %8005 = vmatprep.subr.mxu0 %v8336_v0 }
0x1ca9   : > { %8006 = vmatpush3.msra.mxu0 %v7521_v55 }
0x1caa   : > { %8007 = vmatprep.subr.mxu0 %v8336_v0 }
0x1cab   : > { %8008 = vmatpush3.msra.mxu0 %v7520_v44 }
0x1cac   : > { %8009 = vmatprep.subr.mxu0 %v8336_v0 }
0x1cad   : > { %8010 = vmatpush3.msra.mxu0 %v7519_v47 }
0x1d5e   : > { %v6915_v27 = vpop.f32.mrf.mxu0 }
0x1d5f   : > { %v6916_v30 = vadd.f32 %v7511_v32, %v6915_v27 }
0x1d60   : > { %v7983_v31 = vpop.f32.mrf.mxu0 }
0x1d61   : > { %v6919_v33 = vadd.f32 %v6916_v30, %v9367_v43  ;;  %v6952_v43 = vld [vmem:[#allocation4 + $0x20] sm:$0xff] }
0x1d62   : > { %7991 = vmatpush3.msra.mxu1 %v6952_v43 }
0x1d63   : > { %v6924_v13 = vsel %vm836_vm1, %v6919_v33, 0.0  ;;  %8014 = vmatprep.subr.mxu1 %v8336_v0 }
0x1d64   : > { %6925 = vadd.xlane.f32.xlu0 %v6924_v13 }
0x1ded   : > { %v6926_v12 = vpop.xlane.xlu0 %6925 }
0x1dee   : > { %v6927_v36 = vmul.f32 0.03125, %v6926_v12 }
0x1df0   : > { %v6928_v48 = vsub.f32 %v6919_v33, %v6927_v36 }
0x1df2   : > { %v6929_v11 = vmul.f32 %v6928_v48, %v6928_v48 }
0x1df4   : > { %v6930_v34 = vsel %vm836_vm1, %v6929_v11, 0.0 }
0x1df5   : > { %6931 = vadd.xlane.f32.xlu1 %v6930_v34 }
0x1e7e   : > { %v6932_v46 = vpop.xlane.xlu1 %6931 }
0x1e7f   : > { %v6933_v49 = vmul.f32 0.03125, %v6932_v46 }
0x1e81   : > { %v6934_v50 = vadd.f32 1e-05, %v6933_v49 }
0x1e83   : > { %8172 = vrsqrt.f32 %v6934_v50 }
0x1e90   : > { %v8173_v37 = vpop.eup %8172 }
0x1e91   : > { %v6936_v51 = vmul.f32 %v8173_v37, %v6928_v48 }
0x1e93   : > { %v6943_v53 = vmul.f32 %v7515_v40, %v6936_v51 }
0x1e95   : > { %v6950_v54 = vadd.f32 %v7516_v52, %v6943_v53 }
0x1e97   : > { %7993 = vmatmul.mubr.msk.f32.vlgmr.msra.gmra.mxu1 %vm836_vm1, %v6950_v54 }
0x1e98   : > { %8022 = vmatprep.mubr.msk.f32.mxu1 %vm8337_vm0, %v8336_v0  ;;  %8015 = vmatpush3.msra.mxu1 %v7163_v8 }
0x1e99   : > { %8016 = vmatprep.subr.mxu1 %v8336_v0 }
0x1e9a   : > { %8017 = vmatpush3.msra.mxu1 %v7162_v14 }
0x1e9b   : > { %8018 = vmatprep.subr.mxu1 %v8336_v0 }
0x1e9c   : > { %8019 = vmatpush3.msra.mxu1 %v7161_v5 }
0x1e9d   : > { %8020 = vmatprep.subr.mxu1 %v8336_v0  ;;  %v7533_v0 = vld [vmem:[%s9716_s5] ss:$0 sm:$0xff] }
0x1e9e   : > { %8021 = vmatpush3.msra.mxu1 %v7160_v15 }
0x1f57   : > { %v7033_v57 = vpop.f32.mrf.mxu1 }
0x1f58   : > { %v7034_v58 = vadd.f32 %v7517_v56, %v7033_v57 }
0x1f59   : > { %v7994_v59 = vpop.f32.mrf.mxu1 }
0x1f5a   : > { %v7037_v60 = vmax.f32 %v7034_v58, 0.0 }
0x1f5c   : > { %8012 = vmatmul.mubr.msk.f32.vlgmr.msra.gmra.mxu0 %vm3883_vm5, %v7037_v60 }
0x201c   : > { %v7124_v62 = vpop.f32.mrf.mxu0 }
0x201d   : > { %v7125_v63 = vadd.f32 %v7527_v61, %v7124_v62 }
0x201e   : > { %v8013_v1 = vpop.f32.mrf.mxu0 }
0x201f   : > { %v7128_v2 = vadd.f32 %v7125_v63, %v6950_v54 }
0x2021   : > { %v7133_v3 = vsel %vm836_vm1, %v7128_v2, 0.0 }
0x2022   : > { %7134 = vadd.xlane.f32.xlu0 %v7133_v3 }
0x20ab   : > { %v7135_v4 = vpop.xlane.xlu0 %7134 }
0x20ac   : > { %v7136_v6 = vmul.f32 0.03125, %v7135_v4 }
0x20ae   : > { %v7137_v7 = vsub.f32 %v7128_v2, %v7136_v6 }
0x20b0   : > { %v7138_v9 = vmul.f32 %v7137_v7, %v7137_v7 }
0x20b2   : > { %v7139_v10 = vsel %vm836_vm1, %v7138_v9, 0.0 }
0x20b3   : > { %7140 = vadd.xlane.f32.xlu0 %v7139_v10 }
0x213c   : > { %v7141_v16 = vpop.xlane.xlu0 %7140 }
0x213d   : > { %v7142_v24 = vmul.f32 0.03125, %v7141_v16 }
0x213f   : > { %v7143_v17 = vadd.f32 1e-05, %v7142_v24 }
0x2141   : > { %8174 = vrsqrt.f32 %v7143_v17 }
0x214e   : > { %v8175_v21 = vpop.eup %8174 }
0x214f   : > { %v7145_v18 = vmul.f32 %v8175_v21, %v7137_v7 }
0x2151   : > { %v7152_v20 = vmul.f32 %v7531_v25, %v7145_v18 }
0x2153   : > { %v7159_v22 = vadd.f32 %v7532_v19, %v7152_v20 }
0x2155   : > { %8023 = vmatmul.mubr.msk.f32.vlgmr.msra.gmra.mxu1 %vm836_vm1, %v7159_v22 }
0x2215   : > { %v7240_v23 = vpop.f32.mrf.mxu1 }
0x2216   : > { %v7241_v26 = vadd.f32 %v7533_v0, %v7240_v23 }
0x2217   : > { %v8024_v32 = vpop.f32.mrf.mxu1 }
0x2218   : > { %7244 = vst [vmem:[%s822_s27] sm:$0xff] %v7241_v26 }
0x2219 PF: > { %s9718_s28 = sld [smem:[#allocation13_spill]] }
0x221f   : > { %s37_s5 = sadd.s32 1, %s9718_s28  }
0x2220   : > { %p34_p2 = scmp.ge.s32.totalorder %s37_s5, 4  }
0x2222   :  { %36 = sbr.rel (!%p34_p2) target bundleno = 21 (0x15), region = 190 }
0x2227   :  { %7264 = vsyncpa [#allocation3], 1 }
0x2228   :  { %7266 = vsyncpa [#allocation3 + $0x1], 1 }
0x2229   :  { %7267 = vsyncpa [#allocation5], 1 }
0x222a   :  { %7268 = vsyncpa [#allocation8], 1 }

</bundles_post_ra>
